<compile_context>
chip_gen: v7x
topology: tpu7x:2x2x1
jax: 0.10.0
libtpu: 0.0.40
codegen_flags: <defaults>
</compile_context>

<pallas_src>
import functools

import jax
import jax.numpy as jnp
from jax.experimental import pallas as pl
from jax.experimental.pallas import tpu as pltpu

VOCAB = 9002
EMBED = 300           # logical embedding dim (PyTorch)
E_PAD = 384           # padded to multiple of 128 (lane aligned)
CONV_C = 250          # logical conv output channels
C_PAD = 256           # padded
HID = 150             # logical hidden units
HID_PAD = 256         # padded
OUT = 2               # logical outputs
OUT_PAD = 128         # lane-dense output slab


def _round_up(x, m):
    return (x + m - 1) // m * m


def _cnn_kernel(x_ref,                          # (b_blk, Lp, E_PAD)  compute dtype
                w1_ref, b1_ref,                 # (2, E_PAD, C_PAD), (1, C_PAD)
                w2_ref, b2_ref,                 # (3, E_PAD, C_PAD), (1, C_PAD)
                w3_ref, b3_ref,                 # (4, E_PAD, C_PAD), (1, C_PAD)
                wl1a_ref, wl1b_ref, wl1c_ref,   # (C_PAD, HID_PAD) each
                bl1_ref,                        # (1, HID_PAD)
                wl2_ref, bl2_ref,               # (HID_PAD, OUT_PAD), (1, OUT_PAD)
                o_ref,                          # (b_blk, OUT_PAD)
                *, seq_len, t_w, b_blk):
    L = seq_len
    T_W = t_w                                   # 8-aligned conv output window
    cdt = x_ref.dtype                           # bf16 (fast path) or f32
    m = b_blk * T_W                             # matmul M for the conv taps

    def conv_relu_max(w_ref, b_ref, k, start, t_out):
        # conv1d as k shifted (m, E_PAD) @ (E_PAD, C_PAD) MXU matmuls with f32
        # accumulation.  The per-tap slice window is 8-sublane / 128-lane
        # aligned (T_W % 8 == 0, E_PAD % 128 == 0), so slice + reshape is one
        # cheap tile-aligned copy rather than a ragged relayout.
        acc = None
        for dt in range(k):                     # static, unrolled
            xs = x_ref[:, start + dt:start + dt + T_W, :].reshape(m, E_PAD)
            y = jnp.dot(xs, w_ref[dt], preferred_element_type=jnp.float32)
            acc = y if acc is None else acc + y
        acc = jnp.maximum(acc + b_ref[...], 0.0)          # ReLU(conv + bias)
        acc = acc.reshape(b_blk, T_W, C_PAD)
        if t_out < T_W:
            # Padded window positions MUST be zeroed (not left as ReLU(bias))
            # before the time-max.  Exact because ReLU outputs are >= 0.
            tpos = jax.lax.broadcasted_iota(jnp.int32, (b_blk, T_W, C_PAD), 1)
            acc = jnp.where(tpos < t_out, acc, 0.0)
        return jnp.max(acc, axis=1)                       # (b_blk, C_PAD)

    f1 = conv_relu_max(w1_ref, b1_ref, 2, 1, L - 1)       # conv_1: k=2, pad=0
    f2 = conv_relu_max(w2_ref, b2_ref, 3, 0, L)           # conv_2: k=3, pad=1
    f3 = conv_relu_max(w3_ref, b3_ref, 4, 0, L - 1)       # conv_3: k=4, pad=1

    # TODO(synk): dropout (p=0.5) is eval-mode identity here.

    # linear_1 on the (virtual) concat [f1|f2|f3] without jnp.concatenate:
    # split weight slabs, accumulate three MXU matmuls in f32.
    pre = (jnp.dot(f1.astype(cdt), wl1a_ref[...], preferred_element_type=jnp.float32)
           + jnp.dot(f2.astype(cdt), wl1b_ref[...], preferred_element_type=jnp.float32)
           + jnp.dot(f3.astype(cdt), wl1c_ref[...], preferred_element_type=jnp.float32)
           + bl1_ref[...])
    h = jnp.maximum(pre, 0.0)                             # (b_blk, HID_PAD)

    out = (jnp.dot(h.astype(cdt), wl2_ref[...], preferred_element_type=jnp.float32)
           + bl2_ref[...])                                # (b_blk, OUT_PAD)
    o_ref[...] = out.astype(o_ref.dtype)


def prepare_params(params, compute_dtype=jnp.bfloat16):
    """Zero-pad E/channel/hidden/output dims to 128-multiples, split wl1, cast."""
    def pad_to(a, shape):
        return jnp.pad(a, [(0, t - s) for s, t in zip(a.shape, shape)])

    wl1 = params["wl1"]                                   # (750, 150)
    return {
        # Padded + compute-dtype table: the gather output needs no extra pad/cast.
        "emb": pad_to(params["emb"], (VOCAB, E_PAD)).astype(compute_dtype),
        "w1": pad_to(params["w1"], (2, E_PAD, C_PAD)).astype(compute_dtype),
        "b1": pad_to(params["b1"], (1, C_PAD)).astype(jnp.float32),
        "w2": pad_to(params["w2"], (3, E_PAD, C_PAD)).astype(compute_dtype),
        "b2": pad_to(params["b2"], (1, C_PAD)).astype(jnp.float32),
        "w3": pad_to(params["w3"], (4, E_PAD, C_PAD)).astype(compute_dtype),
        "b3": pad_to(params["b3"], (1, C_PAD)).astype(jnp.float32),
        "wl1a": pad_to(wl1[0:CONV_C], (C_PAD, HID_PAD)).astype(compute_dtype),
        "wl1b": pad_to(wl1[CONV_C:2 * CONV_C], (C_PAD, HID_PAD)).astype(compute_dtype),
        "wl1c": pad_to(wl1[2 * CONV_C:3 * CONV_C], (C_PAD, HID_PAD)).astype(compute_dtype),
        "bl1": pad_to(params["bl1"], (1, HID_PAD)).astype(jnp.float32),
        "wl2": pad_to(params["wl2"], (HID_PAD, OUT_PAD)).astype(compute_dtype),
        "bl2": pad_to(params["bl2"], (1, OUT_PAD)).astype(jnp.float32),
    }


def cnn_forward(token_ids, kparams, *, b_blk=128):
    """token_ids: (B, L) int32.  kparams: output of prepare_params()."""
    compute_dtype = kparams["w1"].dtype
    B, L = token_ids.shape

    # Conv output window padded to a multiple of 8; x time axis padded so every
    # per-tap slice [start+dt, start+dt+T_W) stays in range.  Layout (time):
    #   [0] = left zero pad, [1..L] = tokens, [L+1..Lp-1] = right zero pad.
    # Extra right zeros only feed masked (invalid) window positions.
    t_w = _round_up(L, 8)
    lp = _round_up(t_w + 3, 8)

    # Batch blocking: cap the block at the 8-rounded batch so a tiny batch does
    # not compute a full padded block; for large B, cdiv naturally keeps >= 2
    # "parallel" blocks so both v7x TensorCores get work.
    b_blk = max(8, min(b_blk, _round_up(B, 8)))
    n_blocks = pl.cdiv(B, b_blk)
    b_pad = n_blocks * b_blk

    # XLA glue: embedding gather (already compute dtype, E_PAD wide) + ONE fused
    # pad for batch and time.  See TODO(synk) at top about in-kernel gather.
    embeds = jnp.take(kparams["emb"], token_ids, axis=0)          # (B, L, E_PAD)
    x = jnp.pad(embeds, ((0, b_pad - B), (1, lp - 1 - L), (0, 0)))  # (b_pad, Lp, E_PAD)

    kernel = functools.partial(_cnn_kernel, seq_len=L, t_w=t_w, b_blk=b_blk)

    rep3 = lambda shape: pl.BlockSpec(shape, lambda b: (0, 0, 0))
    rep2 = lambda shape: pl.BlockSpec(shape, lambda b: (0, 0))

    out = pl.pallas_call(
        kernel,
        out_shape=jax.ShapeDtypeStruct((b_pad, OUT_PAD), jnp.float32),
        grid=(n_blocks,),
        in_specs=[
            pl.BlockSpec((b_blk, lp, E_PAD), lambda b: (b, 0, 0)),
            rep3((2, E_PAD, C_PAD)), rep2((1, C_PAD)),
            rep3((3, E_PAD, C_PAD)), rep2((1, C_PAD)),
            rep3((4, E_PAD, C_PAD)), rep2((1, C_PAD)),
            rep2((C_PAD, HID_PAD)), rep2((C_PAD, HID_PAD)), rep2((C_PAD, HID_PAD)),
            rep2((1, HID_PAD)),
            rep2((HID_PAD, OUT_PAD)), rep2((1, OUT_PAD)),
        ],
        out_specs=pl.BlockSpec((b_blk, OUT_PAD), lambda b: (b, 0)),
        compiler_params=pltpu.CompilerParams(
            # batch blocks are independent -> megacore-shardable on v7x
            dimension_semantics=("parallel",),
            # ~12-16 MiB actually used at b_blk=128; raise to ~40 MiB if b_blk
            # is pushed to 256 (still well inside v7x's 64 MiB physical VMEM).
            vmem_limit_bytes=32 * 1024 * 1024),
    )(x,
      kparams["w1"], kparams["b1"],
      kparams["w2"], kparams["b2"],
      kparams["w3"], kparams["b3"],
      kparams["wl1a"], kparams["wl1b"], kparams["wl1c"], kparams["bl1"],
      kparams["wl2"], kparams["bl2"])

    return out[:B, :OUT]


def ref_forward(token_ids, params):
    """Pure-JAX f32 reference matching PyTorch semantics (eval-mode dropout)."""
    emb = jnp.take(params["emb"], token_ids, axis=0)      # (B, L, E)
    x = jnp.transpose(emb, (0, 2, 1))                     # (B, E, L)  (NCH)

    def conv1d(x, w_keC, b, pad):
        w_pt = jnp.transpose(w_keC, (2, 1, 0))            # (Cout, Cin, k)
        y = jax.lax.conv_general_dilated(
            x, w_pt, window_strides=(1,), padding=[(pad, pad)],
            dimension_numbers=("NCH", "OIH", "NCH"))
        return y + b.reshape(1, -1, 1)

    c1 = jnp.max(jax.nn.relu(conv1d(x, params["w1"], params["b1"], 0)), axis=-1)
    c2 = jnp.max(jax.nn.relu(conv1d(x, params["w2"], params["b2"], 1)), axis=-1)
    c3 = jnp.max(jax.nn.relu(conv1d(x, params["w3"], params["b3"], 1)), axis=-1)
    feat = jnp.concatenate([c1, c2, c3], axis=-1)         # (B, 750)
    h = jax.nn.relu(feat @ params["wl1"] + params["bl1"].reshape(-1))
    return h @ params["wl2"] + params["bl2"].reshape(-1)


def init_params(key):
    ks = jax.random.split(key, 11)
    s = 0.05
    return {
        "emb": jax.random.normal(ks[0], (VOCAB, EMBED), jnp.float32) * 0.1,
        "w1": jax.random.normal(ks[1], (2, EMBED, CONV_C), jnp.float32) * s,
        "b1": jax.random.normal(ks[2], (1, CONV_C), jnp.float32) * s,
        "w2": jax.random.normal(ks[3], (3, EMBED, CONV_C), jnp.float32) * s,
        "b2": jax.random.normal(ks[4], (1, CONV_C), jnp.float32) * s,
        "w3": jax.random.normal(ks[5], (4, EMBED, CONV_C), jnp.float32) * s,
        "b3": jax.random.normal(ks[6], (1, CONV_C), jnp.float32) * s,
        "wl1": jax.random.normal(ks[7], (3 * CONV_C, HID), jnp.float32) * s,
        "bl1": jax.random.normal(ks[8], (1, HID), jnp.float32) * s,
        "wl2": jax.random.normal(ks[9], (HID, OUT), jnp.float32) * s,
        "bl2": jax.random.normal(ks[10], (1, OUT), jnp.float32) * s,
    }


if __name__ == "__main__":
    key = jax.random.PRNGKey(0)
    pkey, tkey = jax.random.split(key)
    params = init_params(pkey)

    B, L = 2, 8
    token_ids = jax.random.randint(tkey, (B, L), 0, VOCAB, dtype=jnp.int32)

    ref = jax.block_until_ready(ref_forward(token_ids, params))

    # f32 compute path: tight regression gate on the kernel logic.
    kp_f32 = prepare_params(params, jnp.float32)
    out_f32 = jax.block_until_ready(cnn_forward(token_ids, kp_f32))
    assert out_f32.shape == (B, OUT), out_f32.shape
    assert jnp.allclose(out_f32, ref, atol=1e-3, rtol=1e-3), (out_f32, ref)

    # bf16 compute path (fast / default): tolerance sized for bf16 rounding
    # with f32 accumulation.
    kp_bf16 = prepare_params(params, jnp.bfloat16)
    out_bf16 = jax.block_until_ready(cnn_forward(token_ids, kp_bf16))
    assert out_bf16.shape == (B, OUT), out_bf16.shape
    assert jnp.allclose(out_bf16, ref, atol=2e-2, rtol=2e-2), (out_bf16, ref)

    print("KERNEL_OK")
</pallas_src>

<mosaic_0001>
module attributes {stable_mosaic.version = 11 : i64} {
  func.func @_cnn_kernel(%arg0: i32, %arg1: memref<8x16x384xf32, #tpu.memory_space<vmem>>, %arg2: memref<2x384x256xf32, #tpu.memory_space<vmem>>, %arg3: memref<1x256xf32, #tpu.memory_space<vmem>>, %arg4: memref<3x384x256xf32, #tpu.memory_space<vmem>>, %arg5: memref<1x256xf32, #tpu.memory_space<vmem>>, %arg6: memref<4x384x256xf32, #tpu.memory_space<vmem>>, %arg7: memref<1x256xf32, #tpu.memory_space<vmem>>, %arg8: memref<256x256xf32, #tpu.memory_space<vmem>>, %arg9: memref<256x256xf32, #tpu.memory_space<vmem>>, %arg10: memref<256x256xf32, #tpu.memory_space<vmem>>, %arg11: memref<1x256xf32, #tpu.memory_space<vmem>>, %arg12: memref<256x128xf32, #tpu.memory_space<vmem>>, %arg13: memref<1x128xf32, #tpu.memory_space<vmem>>, %arg14: memref<8x128xf32, #tpu.memory_space<vmem>>) attributes {dimension_semantics = [#tpu.dimension_semantics<parallel>], iteration_bounds = array<i64: 1>, scalar_prefetch = 0 : i64, scratch_operands = 0 : i64, tpu.core_type = #tpu.core_type<tc>, window_params = [{transform_indices = @transform_0, window_bounds = array<i64: 8, 16, 384>}, {pipeline_mode = #tpu.pipeline_mode<synchronous>, transform_indices = @transform_1, window_bounds = array<i64: 2, 384, 256>}, {pipeline_mode = #tpu.pipeline_mode<synchronous>, transform_indices = @transform_2, window_bounds = array<i64: 1, 256>}, {pipeline_mode = #tpu.pipeline_mode<synchronous>, transform_indices = @transform_3, window_bounds = array<i64: 3, 384, 256>}, {pipeline_mode = #tpu.pipeline_mode<synchronous>, transform_indices = @transform_4, window_bounds = array<i64: 1, 256>}, {pipeline_mode = #tpu.pipeline_mode<synchronous>, transform_indices = @transform_5, window_bounds = array<i64: 4, 384, 256>}, {pipeline_mode = #tpu.pipeline_mode<synchronous>, transform_indices = @transform_6, window_bounds = array<i64: 1, 256>}, {pipeline_mode = #tpu.pipeline_mode<synchronous>, transform_indices = @transform_7, window_bounds = array<i64: 256, 256>}, {pipeline_mode = #tpu.pipeline_mode<synchronous>, transform_indices = @transform_8, window_bounds = array<i64: 256, 256>}, {pipeline_mode = #tpu.pipeline_mode<synchronous>, transform_indices = @transform_9, window_bounds = array<i64: 256, 256>}, {pipeline_mode = #tpu.pipeline_mode<synchronous>, transform_indices = @transform_10, window_bounds = array<i64: 1, 256>}, {pipeline_mode = #tpu.pipeline_mode<synchronous>, transform_indices = @transform_11, window_bounds = array<i64: 256, 128>}, {pipeline_mode = #tpu.pipeline_mode<synchronous>, transform_indices = @transform_12, window_bounds = array<i64: 1, 128>}, {transform_indices = @transform_13, window_bounds = array<i64: 8, 128>}]} {
    %c0 = arith.constant 0 : index
    %c1 = arith.constant 1 : index
    %c0_0 = arith.constant 0 : index
    %0 = vector.load %arg1[%c0, %c1, %c0_0] : memref<8x16x384xf32, #tpu.memory_space<vmem>>, vector<8x8x384xf32>
    %1 = vector.shape_cast %0 : vector<8x8x384xf32> to vector<64x384xf32>
    %c0_1 = arith.constant 0 : index
    %c0_2 = arith.constant 0 : index
    %c0_3 = arith.constant 0 : index
    %2 = vector.load %arg2[%c0_1, %c0_2, %c0_3] : memref<2x384x256xf32, #tpu.memory_space<vmem>>, vector<1x384x256xf32>
    %3 = vector.shape_cast %2 : vector<1x384x256xf32> to vector<384x256xf32>
    %cst = arith.constant dense<0.000000e+00> : vector<64x256xf32>
    %4 = tpu.matmul %1, %3, %cst {dimension_numbers = #tpu.dot_dimension_numbers<[1], [0], [0], [1], [0, 0, 1, 1], [], []>} : vector<64x384xf32>, vector<384x256xf32>, vector<64x256xf32> -> vector<64x256xf32>
    %c0_4 = arith.constant 0 : index
    %c2 = arith.constant 2 : index
    %c0_5 = arith.constant 0 : index
    %5 = vector.load %arg1[%c0_4, %c2, %c0_5] : memref<8x16x384xf32, #tpu.memory_space<vmem>>, vector<8x8x384xf32>
    %6 = vector.shape_cast %5 : vector<8x8x384xf32> to vector<64x384xf32>
    %c1_6 = arith.constant 1 : index
    %c0_7 = arith.constant 0 : index
    %c0_8 = arith.constant 0 : index
    %7 = vector.load %arg2[%c1_6, %c0_7, %c0_8] : memref<2x384x256xf32, #tpu.memory_space<vmem>>, vector<1x384x256xf32>
    %8 = vector.shape_cast %7 : vector<1x384x256xf32> to vector<384x256xf32>
    %cst_9 = arith.constant dense<0.000000e+00> : vector<64x256xf32>
    %9 = tpu.matmul %6, %8, %cst_9 {dimension_numbers = #tpu.dot_dimension_numbers<[1], [0], [0], [1], [0, 0, 1, 1], [], []>} : vector<64x384xf32>, vector<384x256xf32>, vector<64x256xf32> -> vector<64x256xf32>
    %10 = arith.addf %4, %9 : vector<64x256xf32>
    %c0_10 = arith.constant 0 : index
    %c0_11 = arith.constant 0 : index
    %11 = vector.load %arg3[%c0_10, %c0_11] : memref<1x256xf32, #tpu.memory_space<vmem>>, vector<1x256xf32>
    %12 = vector.broadcast %11 : vector<1x256xf32> to vector<64x256xf32>
    %13 = arith.addf %10, %12 : vector<64x256xf32>
    %cst_12 = arith.constant 0.000000e+00 : f32
    %14 = vector.broadcast %cst_12 : f32 to vector<64x256xf32>
    %15 = arith.maximumf %13, %14 : vector<64x256xf32>
    %16 = vector.shape_cast %15 : vector<64x256xf32> to vector<8x8x256xf32>
    %17 = tpu.iota {dimensions = array<i32: 1>} : vector<8x8x256xi32>
    %c7_i32 = arith.constant 7 : i32
    %18 = vector.broadcast %c7_i32 : i32 to vector<8x8x256xi32>
    %19 = arith.cmpi slt, %17, %18 : vector<8x8x256xi32>
    %cst_13 = arith.constant 0.000000e+00 : f32
    %20 = vector.broadcast %cst_13 : f32 to vector<8x8x256xf32>
    %21 = arith.select %19, %16, %20 : vector<8x8x256xi1>, vector<8x8x256xf32>
    %cst_14 = arith.constant dense<0xFF800000> : vector<8x256xf32>
    %22 = vector.multi_reduction <maximumf>, %21, %cst_14 [1] : vector<8x8x256xf32> to vector<8x256xf32>
    %c0_15 = arith.constant 0 : index
    %c0_16 = arith.constant 0 : index
    %c0_17 = arith.constant 0 : index
    %23 = vector.load %arg1[%c0_15, %c0_16, %c0_17] : memref<8x16x384xf32, #tpu.memory_space<vmem>>, vector<8x8x384xf32>
    %24 = vector.shape_cast %23 : vector<8x8x384xf32> to vector<64x384xf32>
    %c0_18 = arith.constant 0 : index
    %c0_19 = arith.constant 0 : index
    %c0_20 = arith.constant 0 : index
    %25 = vector.load %arg4[%c0_18, %c0_19, %c0_20] : memref<3x384x256xf32, #tpu.memory_space<vmem>>, vector<1x384x256xf32>
    %26 = vector.shape_cast %25 : vector<1x384x256xf32> to vector<384x256xf32>
    %cst_21 = arith.constant dense<0.000000e+00> : vector<64x256xf32>
    %27 = tpu.matmul %24, %26, %cst_21 {dimension_numbers = #tpu.dot_dimension_numbers<[1], [0], [0], [1], [0, 0, 1, 1], [], []>} : vector<64x384xf32>, vector<384x256xf32>, vector<64x256xf32> -> vector<64x256xf32>
    %c0_22 = arith.constant 0 : index
    %c1_23 = arith.constant 1 : index
    %c0_24 = arith.constant 0 : index
    %28 = vector.load %arg1[%c0_22, %c1_23, %c0_24] : memref<8x16x384xf32, #tpu.memory_space<vmem>>, vector<8x8x384xf32>
    %29 = vector.shape_cast %28 : vector<8x8x384xf32> to vector<64x384xf32>
    %c1_25 = arith.constant 1 : index
    %c0_26 = arith.constant 0 : index
    %c0_27 = arith.constant 0 : index
    %30 = vector.load %arg4[%c1_25, %c0_26, %c0_27] : memref<3x384x256xf32, #tpu.memory_space<vmem>>, vector<1x384x256xf32>
    %31 = vector.shape_cast %30 : vector<1x384x256xf32> to vector<384x256xf32>
    %cst_28 = arith.constant dense<0.000000e+00> : vector<64x256xf32>
    %32 = tpu.matmul %29, %31, %cst_28 {dimension_numbers = #tpu.dot_dimension_numbers<[1], [0], [0], [1], [0, 0, 1, 1], [], []>} : vector<64x384xf32>, vector<384x256xf32>, vector<64x256xf32> -> vector<64x256xf32>
    %33 = arith.addf %27, %32 : vector<64x256xf32>
    %c0_29 = arith.constant 0 : index
    %c2_30 = arith.constant 2 : index
    %c0_31 = arith.constant 0 : index
    %34 = vector.load %arg1[%c0_29, %c2_30, %c0_31] : memref<8x16x384xf32, #tpu.memory_space<vmem>>, vector<8x8x384xf32>
    %35 = vector.shape_cast %34 : vector<8x8x384xf32> to vector<64x384xf32>
    %c2_32 = arith.constant 2 : index
    %c0_33 = arith.constant 0 : index
    %c0_34 = arith.constant 0 : index
    %36 = vector.load %arg4[%c2_32, %c0_33, %c0_34] : memref<3x384x256xf32, #tpu.memory_space<vmem>>, vector<1x384x256xf32>
    %37 = vector.shape_cast %36 : vector<1x384x256xf32> to vector<384x256xf32>
    %cst_35 = arith.constant dense<0.000000e+00> : vector<64x256xf32>
    %38 = tpu.matmul %35, %37, %cst_35 {dimension_numbers = #tpu.dot_dimension_numbers<[1], [0], [0], [1], [0, 0, 1, 1], [], []>} : vector<64x384xf32>, vector<384x256xf32>, vector<64x256xf32> -> vector<64x256xf32>
    %39 = arith.addf %33, %38 : vector<64x256xf32>
    %c0_36 = arith.constant 0 : index
    %c0_37 = arith.constant 0 : index
    %40 = vector.load %arg5[%c0_36, %c0_37] : memref<1x256xf32, #tpu.memory_space<vmem>>, vector<1x256xf32>
    %41 = vector.broadcast %40 : vector<1x256xf32> to vector<64x256xf32>
    %42 = arith.addf %39, %41 : vector<64x256xf32>
    %cst_38 = arith.constant 0.000000e+00 : f32
    %43 = vector.broadcast %cst_38 : f32 to vector<64x256xf32>
    %44 = arith.maximumf %42, %43 : vector<64x256xf32>
    %45 = vector.shape_cast %44 : vector<64x256xf32> to vector<8x8x256xf32>
    %cst_39 = arith.constant dense<0xFF800000> : vector<8x256xf32>
    %46 = vector.multi_reduction <maximumf>, %45, %cst_39 [1] : vector<8x8x256xf32> to vector<8x256xf32>
    %c0_40 = arith.constant 0 : index
    %c0_41 = arith.constant 0 : index
    %c0_42 = arith.constant 0 : index
    %47 = vector.load %arg1[%c0_40, %c0_41, %c0_42] : memref<8x16x384xf32, #tpu.memory_space<vmem>>, vector<8x8x384xf32>
    %48 = vector.shape_cast %47 : vector<8x8x384xf32> to vector<64x384xf32>
    %c0_43 = arith.constant 0 : index
    %c0_44 = arith.constant 0 : index
    %c0_45 = arith.constant 0 : index
    %49 = vector.load %arg6[%c0_43, %c0_44, %c0_45] : memref<4x384x256xf32, #tpu.memory_space<vmem>>, vector<1x384x256xf32>
    %50 = vector.shape_cast %49 : vector<1x384x256xf32> to vector<384x256xf32>
    %cst_46 = arith.constant dense<0.000000e+00> : vector<64x256xf32>
    %51 = tpu.matmul %48, %50, %cst_46 {dimension_numbers = #tpu.dot_dimension_numbers<[1], [0], [0], [1], [0, 0, 1, 1], [], []>} : vector<64x384xf32>, vector<384x256xf32>, vector<64x256xf32> -> vector<64x256xf32>
    %c0_47 = arith.constant 0 : index
    %c1_48 = arith.constant 1 : index
    %c0_49 = arith.constant 0 : index
    %52 = vector.load %arg1[%c0_47, %c1_48, %c0_49] : memref<8x16x384xf32, #tpu.memory_space<vmem>>, vector<8x8x384xf32>
    %53 = vector.shape_cast %52 : vector<8x8x384xf32> to vector<64x384xf32>
    %c1_50 = arith.constant 1 : index
    %c0_51 = arith.constant 0 : index
    %c0_52 = arith.constant 0 : index
    %54 = vector.load %arg6[%c1_50, %c0_51, %c0_52] : memref<4x384x256xf32, #tpu.memory_space<vmem>>, vector<1x384x256xf32>
    %55 = vector.shape_cast %54 : vector<1x384x256xf32> to vector<384x256xf32>
    %cst_53 = arith.constant dense<0.000000e+00> : vector<64x256xf32>
    %56 = tpu.matmul %53, %55, %cst_53 {dimension_numbers = #tpu.dot_dimension_numbers<[1], [0], [0], [1], [0, 0, 1, 1], [], []>} : vector<64x384xf32>, vector<384x256xf32>, vector<64x256xf32> -> vector<64x256xf32>
    %57 = arith.addf %51, %56 : vector<64x256xf32>
    %c0_54 = arith.constant 0 : index
    %c2_55 = arith.constant 2 : index
    %c0_56 = arith.constant 0 : index
    %58 = vector.load %arg1[%c0_54, %c2_55, %c0_56] : memref<8x16x384xf32, #tpu.memory_space<vmem>>, vector<8x8x384xf32>
    %59 = vector.shape_cast %58 : vector<8x8x384xf32> to vector<64x384xf32>
    %c2_57 = arith.constant 2 : index
    %c0_58 = arith.constant 0 : index
    %c0_59 = arith.constant 0 : index
    %60 = vector.load %arg6[%c2_57, %c0_58, %c0_59] : memref<4x384x256xf32, #tpu.memory_space<vmem>>, vector<1x384x256xf32>
    %61 = vector.shape_cast %60 : vector<1x384x256xf32> to vector<384x256xf32>
    %cst_60 = arith.constant dense<0.000000e+00> : vector<64x256xf32>
    %62 = tpu.matmul %59, %61, %cst_60 {dimension_numbers = #tpu.dot_dimension_numbers<[1], [0], [0], [1], [0, 0, 1, 1], [], []>} : vector<64x384xf32>, vector<384x256xf32>, vector<64x256xf32> -> vector<64x256xf32>
    %63 = arith.addf %57, %62 : vector<64x256xf32>
    %c0_61 = arith.constant 0 : index
    %c3 = arith.constant 3 : index
    %c0_62 = arith.constant 0 : index
    %64 = vector.load %arg1[%c0_61, %c3, %c0_62] : memref<8x16x384xf32, #tpu.memory_space<vmem>>, vector<8x8x384xf32>
    %65 = vector.shape_cast %64 : vector<8x8x384xf32> to vector<64x384xf32>
    %c3_63 = arith.constant 3 : index
    %c0_64 = arith.constant 0 : index
    %c0_65 = arith.constant 0 : index
    %66 = vector.load %arg6[%c3_63, %c0_64, %c0_65] : memref<4x384x256xf32, #tpu.memory_space<vmem>>, vector<1x384x256xf32>
    %67 = vector.shape_cast %66 : vector<1x384x256xf32> to vector<384x256xf32>
    %cst_66 = arith.constant dense<0.000000e+00> : vector<64x256xf32>
    %68 = tpu.matmul %65, %67, %cst_66 {dimension_numbers = #tpu.dot_dimension_numbers<[1], [0], [0], [1], [0, 0, 1, 1], [], []>} : vector<64x384xf32>, vector<384x256xf32>, vector<64x256xf32> -> vector<64x256xf32>
    %69 = arith.addf %63, %68 : vector<64x256xf32>
    %c0_67 = arith.constant 0 : index
    %c0_68 = arith.constant 0 : index
    %70 = vector.load %arg7[%c0_67, %c0_68] : memref<1x256xf32, #tpu.memory_space<vmem>>, vector<1x256xf32>
    %71 = vector.broadcast %70 : vector<1x256xf32> to vector<64x256xf32>
    %72 = arith.addf %69, %71 : vector<64x256xf32>
    %cst_69 = arith.constant 0.000000e+00 : f32
    %73 = vector.broadcast %cst_69 : f32 to vector<64x256xf32>
    %74 = arith.maximumf %72, %73 : vector<64x256xf32>
    %75 = vector.shape_cast %74 : vector<64x256xf32> to vector<8x8x256xf32>
    %76 = tpu.iota {dimensions = array<i32: 1>} : vector<8x8x256xi32>
    %c7_i32_70 = arith.constant 7 : i32
    %77 = vector.broadcast %c7_i32_70 : i32 to vector<8x8x256xi32>
    %78 = arith.cmpi slt, %76, %77 : vector<8x8x256xi32>
    %cst_71 = arith.constant 0.000000e+00 : f32
    %79 = vector.broadcast %cst_71 : f32 to vector<8x8x256xf32>
    %80 = arith.select %78, %75, %79 : vector<8x8x256xi1>, vector<8x8x256xf32>
    %cst_72 = arith.constant dense<0xFF800000> : vector<8x256xf32>
    %81 = vector.multi_reduction <maximumf>, %80, %cst_72 [1] : vector<8x8x256xf32> to vector<8x256xf32>
    %c0_73 = arith.constant 0 : index
    %c0_74 = arith.constant 0 : index
    %82 = vector.load %arg8[%c0_73, %c0_74] : memref<256x256xf32, #tpu.memory_space<vmem>>, vector<256x256xf32>
    %cst_75 = arith.constant dense<0.000000e+00> : vector<8x256xf32>
    %83 = tpu.matmul %22, %82, %cst_75 {dimension_numbers = #tpu.dot_dimension_numbers<[1], [0], [0], [1], [0, 0, 1, 1], [], []>} : vector<8x256xf32>, vector<256x256xf32>, vector<8x256xf32> -> vector<8x256xf32>
    %c0_76 = arith.constant 0 : index
    %c0_77 = arith.constant 0 : index
    %84 = vector.load %arg9[%c0_76, %c0_77] : memref<256x256xf32, #tpu.memory_space<vmem>>, vector<256x256xf32>
    %cst_78 = arith.constant dense<0.000000e+00> : vector<8x256xf32>
    %85 = tpu.matmul %46, %84, %cst_78 {dimension_numbers = #tpu.dot_dimension_numbers<[1], [0], [0], [1], [0, 0, 1, 1], [], []>} : vector<8x256xf32>, vector<256x256xf32>, vector<8x256xf32> -> vector<8x256xf32>
    %86 = arith.addf %83, %85 : vector<8x256xf32>
    %c0_79 = arith.constant 0 : index
    %c0_80 = arith.constant 0 : index
    %87 = vector.load %arg10[%c0_79, %c0_80] : memref<256x256xf32, #tpu.memory_space<vmem>>, vector<256x256xf32>
    %cst_81 = arith.constant dense<0.000000e+00> : vector<8x256xf32>
    %88 = tpu.matmul %81, %87, %cst_81 {dimension_numbers = #tpu.dot_dimension_numbers<[1], [0], [0], [1], [0, 0, 1, 1], [], []>} : vector<8x256xf32>, vector<256x256xf32>, vector<8x256xf32> -> vector<8x256xf32>
    %89 = arith.addf %86, %88 : vector<8x256xf32>
    %c0_82 = arith.constant 0 : index
    %c0_83 = arith.constant 0 : index
    %90 = vector.load %arg11[%c0_82, %c0_83] : memref<1x256xf32, #tpu.memory_space<vmem>>, vector<1x256xf32>
    %91 = vector.broadcast %90 : vector<1x256xf32> to vector<8x256xf32>
    %92 = arith.addf %89, %91 : vector<8x256xf32>
    %cst_84 = arith.constant 0.000000e+00 : f32
    %93 = vector.broadcast %cst_84 : f32 to vector<8x256xf32>
    %94 = arith.maximumf %92, %93 : vector<8x256xf32>
    %c0_85 = arith.constant 0 : index
    %c0_86 = arith.constant 0 : index
    %95 = vector.load %arg12[%c0_85, %c0_86] : memref<256x128xf32, #tpu.memory_space<vmem>>, vector<256x128xf32>
    %cst_87 = arith.constant dense<0.000000e+00> : vector<8x128xf32>
    %96 = tpu.matmul %94, %95, %cst_87 {dimension_numbers = #tpu.dot_dimension_numbers<[1], [0], [0], [1], [0, 0, 1, 1], [], []>} : vector<8x256xf32>, vector<256x128xf32>, vector<8x128xf32> -> vector<8x128xf32>
    %c0_88 = arith.constant 0 : index
    %c0_89 = arith.constant 0 : index
    %97 = vector.load %arg13[%c0_88, %c0_89] : memref<1x128xf32, #tpu.memory_space<vmem>>, vector<1x128xf32>
    %98 = vector.broadcast %97 : vector<1x128xf32> to vector<8x128xf32>
    %99 = arith.addf %96, %98 : vector<8x128xf32>
    %c0_90 = arith.constant 0 : index
    %c0_91 = arith.constant 0 : index
    %100 = vector.load %arg14[%c0_90, %c0_91] : memref<8x128xf32, #tpu.memory_space<vmem>>, vector<8x128xf32>
    tpu.vector_store %arg14[%c0_90, %c0_91], %99 {strides = array<i32>} : memref<8x128xf32, #tpu.memory_space<vmem>>, vector<8x128xf32>,
    return
  }
  func.func @transform_0(%arg0: i32) -> (i32, i32, i32) {
    %c0_i32 = arith.constant 0 : i32
    %c0_i32_0 = arith.constant 0 : i32
    %c0_i32_1 = arith.constant 0 : i32
    return %arg0, %c0_i32, %c0_i32_0 : i32, i32, i32
  }
  func.func @transform_1(%arg0: i32) -> (i32, i32, i32) {
    %c0_i32 = arith.constant 0 : i32
    %c0_i32_0 = arith.constant 0 : i32
    %c0_i32_1 = arith.constant 0 : i32
    %c0_i32_2 = arith.constant 0 : i32
    return %c0_i32, %c0_i32_0, %c0_i32_1 : i32, i32, i32
  }
  func.func @transform_2(%arg0: i32) -> (i32, i32) {
    %c0_i32 = arith.constant 0 : i32
    %c0_i32_0 = arith.constant 0 : i32
    %c0_i32_1 = arith.constant 0 : i32
    return %c0_i32, %c0_i32_0 : i32, i32
  }
  func.func @transform_3(%arg0: i32) -> (i32, i32, i32) {
    %c0_i32 = arith.constant 0 : i32
    %c0_i32_0 = arith.constant 0 : i32
    %c0_i32_1 = arith.constant 0 : i32
    %c0_i32_2 = arith.constant 0 : i32
    return %c0_i32, %c0_i32_0, %c0_i32_1 : i32, i32, i32
  }
  func.func @transform_4(%arg0: i32) -> (i32, i32) {
    %c0_i32 = arith.constant 0 : i32
    %c0_i32_0 = arith.constant 0 : i32
    %c0_i32_1 = arith.constant 0 : i32
    return %c0_i32, %c0_i32_0 : i32, i32
  }
  func.func @transform_5(%arg0: i32) -> (i32, i32, i32) {
    %c0_i32 = arith.constant 0 : i32
    %c0_i32_0 = arith.constant 0 : i32
    %c0_i32_1 = arith.constant 0 : i32
    %c0_i32_2 = arith.constant 0 : i32
    return %c0_i32, %c0_i32_0, %c0_i32_1 : i32, i32, i32
  }
  func.func @transform_6(%arg0: i32) -> (i32, i32) {
    %c0_i32 = arith.constant 0 : i32
    %c0_i32_0 = arith.constant 0 : i32
    %c0_i32_1 = arith.constant 0 : i32
    return %c0_i32, %c0_i32_0 : i32, i32
  }
  func.func @transform_7(%arg0: i32) -> (i32, i32) {
    %c0_i32 = arith.constant 0 : i32
    %c0_i32_0 = arith.constant 0 : i32
    %c0_i32_1 = arith.constant 0 : i32
    return %c0_i32, %c0_i32_0 : i32, i32
  }
  func.func @transform_8(%arg0: i32) -> (i32, i32) {
    %c0_i32 = arith.constant 0 : i32
    %c0_i32_0 = arith.constant 0 : i32
    %c0_i32_1 = arith.constant 0 : i32
    return %c0_i32, %c0_i32_0 : i32, i32
  }
  func.func @transform_9(%arg0: i32) -> (i32, i32) {
    %c0_i32 = arith.constant 0 : i32
    %c0_i32_0 = arith.constant 0 : i32
    %c0_i32_1 = arith.constant 0 : i32
    return %c0_i32, %c0_i32_0 : i32, i32
  }
  func.func @transform_10(%arg0: i32) -> (i32, i32) {
    %c0_i32 = arith.constant 0 : i32
    %c0_i32_0 = arith.constant 0 : i32
    %c0_i32_1 = arith.constant 0 : i32
    return %c0_i32, %c0_i32_0 : i32, i32
  }
  func.func @transform_11(%arg0: i32) -> (i32, i32) {
    %c0_i32 = arith.constant 0 : i32
    %c0_i32_0 = arith.constant 0 : i32
    %c0_i32_1 = arith.constant 0 : i32
    return %c0_i32, %c0_i32_0 : i32, i32
  }
  func.func @transform_12(%arg0: i32) -> (i32, i32) {
    %c0_i32 = arith.constant 0 : i32
    %c0_i32_0 = arith.constant 0 : i32
    %c0_i32_1 = arith.constant 0 : i32
    return %c0_i32, %c0_i32_0 : i32, i32
  }
  func.func @transform_13(%arg0: i32) -> (i32, i32) {
    %c0_i32 = arith.constant 0 : i32
    %c0_i32_0 = arith.constant 0 : i32
    return %arg0, %c0_i32 : i32, i32
  }
}

</mosaic_0001>

<bundles_post_ra>
// kernel: tpu_custom_call.1
= control target key start
LH: loop header
LB: loop body
LE: loop exit
PB: predicated region body
PF: predicated region fallthrough
CT: control target
= control target key end

     0   :  { %18 = vsyncpa [#allocation3], 0  ;;  %s7904_s0 = inlined_call_operand.hbm [shape: f32[8,16,384], index: 0, kind: input, shape index: {}]   ;;  %s7905_s1 = inlined_call_operand.hbm [shape: f32[2,384,256], index: 1, kind: input, shape index: {}]   ;;  %s7906_s2 = inlined_call_operand.hbm [shape: f32[1,256], index: 2, kind: input, shape index: {}]   ;;  %s7907_s3 = inlined_call_operand.hbm [shape: f32[3,384,256], index: 3, kind: input, shape index: {}]   ;;  %s7908_s4 = inlined_call_operand.hbm [shape: f32[1,256], index: 4, kind: input, shape index: {}]   ;;  %s7909_s5 = inlined_call_operand.hbm [shape: f32[4,384,256], index: 5, kind: input, shape index: {}]   ;;  %s7910_s6 = inlined_call_operand.hbm [shape: f32[1,256], index: 6, kind: input, shape index: {}]   ;;  %s7911_s7 = inlined_call_operand.hbm [shape: f32[256,256], index: 7, kind: input, shape index: {}]   ;;  %s7912_s8 = inlined_call_operand.hbm [shape: f32[256,256], index: 8, kind: input, shape index: {}]   ;;  %s7913_s9 = inlined_call_operand.hbm [shape: f32[256,256], index: 9, kind: input, shape index: {}]   ;;  %s7914_s10 = inlined_call_operand.hbm [shape: f32[1,256], index: 10, kind: input, shape index: {}]   ;;  %s7915_s11 = inlined_call_operand.hbm [shape: f32[256,128], index: 11, kind: input, shape index: {}]   ;;  %s7916_s12 = inlined_call_operand.hbm [shape: f32[1,128], index: 12, kind: input, shape index: {}]   ;;  %s7917_s13 = inlined_call_operand.hbm [shape: f32[8,128], index: 13, kind: output, shape index: {}]  }
   0x1   :  { %19 = vsyncpa [#allocation6], 0 }
   0x2   :  { %20 = vsyncpa [#allocation9], 0 }
   0x3   :  { %21 = vsyncpa [#allocation12], 0 }
   0x4   :  { %22 = vsyncpa [#allocation15], 0 }
   0x5   :  { %23 = vsyncpa [#allocation18], 0 }
   0x6   :  { %24 = vsyncpa [#allocation21], 0 }
   0x7   :  { %25 = vsyncpa [#allocation4], 0  ;;  %s6615_s25 = smov [#allocation5]   ;;  %s6291_s29 = scalar_lea.hbm %s7905_s1, 24576 }
   0x8   :  { %s43_s26 = sshll.u32 %s6615_s25, 4  ;;  %p6292_p0 = scmp.ne.s32.totalorder %s7905_s1, %s6291_s29  ;;  %s44_s26 = int_to_ptr.vmem [resolvable:$true] %s43_s26 }
   0x9   :  { %p6295_p1 = scmp.lt.u32.totalorder %s6291_s29, %s7905_s1 }
   0xb   :  { %p6297_p2 = pnand %p6295_p1, %p6292_p0 }
   0xd   :  { %6300 = shalt.err (!%p6297_p2)
}
   0xe   :  { %s6301_s17 = scalar_lea.vmem %s44_s26, 24576  ;;  %p6306_p4 = scmp.lt.s32.totalorder %s44_s26, %s44_s26 }
   0xf   :  { %p6302_p3 = scmp.ne.s32.totalorder %s44_s26, %s6301_s17  ;;  %p6307_p5 = scmp.lt.s32.totalorder %s6301_s17, %s6301_s17 }
  0x11   :  { %p6308_p6 = por %p6307_p5, %p6306_p4 }
  0x13   :  { %p6309_p7 = pnand %p6308_p6, %p6302_p3 }
  0x15   :  { %6312 = shalt.err (!%p6309_p7)
}
  0x16   :  { %s6616_s18 = smov 256   ;;  %s6617_s19 = smov 16  }
  0x17   :  { %49 = dma.hbm_to_vmem [thread:$0]  %s7905_s1, 24576, %s44_s26, [#allocation6], %s6616_s18, %s6616_s18, %s6617_s19  }
  0x18   :  { %s6618_s22 = smov [#allocation8]   ;;  %s6619_s24 = smov [#allocation11]  }
  0x19   :  { %s65_s23 = sshll.u32 %s6618_s22, 4  ;;  %s87_s25 = sshll.u32 %s6619_s24, 4  ;;  %s66_s23 = int_to_ptr.vmem [resolvable:$true] %s65_s23  ;;  %s88_s25 = int_to_ptr.vmem [resolvable:$true] %s87_s25 }
  0x1a   :  { %s6313_s29 = scalar_lea.hbm %s7907_s3, 36864 }
  0x1b   :  { %p6314_p8 = scmp.ne.s32.totalorder %s7907_s3, %s6313_s29  ;;  %p6317_p9 = scmp.lt.u32.totalorder %s6313_s29, %s7907_s3 }
  0x1d   :  { %p6319_p10 = pnand %p6317_p9, %p6314_p8 }
  0x1f   :  { %6322 = shalt.err (!%p6319_p10)
}
  0x20   :  { %s6323_s1 = scalar_lea.vmem %s66_s23, 36864  ;;  %p6328_p12 = scmp.lt.s32.totalorder %s66_s23, %s66_s23 }
  0x21   :  { %p6324_p11 = scmp.ne.s32.totalorder %s66_s23, %s6323_s1  ;;  %p6329_p13 = scmp.lt.s32.totalorder %s6323_s1, %s6323_s1 }
  0x23   :  { %p6330_p0 = por %p6329_p13, %p6328_p12 }
  0x25   :  { %p6331_p1 = pnand %p6330_p0, %p6324_p11 }
  0x27   :  { %6334 = shalt.err (!%p6331_p1)
}
  0x28   :  { %71 = dma.hbm_to_vmem [thread:$0]  %s7907_s3, 36864, %s66_s23, [#allocation9], %s6616_s18, %s6616_s18, %s6617_s19  }
  0x29   :  { %s6335_s22 = scalar_lea.hbm %s7909_s5, 49152 }
  0x2a   :  { %p6336_p2 = scmp.ne.s32.totalorder %s7909_s5, %s6335_s22  ;;  %p6339_p3 = scmp.lt.u32.totalorder %s6335_s22, %s7909_s5 }
  0x2c   :  { %p6341_p4 = pnand %p6339_p3, %p6336_p2 }
  0x2e   :  { %6344 = shalt.err (!%p6341_p4)
}
  0x2f   :  { %s6345_s30 = scalar_lea.vmem %s88_s25, 49152  ;;  %p6350_p6 = scmp.lt.s32.totalorder %s88_s25, %s88_s25 }
  0x30   :  { %p6346_p5 = scmp.ne.s32.totalorder %s88_s25, %s6345_s30  ;;  %p6351_p7 = scmp.lt.s32.totalorder %s6345_s30, %s6345_s30 }
  0x32   :  { %p6352_p8 = por %p6351_p7, %p6350_p6 }
  0x34   :  { %p6353_p9 = pnand %p6352_p8, %p6346_p5 }
  0x36   :  { %6356 = shalt.err (!%p6353_p9)
}
  0x37   :  { %93 = dma.hbm_to_vmem [thread:$0]  %s7909_s5, 49152, %s88_s25, [#allocation12], %s6616_s18, %s6616_s18, %s6617_s19  }
  0x38   :  { %s6620_s14 = smov [#allocation14]   ;;  %s6621_s16 = smov [#allocation17]  }
  0x39   :  { %s109_s15 = sshll.u32 %s6620_s14, 4  ;;  %s133_s1 = sshll.u32 %s6621_s16, 4  ;;  %s110_s15 = int_to_ptr.vmem [resolvable:$true] %s109_s15  ;;  %s134_s1 = int_to_ptr.vmem [resolvable:$true] %s133_s1 }
  0x3a   :  { %s6357_s20 = scalar_lea.hbm %s7911_s7, 8192 }
  0x3b   :  { %p6358_p10 = scmp.ne.s32.totalorder %s7911_s7, %s6357_s20  ;;  %p6361_p11 = scmp.lt.u32.totalorder %s6357_s20, %s7911_s7 }
  0x3d   :  { %p6363_p12 = pnand %p6361_p11, %p6358_p10 }
  0x3f   :  { %6366 = shalt.err (!%p6363_p12)
}
  0x40   :  { %s6367_s5 = scalar_lea.vmem %s110_s15, 8192  ;;  %p6372_p0 = scmp.lt.s32.totalorder %s110_s15, %s110_s15 }
  0x41   :  { %p6368_p13 = scmp.ne.s32.totalorder %s110_s15, %s6367_s5  ;;  %p6373_p1 = scmp.lt.s32.totalorder %s6367_s5, %s6367_s5 }
  0x43   :  { %p6374_p2 = por %p6373_p1, %p6372_p0 }
  0x45   :  { %p6375_p3 = pnand %p6374_p2, %p6368_p13 }
  0x47   :  { %6378 = shalt.err (!%p6375_p3)
}
  0x48   :  { %115 = dma.hbm_to_vmem [thread:$0]  %s7911_s7, 8192, %s110_s15, [#allocation15], %s6616_s18, %s6616_s18, %s6617_s19  }
  0x49   :  { %s6379_s3 = scalar_lea.hbm %s7913_s9, 8192 }
  0x4a   :  { %p6380_p4 = scmp.ne.s32.totalorder %s7913_s9, %s6379_s3  ;;  %p6383_p5 = scmp.lt.u32.totalorder %s6379_s3, %s7913_s9 }
  0x4c   :  { %p6385_p6 = pnand %p6383_p5, %p6380_p4 }
  0x4e   :  { %6388 = shalt.err (!%p6385_p6)
}
  0x4f   :  { %s6389_s17 = scalar_lea.vmem %s134_s1, 8192  ;;  %p6394_p8 = scmp.lt.s32.totalorder %s134_s1, %s134_s1 }
  0x50   :  { %p6390_p7 = scmp.ne.s32.totalorder %s134_s1, %s6389_s17  ;;  %p6395_p9 = scmp.lt.s32.totalorder %s6389_s17, %s6389_s17 }
  0x52   :  { %p6396_p10 = por %p6395_p9, %p6394_p8 }
  0x54   :  { %p6397_p11 = pnand %p6396_p10, %p6390_p7 }
  0x56   :  { %6400 = shalt.err (!%p6397_p11)
}
  0x57   :  { %139 = dma.hbm_to_vmem [thread:$0]  %s7913_s9, 8192, %s134_s1, [#allocation18], %s6616_s18, %s6616_s18, %s6617_s19  }
  0x58   :  { %s6622_s20 = smov [#allocation20]   ;;  %s6401_s27 = scalar_lea.hbm %s7915_s11, 4096 }
  0x59   :  { %s155_s21 = sshll.u32 %s6622_s20, 4  ;;  %p6402_p12 = scmp.ne.s32.totalorder %s7915_s11, %s6401_s27  ;;  %s156_s21 = int_to_ptr.vmem [resolvable:$true] %s155_s21 }
  0x5a   :  { %p6405_p13 = scmp.lt.u32.totalorder %s6401_s27, %s7915_s11 }
  0x5c   :  { %p6407_p0 = pnand %p6405_p13, %p6402_p12 }
  0x5e   :  { %6410 = shalt.err (!%p6407_p0)
}
  0x5f   :  { %s6411_s30 = scalar_lea.vmem %s156_s21, 4096  ;;  %p6416_p2 = scmp.lt.s32.totalorder %s156_s21, %s156_s21 }
  0x60   :  { %p6412_p1 = scmp.ne.s32.totalorder %s156_s21, %s6411_s30  ;;  %p6417_p3 = scmp.lt.s32.totalorder %s6411_s30, %s6411_s30 }
  0x62   :  { %p6418_p4 = por %p6417_p3, %p6416_p2 }
  0x64   :  { %p6419_p5 = pnand %p6418_p4, %p6412_p1 }
  0x66   :  { %6422 = shalt.err (!%p6419_p5)
}
  0x67   :  { %s6623_s9 = smov 128   ;;  %s6624_s1 = smov 8  }
  0x68   :  { %161 = dma.hbm_to_vmem [thread:$0]  %s7915_s11, 4096, %s156_s21, [#allocation21], %s6623_s9, %s6623_s9, %s6624_s1  }
  0x69   :  { %s6625_s14 = smov [#allocation2]   ;;  %s6423_s7 = scalar_lea.hbm %s7904_s0, 6144 }
  0x6a   :  { %s31_s16 = sshll.u32 %s6625_s14, 4  ;;  %p6424_p6 = scmp.ne.s32.totalorder %s7904_s0, %s6423_s7  ;;  %s32_s16 = int_to_ptr.vmem [resolvable:$true] %s31_s16 }
  0x6b   :  { %p6427_p7 = scmp.lt.u32.totalorder %s6423_s7, %s7904_s0 }
  0x6d   :  { %p6429_p8 = pnand %p6427_p7, %p6424_p6 }
  0x6f   :  { %6432 = shalt.err (!%p6429_p8)
}
  0x70   :  { %s6433_s27 = scalar_lea.vmem %s32_s16, 6144  ;;  %p6438_p10 = scmp.lt.s32.totalorder %s32_s16, %s32_s16 }
  0x71   :  { %p6434_p9 = scmp.ne.s32.totalorder %s32_s16, %s6433_s27  ;;  %p6439_p11 = scmp.lt.s32.totalorder %s6433_s27, %s6433_s27 }
  0x73   :  { %p6440_p12 = por %p6439_p11, %p6438_p10 }
  0x75   :  { %p6441_p13 = pnand %p6440_p12, %p6434_p9 }
  0x77   :  { %6444 = shalt.err (!%p6441_p13)
}
  0x78   :  { %s6626_s11 = smov 384   ;;  %s6627_s21 = smov 24  }
  0x79   :  { %37 = dma.hbm_to_vmem [thread:$0]  %s7904_s0, 6144, %s32_s16, [#allocation3], %s6626_s11, %s6626_s11, %s6627_s21  }
  0x7a   :  { %s6628_s28 = smov [#allocation7]   ;;  %s6629_s30 = smov [#allocation10]  }
  0x7b   :  { %s56_s29 = sshll.u32 %s6628_s28, 4  ;;  %s78_s9 = sshll.u32 %s6629_s30, 4  ;;  %s57_s29 = int_to_ptr.vmem [resolvable:$true] %s56_s29  ;;  %s79_s9 = int_to_ptr.vmem [resolvable:$true] %s78_s9 }
  0x7c   :  { %s6445_s23 = scalar_lea.hbm %s7906_s2, 32 }
  0x7d   :  { %p6446_p0 = scmp.ne.s32.totalorder %s7906_s2, %s6445_s23  ;;  %p6449_p1 = scmp.lt.u32.totalorder %s6445_s23, %s7906_s2 }
  0x7f   :  { %p6451_p2 = pnand %p6449_p1, %p6446_p0 }
  0x81   :  { %6454 = shalt.err (!%p6451_p2)
}
  0x82   :  { %s6455_s0 = scalar_lea.vmem %s57_s29, 32  ;;  %p6460_p4 = scmp.lt.s32.totalorder %s57_s29, %s57_s29 }
  0x83   :  { %p6456_p3 = scmp.ne.s32.totalorder %s57_s29, %s6455_s0  ;;  %p6461_p5 = scmp.lt.s32.totalorder %s6455_s0, %s6455_s0 }
  0x85   :  { %p6462_p6 = por %p6461_p5, %p6460_p4 }
  0x87   :  { %p6463_p7 = pnand %p6462_p6, %p6456_p3 }
  0x89   :  { %6466 = shalt.err (!%p6463_p7)
}
  0x8a   :  { %59 = dma.hbm_to_vmem [thread:$0]  %s7906_s2, 32, %s57_s29, [#allocation6]  }
  0x8b   :  { %s6467_s24 = scalar_lea.hbm %s7908_s4, 32 }
  0x8c   :  { %p6468_p8 = scmp.ne.s32.totalorder %s7908_s4, %s6467_s24  ;;  %p6471_p9 = scmp.lt.u32.totalorder %s6467_s24, %s7908_s4 }
  0x8e   :  { %p6473_p10 = pnand %p6471_p9, %p6468_p8 }
  0x90   :  { %6476 = shalt.err (!%p6473_p10)
}
  0x91   :  { %s6477_s25 = scalar_lea.vmem %s79_s9, 32  ;;  %p6482_p12 = scmp.lt.s32.totalorder %s79_s9, %s79_s9 }
  0x92   :  { %p6478_p11 = scmp.ne.s32.totalorder %s79_s9, %s6477_s25  ;;  %p6483_p13 = scmp.lt.s32.totalorder %s6477_s25, %s6477_s25 }
  0x94   :  { %p6484_p0 = por %p6483_p13, %p6482_p12 }
  0x96   :  { %p6485_p1 = pnand %p6484_p0, %p6478_p11 }
  0x98   :  { %6488 = shalt.err (!%p6485_p1)
}
  0x99   :  { %81 = dma.hbm_to_vmem [thread:$0]  %s7908_s4, 32, %s79_s9, [#allocation9]  }
  0x9a   :  { %s6630_s29 = smov [#allocation13]   ;;  %s6631_s1 = smov [#allocation16]  }
  0x9b   :  { %s100_s30 = sshll.u32 %s6630_s29, 4  ;;  %s121_s3 = sshll.u32 %s6631_s1, 4  ;;  %s101_s30 = int_to_ptr.vmem [resolvable:$true] %s100_s30  ;;  %s122_s3 = int_to_ptr.vmem [resolvable:$true] %s121_s3 }
  0x9c   :  { %s6489_s26 = scalar_lea.hbm %s7910_s6, 32 }
  0x9d   :  { %p6490_p2 = scmp.ne.s32.totalorder %s7910_s6, %s6489_s26  ;;  %p6493_p3 = scmp.lt.u32.totalorder %s6489_s26, %s7910_s6 }
  0x9f   :  { %p6495_p4 = pnand %p6493_p3, %p6490_p2 }
  0xa1   :  { %6498 = shalt.err (!%p6495_p4)
}
  0xa2   :  { %s6499_s4 = scalar_lea.vmem %s101_s30, 32  ;;  %p6504_p6 = scmp.lt.s32.totalorder %s101_s30, %s101_s30 }
  0xa3   :  { %p6500_p5 = scmp.ne.s32.totalorder %s101_s30, %s6499_s4  ;;  %p6505_p7 = scmp.lt.s32.totalorder %s6499_s4, %s6499_s4 }
  0xa5   :  { %p6506_p8 = por %p6505_p7, %p6504_p6 }
  0xa7   :  { %p6507_p9 = pnand %p6506_p8, %p6500_p5 }
  0xa9   :  { %6510 = shalt.err (!%p6507_p9)
}
  0xaa   :  { %103 = dma.hbm_to_vmem [thread:$0]  %s7910_s6, 32, %s101_s30, [#allocation12]  }
  0xab   :  { %s6511_s24 = scalar_lea.hbm %s7912_s8, 8192 }
  0xac   :  { %p6512_p10 = scmp.ne.s32.totalorder %s7912_s8, %s6511_s24  ;;  %p6515_p11 = scmp.lt.u32.totalorder %s6511_s24, %s7912_s8 }
  0xae   :  { %p6517_p12 = pnand %p6515_p11, %p6512_p10 }
  0xb0   :  { %6520 = shalt.err (!%p6517_p12)
}
  0xb1   :  { %s6521_s25 = scalar_lea.vmem %s122_s3, 8192  ;;  %p6526_p0 = scmp.lt.s32.totalorder %s122_s3, %s122_s3 }
  0xb2   :  { %p6522_p13 = scmp.ne.s32.totalorder %s122_s3, %s6521_s25  ;;  %p6527_p1 = scmp.lt.s32.totalorder %s6521_s25, %s6521_s25 }
  0xb4   :  { %p6528_p2 = por %p6527_p1, %p6526_p0 }
  0xb6   :  { %p6529_p3 = pnand %p6528_p2, %p6522_p13 }
  0xb8   :  { %6532 = shalt.err (!%p6529_p3)
}
  0xb9   :  { %127 = dma.hbm_to_vmem [thread:$0]  %s7912_s8, 8192, %s122_s3, [#allocation15], %s6616_s18, %s6616_s18, %s6617_s19  }
  0xba   :  { %s6632_s28 = smov [#allocation19]   ;;  %s6633_s30 = smov [#allocation22]  }
  0xbb   :  { %s146_s29 = sshll.u32 %s6632_s28, 4  ;;  %s168_s1 = sshll.u32 %s6633_s30, 4  ;;  %s147_s29 = int_to_ptr.vmem [resolvable:$true] %s146_s29  ;;  %s169_s1 = int_to_ptr.vmem [resolvable:$true] %s168_s1 }
  0xbc   :  { %s6533_s26 = scalar_lea.hbm %s7914_s10, 32 }
  0xbd   :  { %p6534_p4 = scmp.ne.s32.totalorder %s7914_s10, %s6533_s26  ;;  %p6537_p5 = scmp.lt.u32.totalorder %s6533_s26, %s7914_s10 }
  0xbf   :  { %p6539_p6 = pnand %p6537_p5, %p6534_p4 }
  0xc1   :  { %6542 = shalt.err (!%p6539_p6)
}
  0xc2   :  { %s6543_s8 = scalar_lea.vmem %s147_s29, 32  ;;  %p6548_p8 = scmp.lt.s32.totalorder %s147_s29, %s147_s29 }
  0xc3   :  { %p6544_p7 = scmp.ne.s32.totalorder %s147_s29, %s6543_s8  ;;  %p6549_p9 = scmp.lt.s32.totalorder %s6543_s8, %s6543_s8 }
  0xc5   :  { %p6550_p10 = por %p6549_p9, %p6548_p8 }
  0xc7   :  { %p6551_p11 = pnand %p6550_p10, %p6544_p7 }
  0xc9   :  { %6554 = shalt.err (!%p6551_p11)
}
  0xca   :  { %149 = dma.hbm_to_vmem [thread:$0]  %s7914_s10, 32, %s147_s29, [#allocation18]  }
  0xcb   :  { %s6555_s9 = scalar_lea.hbm %s7916_s12, 16 }
  0xcc   :  { %p6556_p12 = scmp.ne.s32.totalorder %s7916_s12, %s6555_s9  ;;  %p6559_p13 = scmp.lt.u32.totalorder %s6555_s9, %s7916_s12 }
  0xce   :  { %p6561_p0 = pnand %p6559_p13, %p6556_p12 }
  0xd0   :  { %6564 = shalt.err (!%p6561_p0)
}
  0xd1   :  { %s6565_s27 = scalar_lea.vmem %s169_s1, 16  ;;  %s6569_s11 = scalar_lea.vmem %s169_s1, 32 }
  0xd2   :  { %p6566_p1 = scmp.ne.s32.totalorder %s169_s1, %s6565_s27  ;;  %p6570_p2 = scmp.lt.s32.totalorder %s169_s1, %s169_s1 }
  0xd3   :  { %p6571_p3 = scmp.lt.s32.totalorder %s6569_s11, %s6565_s27 }
  0xd5   :  { %p6572_p4 = por %p6571_p3, %p6570_p2 }
  0xd7   :  { %p6573_p5 = pnand %p6572_p4, %p6566_p1 }
  0xd9   :  { %6576 = shalt.err (!%p6573_p5)
}
  0xda   :  { %171 = dma.hbm_to_vmem [thread:$0]  %s7916_s12, 16, %s169_s1, [#allocation21]  }
  0xdb   :  { %6599 = dma.done.wait [#allocation3], 6144  }
  0xdc   :  { %6600 = vsyncadd [#allocation3], 4294961152 }
  0xdd   :  { %6601 = dma.done.wait [#allocation6], 24608  }
  0xde   :  { %6602 = vsyncadd [#allocation6], 4294942688 }
  0xdf   :  { %6603 = dma.done.wait [#allocation9], 36896  }
  0xe0   :  { %6604 = vsyncadd [#allocation9], 4294930400 }
  0xe1   :  { %6605 = dma.done.wait [#allocation12], 49184  }
  0xe2   :  { %6606 = vsyncadd [#allocation12], 4294918112 }
  0xe3   :  { %6607 = dma.done.wait [#allocation15], 16384  }
  0xe4   :  { %6608 = vsyncadd [#allocation15], 4294950912 }
  0xe5   :  { %6609 = dma.done.wait [#allocation18], 8224  }
  0xe6   :  { %6610 = vsyncadd [#allocation18], 4294959072 }
  0xe7   :  { %6611 = dma.done.wait [#allocation21], 4112  }
  0xe8   :  { %6612 = vsyncadd [#allocation21], 4294963184  ;;  %v7918_v0 = vmov 0.0   ;;  %v695_v1 = vld [vmem:[#allocation5 + $0x308] sm:$0xff]  ;;  %v697_v2 = vld [vmem:[#allocation5 + $0x318] sm:$0xff]  ;;  %vm596_vm0 = vcmask 1045504  }
  0xe9   :  { %967 = vmatprep.mubr.f32.mxu1 %v7918_v0  ;;  %v759_v3 = vld [vmem:[#allocation5 + $0x508] sm:$0xff]  ;;  %v4914_v4 = vpack.c.bf16 %v697_v2, %v695_v1  ;;  %v761_v5 = vld [vmem:[#allocation5 + $0x518] sm:$0xff]  ;;  %v694_v6 = vld [vmem:[#allocation5 + $0x300] sm:$0xff]  ;;  %vm307_vm1 = vcmask 1046528   ;;  %vm4365_vm3 = vcmask 1041409   ;;  %vm4367_vm4 = vcmask 1042434  }
  0xea   :  { %v696_v7 = vld [vmem:[#allocation5 + $0x310] sm:$0xff]  ;;  %v4978_v8 = vpack.c.bf16 %v761_v5, %v759_v3  ;;  %v758_v10 = vld [vmem:[#allocation5 + $0x500] sm:$0xff]  ;;  %v699_v12 = vld [vmem:[#allocation5 + $0x328] sm:$0xff]  ;;  %vm4369_vm5 = vcmask 1043459   ;;  %vm4371_vm6 = vcmask 1044484   ;;  %vm4373_vm7 = vcmask 1045509  }
  0xeb   :  { %v4916_v9 = vpack.c.bf16 %v696_v7, %v694_v6  ;;  %v760_v11 = vld [vmem:[#allocation5 + $0x510] sm:$0xff]  ;;  %4915 = vmatprep.subr.bf16.mxu0 %v4914_v4  ;;  %v701_v14 = vld [vmem:[#allocation5 + $0x338] sm:$0xff]  ;;  %v763_v15 = vld [vmem:[#allocation5 + $0x528] sm:$0xff]  ;;  %vm4375_vm8 = vcmask 1046534   ;;  %vm4377_vm9 = vcmask 1047559   ;;  %vm3629_vm10 = vcmask 1044480  }
  0xec   :  { %v4980_v13 = vpack.c.bf16 %v760_v11, %v758_v10  ;;  %v765_v16 = vld [vmem:[#allocation5 + $0x538] sm:$0xff]  ;;  %4979 = vmatprep.subr.bf16.mxu1 %v4978_v8  ;;  %v4918_v17 = vpack.c.bf16 %v701_v14, %v699_v12  ;;  %v698_v19 = vld [vmem:[#allocation5 + $0x320] sm:$0xff]  ;;  %v700_v20 = vld [vmem:[#allocation5 + $0x330] sm:$0xff]  ;;  %s6635_s12 = smov [#allocation23]  }
  0xed   :  { %4917 = vmatpush1.bf16.msra.mxu0 %v4916_v9  ;;  %v4982_v18 = vpack.c.bf16 %v765_v16, %v763_v15  ;;  %v762_v21 = vld [vmem:[#allocation5 + $0x520] sm:$0xff]  ;;  %v4920_v22 = vpack.c.bf16 %v700_v20, %v698_v19  ;;  %v764_v23 = vld [vmem:[#allocation5 + $0x530] sm:$0xff]  ;;  %v703_v24 = vld [vmem:[#allocation5 + $0x348] sm:$0xff]  ;;  %s4863_s5 = sshll.u32 %s6635_s12, 4  ;;  %s4864_s5 = int_to_ptr.vmem [resolvable:$true] %s4863_s5 }
  0xee   :  { %4981 = vmatpush1.bf16.msra.mxu1 %v4980_v13  ;;  %v705_v25 = vld [vmem:[#allocation5 + $0x358] sm:$0xff]  ;;  %4919 = vmatprep.subr.bf16.mxu0 %v4918_v17  ;;  %v4984_v26 = vpack.c.bf16 %v764_v23, %v762_v21  ;;  %v767_v28 = vld [vmem:[#allocation5 + $0x548] sm:$0xff]  ;;  %v702_v30 = vld [vmem:[#allocation5 + $0x340] sm:$0xff]  ;;  %s6577_s25 = scalar_lea.vmem %s4864_s5, 128  ;;  %p6582_p7 = scmp.lt.s32.totalorder %s4864_s5, %s4864_s5 }
  0xef   :  { %4983 = vmatprep.subr.bf16.mxu1 %v4982_v18  ;;  %v4922_v27 = vpack.c.bf16 %v705_v25, %v703_v24  ;;  %v769_v29 = vld [vmem:[#allocation5 + $0x558] sm:$0xff]  ;;  %v704_v32 = vld [vmem:[#allocation5 + $0x350] sm:$0xff]  ;;  %v766_v33 = vld [vmem:[#allocation5 + $0x540] sm:$0xff]  ;;  %p6578_p6 = scmp.ne.s32.totalorder %s4864_s5, %s6577_s25  ;;  %p6583_p8 = scmp.lt.s32.totalorder %s6577_s25, %s6577_s25 }
  0xf0   :  { %v4986_v31 = vpack.c.bf16 %v769_v29, %v767_v28  ;;  %v768_v34 = vld [vmem:[#allocation5 + $0x550] sm:$0xff]  ;;  %v4924_v35 = vpack.c.bf16 %v704_v32, %v702_v30  ;;  %v707_v36 = vld [vmem:[#allocation5 + $0x368] sm:$0xff]  ;;  %v709_v37 = vld [vmem:[#allocation5 + $0x378] sm:$0xff] }
  0xf1   :  { %4921 = vmatpush1.bf16.msra.mxu0 %v4920_v22  ;;  %v771_v38 = vld [vmem:[#allocation5 + $0x568] sm:$0xff]  ;;  %v4988_v39 = vpack.c.bf16 %v768_v34, %v766_v33  ;;  %v4926_v40 = vpack.c.bf16 %v709_v37, %v707_v36  ;;  %v773_v41 = vld [vmem:[#allocation5 + $0x578] sm:$0xff]  ;;  %v706_v42 = vld [vmem:[#allocation5 + $0x360] sm:$0xff]  ;;  %p6584_p9 = por %p6583_p8, %p6582_p7 }
  0xf2   :  { %4985 = vmatpush1.bf16.msra.mxu1 %v4984_v26  ;;  %4923 = vmatprep.subr.bf16.mxu0 %v4922_v27  ;;  %v708_v43 = vld [vmem:[#allocation5 + $0x370] sm:$0xff]  ;;  %v4990_v44 = vpack.c.bf16 %v773_v41, %v771_v38  ;;  %v770_v45 = vld [vmem:[#allocation5 + $0x560] sm:$0xff]  ;;  %v711_v47 = vld [vmem:[#allocation5 + $0x388] sm:$0xff] }
  0xf3   :  { %4987 = vmatprep.subr.bf16.mxu1 %v4986_v31  ;;  %v772_v46 = vld [vmem:[#allocation5 + $0x570] sm:$0xff]  ;;  %v713_v48 = vld [vmem:[#allocation5 + $0x398] sm:$0xff]  ;;  %v775_v49 = vld [vmem:[#allocation5 + $0x588] sm:$0xff]  ;;  %v4928_v51 = vpack.c.bf16 %v708_v43, %v706_v42  ;;  %p6585_p10 = pnand %p6584_p9, %p6578_p6 }
  0xf4   :  { %v777_v50 = vld [vmem:[#allocation5 + $0x598] sm:$0xff]  ;;  %v4992_v52 = vpack.c.bf16 %v772_v46, %v770_v45  ;;  %v4930_v53 = vpack.c.bf16 %v713_v48, %v711_v47  ;;  %v710_v54 = vld [vmem:[#allocation5 + $0x380] sm:$0xff]  ;;  %v712_v55 = vld [vmem:[#allocation5 + $0x390] sm:$0xff] }
  0xf5   :  { %4925 = vmatpush1.bf16.msra.mxu0 %v4924_v35  ;;  %v774_v56 = vld [vmem:[#allocation5 + $0x580] sm:$0xff]  ;;  %v4994_v57 = vpack.c.bf16 %v777_v50, %v775_v49  ;;  %v776_v58 = vld [vmem:[#allocation5 + $0x590] sm:$0xff]  ;;  %v715_v59 = vld [vmem:[#allocation5 + $0x3a8] sm:$0xff]  ;;  %v4932_v63 = vpack.c.bf16 %v712_v55, %v710_v54 }
  0xf6   :  { %4989 = vmatpush1.bf16.msra.mxu1 %v4988_v39  ;;  %4927 = vmatprep.subr.bf16.mxu0 %v4926_v40  ;;  %v717_v60 = vld [vmem:[#allocation5 + $0x3b8] sm:$0xff]  ;;  %v779_v61 = vld [vmem:[#allocation5 + $0x5a8] sm:$0xff]  ;;  %v4996_v1 = vpack.c.bf16 %v776_v58, %v774_v56  ;;  %v714_v3 = vld [vmem:[#allocation5 + $0x3a0] sm:$0xff] }
  0xf7   :  { %4991 = vmatprep.subr.bf16.mxu1 %v4990_v44  ;;  %v781_v62 = vld [vmem:[#allocation5 + $0x5b8] sm:$0xff]  ;;  %v4934_v2 = vpack.c.bf16 %v717_v60, %v715_v59  ;;  %v716_v4 = vld [vmem:[#allocation5 + $0x3b0] sm:$0xff]  ;;  %v778_v5 = vld [vmem:[#allocation5 + $0x5a0] sm:$0xff] }
  0xf8   :  { %v4998_v6 = vpack.c.bf16 %v781_v62, %v779_v61  ;;  %v780_v7 = vld [vmem:[#allocation5 + $0x5b0] sm:$0xff]  ;;  %v719_v8 = vld [vmem:[#allocation5 + $0x3c8] sm:$0xff]  ;;  %v721_v9 = vld [vmem:[#allocation5 + $0x3d8] sm:$0xff]  ;;  %v4936_v12 = vpack.c.bf16 %v716_v4, %v714_v3 }
  0xf9   :  { %4929 = vmatpush1.bf16.msra.mxu0 %v4928_v51  ;;  %v783_v10 = vld [vmem:[#allocation5 + $0x5c8] sm:$0xff]  ;;  %v785_v11 = vld [vmem:[#allocation5 + $0x5d8] sm:$0xff]  ;;  %v5000_v13 = vpack.c.bf16 %v780_v7, %v778_v5  ;;  %v4938_v14 = vpack.c.bf16 %v721_v9, %v719_v8  ;;  %v718_v15 = vld [vmem:[#allocation5 + $0x3c0] sm:$0xff] }
  0xfa   :  { %4993 = vmatpush1.bf16.msra.mxu1 %v4992_v52  ;;  %4931 = vmatprep.subr.bf16.mxu0 %v4930_v53  ;;  %v720_v16 = vld [vmem:[#allocation5 + $0x3d0] sm:$0xff]  ;;  %v782_v17 = vld [vmem:[#allocation5 + $0x5c0] sm:$0xff]  ;;  %v5002_v18 = vpack.c.bf16 %v785_v11, %v783_v10  ;;  %v723_v20 = vld [vmem:[#allocation5 + $0x3e8] sm:$0xff] }
  0xfb   :  { %4995 = vmatprep.subr.bf16.mxu1 %v4994_v57  ;;  %v784_v19 = vld [vmem:[#allocation5 + $0x5d0] sm:$0xff]  ;;  %v725_v21 = vld [vmem:[#allocation5 + $0x3f8] sm:$0xff]  ;;  %v787_v22 = vld [vmem:[#allocation5 + $0x5e8] sm:$0xff]  ;;  %v4940_v24 = vpack.c.bf16 %v720_v16, %v718_v15 }
  0xfc   :  { %v789_v23 = vld [vmem:[#allocation5 + $0x5f8] sm:$0xff]  ;;  %v722_v25 = vld [vmem:[#allocation5 + $0x3e0] sm:$0xff]  ;;  %v724_v26 = vld [vmem:[#allocation5 + $0x3f0] sm:$0xff]  ;;  %v5004_v27 = vpack.c.bf16 %v784_v19, %v782_v17  ;;  %v4942_v28 = vpack.c.bf16 %v725_v21, %v723_v20 }
  0xfd   :  { %4933 = vmatpush1.bf16.msra.mxu0 %v4932_v63  ;;  %v786_v29 = vld [vmem:[#allocation5 + $0x5e0] sm:$0xff]  ;;  %v788_v30 = vld [vmem:[#allocation5 + $0x5f0] sm:$0xff]  ;;  %v727_v31 = vld [vmem:[#allocation5 + $0x408] sm:$0xff]  ;;  %v5006_v32 = vpack.c.bf16 %v789_v23, %v787_v22  ;;  %v4944_v38 = vpack.c.bf16 %v724_v26, %v722_v25 }
  0xfe   :  { %4997 = vmatpush1.bf16.msra.mxu1 %v4996_v1  ;;  %4935 = vmatprep.subr.bf16.mxu0 %v4934_v2  ;;  %v729_v33 = vld [vmem:[#allocation5 + $0x418] sm:$0xff]  ;;  %v502_v34 = vld [vmem:[#allocation2 + $0x10] sm:$0xfc]  ;;  %v505_v35 = vld [vmem:[#allocation2 + $0x28] sm:$0x3]  ;;  %v5008_v39 = vpack.c.bf16 %v788_v30, %v786_v29 }
  0xff   :  { %4999 = vmatprep.subr.bf16.mxu1 %v4998_v6  ;;  %v1523_v36 = vld [vmem:[#allocation8 + $0x308] sm:$0xff]  ;;  %v1525_v37 = vld [vmem:[#allocation8 + $0x318] sm:$0xff]  ;;  %v4946_v40 = vpack.c.bf16 %v729_v33, %v727_v31  ;;  %v603_v43 = vrot.slane %v502_v34, 2  ;;  %v604_v44 = vrot.slane %v505_v35, 2  ;;  %v1522_v45 = vld [vmem:[#allocation8 + $0x300] sm:$0xff] }
 0x100   :  { %v726_v41 = vld [vmem:[#allocation5 + $0x400] sm:$0xff]  ;;  %v728_v42 = vld [vmem:[#allocation5 + $0x410] sm:$0xff]  ;;  %v5106_v46 = vpack.c.bf16 %v1525_v37, %v1523_v36  ;;  %v731_v48 = vld [vmem:[#allocation5 + $0x428] sm:$0xff] }
 0x101   :  { %4937 = vmatpush1.bf16.msra.mxu0 %v4936_v12  ;;  %v1524_v47 = vld [vmem:[#allocation8 + $0x310] sm:$0xff]  ;;  %v1527_v50 = vld [vmem:[#allocation8 + $0x328] sm:$0xff]  ;;  %v1529_v51 = vld [vmem:[#allocation8 + $0x338] sm:$0xff]  ;;  %v4948_v52 = vpack.c.bf16 %v728_v42, %v726_v41  ;;  %v6882_v53 = vsel %vm596_vm0, %v603_v43, %v604_v44 }
 0x102   :  { %5001 = vmatpush1.bf16.msra.mxu1 %v5000_v13  ;;  %4939 = vmatprep.subr.bf16.mxu0 %v4938_v14  ;;  %v733_v49 = vld [vmem:[#allocation5 + $0x438] sm:$0xff]  ;;  %7948 = vst [vmem:[#allocation32_spill] sm:$0xff] %v6882_v53  ;;  %v5108_v54 = vpack.c.bf16 %v1524_v47, %v1522_v45  ;;  %v730_v56 = vld [vmem:[#allocation5 + $0x420] sm:$0xff]  ;;  %v732_v57 = vld [vmem:[#allocation5 + $0x430] sm:$0xff]  ;;  %v5110_v59 = vpack.c.bf16 %v1529_v51, %v1527_v50 }
 0x103   :  { %5003 = vmatprep.subr.bf16.mxu1 %v5002_v18  ;;  %v4950_v55 = vpack.c.bf16 %v733_v49, %v731_v48  ;;  %v1526_v58 = vld [vmem:[#allocation8 + $0x320] sm:$0xff]  ;;  %v1528_v60 = vld [vmem:[#allocation8 + $0x330] sm:$0xff]  ;;  %v1531_v63 = vld [vmem:[#allocation8 + $0x348] sm:$0xff]  ;;  %v4952_v2 = vpack.c.bf16 %v732_v57, %v730_v56 }
 0x104   :  { %v735_v61 = vld [vmem:[#allocation5 + $0x448] sm:$0xff]  ;;  %v737_v62 = vld [vmem:[#allocation5 + $0x458] sm:$0xff]  ;;  %v5112_v3 = vpack.c.bf16 %v1528_v60, %v1526_v58  ;;  %v734_v5 = vld [vmem:[#allocation5 + $0x440] sm:$0xff] }
 0x105   :  { %4941 = vmatpush1.bf16.msra.mxu0 %v4940_v24  ;;  %v1533_v1 = vld [vmem:[#allocation8 + $0x358] sm:$0xff]  ;;  %v4954_v4 = vpack.c.bf16 %v737_v62, %v735_v61  ;;  %v736_v6 = vld [vmem:[#allocation5 + $0x450] sm:$0xff]  ;;  %v1530_v7 = vld [vmem:[#allocation8 + $0x340] sm:$0xff] }
 0x106   :  { %5005 = vmatpush1.bf16.msra.mxu1 %v5004_v27  ;;  %4943 = vmatprep.subr.bf16.mxu0 %v4942_v28  ;;  %v5114_v8 = vpack.c.bf16 %v1533_v1, %v1531_v63  ;;  %v1532_v9 = vld [vmem:[#allocation8 + $0x350] sm:$0xff]  ;;  %v739_v10 = vld [vmem:[#allocation5 + $0x468] sm:$0xff]  ;;  %v1537_v13 = vld [vmem:[#allocation8 + $0x378] sm:$0xff]  ;;  %v4956_v14 = vpack.c.bf16 %v736_v6, %v734_v5 }
 0x107   :  { %5007 = vmatprep.subr.bf16.mxu1 %v5006_v32  ;;  %v741_v11 = vld [vmem:[#allocation5 + $0x478] sm:$0xff]  ;;  %v1535_v12 = vld [vmem:[#allocation8 + $0x368] sm:$0xff]  ;;  %v738_v15 = vld [vmem:[#allocation5 + $0x460] sm:$0xff]  ;;  %v5116_v16 = vpack.c.bf16 %v1532_v9, %v1530_v7 }
 0x108   :  { %v4958_v17 = vpack.c.bf16 %v741_v11, %v739_v10  ;;  %v740_v18 = vld [vmem:[#allocation5 + $0x470] sm:$0xff]  ;;  %v1534_v19 = vld [vmem:[#allocation8 + $0x360] sm:$0xff]  ;;  %v5118_v21 = vpack.c.bf16 %v1537_v13, %v1535_v12  ;;  %v745_v23 = vld [vmem:[#allocation5 + $0x498] sm:$0xff] }
 0x109   :  { %4945 = vmatpush1.bf16.msra.mxu0 %v4944_v38  ;;  %v1536_v20 = vld [vmem:[#allocation8 + $0x370] sm:$0xff]  ;;  %v743_v22 = vld [vmem:[#allocation5 + $0x488] sm:$0xff]  ;;  %v1541_v25 = vld [vmem:[#allocation8 + $0x398] sm:$0xff]  ;;  %v4960_v28 = vpack.c.bf16 %v740_v18, %v738_v15 }
 0x10a   :  { %5009 = vmatpush1.bf16.msra.mxu1 %v5008_v39  ;;  %4947 = vmatprep.subr.bf16.mxu0 %v4946_v40  ;;  %v1539_v24 = vld [vmem:[#allocation8 + $0x388] sm:$0xff]  ;;  %v504_v27 = vld [vmem:[#allocation2 + $0x20] sm:$0x3]  ;;  %v5120_v31 = vpack.c.bf16 %v1536_v20, %v1534_v19  ;;  %v4962_v32 = vpack.c.bf16 %v745_v23, %v743_v22  ;;  %v1538_v35 = vld [vmem:[#allocation8 + $0x380] sm:$0xff] }
 0x10b   :  { %5107 = vmatprep.subr.bf16.mxu1 %v5106_v46  ;;  %v501_v26 = vld [vmem:[#allocation2 + $0x8] sm:$0xfc]  ;;  %v601_v30 = vrot.slane %v504_v27, 2  ;;  %v742_v33 = vld [vmem:[#allocation5 + $0x480] sm:$0xff]  ;;  %v744_v34 = vld [vmem:[#allocation5 + $0x490] sm:$0xff]  ;;  %v5122_v36 = vpack.c.bf16 %v1541_v25, %v1539_v24 }
 0x10c   :  { %v600_v29 = vrot.slane %v501_v26, 2  ;;  %v1540_v37 = vld [vmem:[#allocation8 + $0x390] sm:$0xff]  ;;  %v747_v38 = vld [vmem:[#allocation5 + $0x4a8] sm:$0xff]  ;;  %v1545_v42 = vld [vmem:[#allocation8 + $0x3b8] sm:$0xff]  ;;  %v4964_v43 = vpack.c.bf16 %v744_v34, %v742_v33 }
 0x10d   :  { %4949 = vmatpush1.bf16.msra.mxu0 %v4948_v52  ;;  %968 = vmatmul.mubr.f32.vlgmr.msra.gmra.mrb[0].mxu1 %v6882_v53  ;;  %v749_v39 = vld [vmem:[#allocation5 + $0x4b8] sm:$0xff]  ;;  %v1543_v41 = vld [vmem:[#allocation8 + $0x3a8] sm:$0xff]  ;;  %v746_v44 = vld [vmem:[#allocation5 + $0x4a0] sm:$0xff]  ;;  %v5124_v46 = vpack.c.bf16 %v1540_v37, %v1538_v35 }
 0x10e   :  { %5109 = vmatpush1.bf16.msra.mxu1 %v5108_v54  ;;  %4951 = vmatprep.subr.bf16.mxu0 %v4950_v55  ;;  %v6887_v40 = vsel %vm596_vm0, %v600_v29, %v601_v30  ;;  %v748_v45 = vld [vmem:[#allocation5 + $0x4b0] sm:$0xff]  ;;  %v4966_v47 = vpack.c.bf16 %v749_v39, %v747_v38  ;;  %v1542_v48 = vld [vmem:[#allocation8 + $0x3a0] sm:$0xff]  ;;  %v511_v50 = vld [vmem:[#allocation2 + $0x58] sm:$0x3]  ;;  %v5126_v51 = vpack.c.bf16 %v1545_v42, %v1543_v41 }
 0x10f   :  { %5111 = vmatprep.subr.bf16.mxu1 %v5110_v59  ;;  %973 = vmatprep.mubr.f32.mxu1 %v7918_v0  ;;  %v508_v49 = vld [vmem:[#allocation2 + $0x40] sm:$0xfc]  ;;  %v1544_v52 = vld [vmem:[#allocation8 + $0x3b0] sm:$0xff]  ;;  %v751_v54 = vld [vmem:[#allocation5 + $0x4c8] sm:$0xff]  ;;  %v613_v57 = vrot.slane %v511_v50, 2  ;;  %v4968_v60 = vpack.c.bf16 %v748_v45, %v746_v44 }
 0x110   :  { %854 = vmatprep.mubr.f32.mxu0 %v6887_v40  ;;  %v753_v55 = vld [vmem:[#allocation5 + $0x4d8] sm:$0xff]  ;;  %v612_v56 = vrot.slane %v508_v49, 2  ;;  %v1547_v58 = vld [vmem:[#allocation8 + $0x3c8] sm:$0xff]  ;;  %v750_v61 = vld [vmem:[#allocation5 + $0x4c0] sm:$0xff] }
 0x111   :  { %4953 = vmatpush1.bf16.msra.mxu0 %v4952_v2  ;;  %v1549_v59 = vld [vmem:[#allocation8 + $0x3d8] sm:$0xff]  ;;  %v514_v63 = vld [vmem:[#allocation2 + $0x70] sm:$0xfc]  ;;  %v517_v1 = vld [vmem:[#allocation2 + $0x88] sm:$0x3]  ;;  %v5128_v2 = vpack.c.bf16 %v1544_v52, %v1542_v48 }
 0x112   :  { %5113 = vmatpush1.bf16.msra.mxu1 %v5112_v3  ;;  %4955 = vmatprep.subr.bf16.mxu0 %v4954_v4  ;;  %v6891_v62 = vsel %vm596_vm0, %v612_v56, %v613_v57  ;;  %v4970_v3 = vpack.c.bf16 %v753_v55, %v751_v54  ;;  %v752_v4 = vld [vmem:[#allocation5 + $0x4d0] sm:$0xff]  ;;  %v1546_v5 = vld [vmem:[#allocation8 + $0x3c0] sm:$0xff]  ;;  %v621_v7 = vrot.slane %v514_v63, 2  ;;  %v5130_v9 = vpack.c.bf16 %v1549_v59, %v1547_v58  ;;  %v757_v11 = vld [vmem:[#allocation5 + $0x4f8] sm:$0xff] }
 0x113   :  { %5115 = vmatprep.subr.bf16.mxu1 %v5114_v8  ;;  %7949 = vst [vmem:[#allocation33_spill] sm:$0xff] %v6891_v62  ;;  %v1548_v6 = vld [vmem:[#allocation8 + $0x3d0] sm:$0xff]  ;;  %v622_v8 = vrot.slane %v517_v1, 2  ;;  %v755_v10 = vld [vmem:[#allocation5 + $0x4e8] sm:$0xff]  ;;  %974 = vmatmul.mubr.f32.gmra.mrb[2].mxu1 %v6891_v62  ;;  %v1553_v13 = vld [vmem:[#allocation8 + $0x3f8] sm:$0xff] }
 0x114   :  { %v1551_v12 = vld [vmem:[#allocation8 + $0x3e8] sm:$0xff]  ;;  %979 = vmatprep.mubr.f32.mxu1 %v7918_v0  ;;  %v1550_v19 = vld [vmem:[#allocation8 + $0x3e0] sm:$0xff]  ;;  %v523_v20 = vld [vmem:[#allocation2 + $0xb8] sm:$0x3]  ;;  %v5132_v22 = vpack.c.bf16 %v1548_v6, %v1546_v5  ;;  %v4974_v23 = vpack.c.bf16 %v757_v11, %v755_v10 }
 0x115   :  { %4957 = vmatpush1.bf16.msra.mxu0 %v4956_v14  ;;  %v754_v14 = vld [vmem:[#allocation5 + $0x4e0] sm:$0xff]  ;;  %v6896_v15 = vsel %vm596_vm0, %v621_v7, %v622_v8  ;;  %v756_v18 = vld [vmem:[#allocation5 + $0x4f0] sm:$0xff]  ;;  %v503_v26 = vld [vmem:[#allocation2 + $0x18] sm:$0x3]  ;;  %v631_v27 = vrot.slane %v523_v20, 2 }
 0x116   :  { %5117 = vmatpush1.bf16.msra.mxu1 %v5116_v16  ;;  %4959 = vmatprep.subr.bf16.mxu0 %v4958_v17  ;;  %7950 = vst [vmem:[#allocation34_spill] sm:$0xff] %v6896_v15  ;;  %v520_v16 = vld [vmem:[#allocation2 + $0xa0] sm:$0xfc]  ;;  %v4972_v17 = vpack.c.bf16 %v752_v4, %v750_v61  ;;  %v1552_v24 = vld [vmem:[#allocation8 + $0x3f0] sm:$0xff]  ;;  %v405_v29 = vld [vmem:[#allocation5 + $0x8] sm:$0xff]  ;;  %v598_v38 = vrot.slane %v503_v26, 2 }
 0x117   :  { %5119 = vmatprep.subr.bf16.mxu1 %v5118_v21  ;;  %v630_v21 = vrot.slane %v520_v16, 2  ;;  %v500_v25 = vld [vmem:[#allocation2] sm:$0xfc]  ;;  %v407_v30 = vld [vmem:[#allocation5 + $0x18] sm:$0xff]  ;;  %980 = vmatmul.mubr.f32.gmra.mrb[4].mxu1 %v6896_v15  ;;  %v526_v35 = vld [vmem:[#allocation2 + $0xd0] sm:$0xfc]  ;;  %v5136_v44 = vpack.c.bf16 %v1552_v24, %v1550_v19 }
 0x118   :  { %v1557_v33 = vld [vmem:[#allocation8 + $0x418] sm:$0xff]  ;;  %985 = vmatprep.mubr.f32.mxu1 %v7918_v0  ;;  %v597_v37 = vrot.slane %v500_v25, 2  ;;  %v406_v41 = vld [vmem:[#allocation5 + $0x10] sm:$0xff]  ;;  %v639_v42 = vrot.slane %v526_v35, 2  ;;  %v5010_v45 = vpack.c.bf16 %v407_v30, %v405_v29  ;;  %v409_v48 = vld [vmem:[#allocation5 + $0x28] sm:$0xff] }
 0x119   :  { %4961 = vmatpush1.bf16.msra.mxu0 %v4960_v28  ;;  %v5134_v28 = vpack.c.bf16 %v1553_v13, %v1551_v12  ;;  %v6901_v34 = vsel %vm596_vm0, %v630_v21, %v631_v27  ;;  %v404_v39 = vld [vmem:[#allocation5] sm:$0xff]  ;;  %v411_v50 = vld [vmem:[#allocation5 + $0x38] sm:$0xff]  ;;  %v1559_v54 = vld [vmem:[#allocation8 + $0x428] sm:$0xff] }
 0x11a   :  { %5121 = vmatpush1.bf16.msra.mxu1 %v5120_v31  ;;  %4963 = vmatprep.subr.bf16.mxu0 %v4962_v32  ;;  %v1555_v31 = vld [vmem:[#allocation8 + $0x408] sm:$0xff]  ;;  %v4976_v32 = vpack.c.bf16 %v756_v18, %v754_v14  ;;  %7951 = vst [vmem:[#allocation35_spill] sm:$0xff] %v6901_v34  ;;  %v535_v52 = vld [vmem:[#allocation2 + $0x118] sm:$0x3]  ;;  %v1561_v55 = vld [vmem:[#allocation8 + $0x438] sm:$0xff]  ;;  %v6909_v59 = vsel %vm596_vm0, %v597_v37, %v598_v38 }
 0x11b   :  { %5123 = vmatprep.subr.bf16.mxu1 %v5122_v36  ;;  %v529_v36 = vld [vmem:[#allocation2 + $0xe8] sm:$0x3]  ;;  %v5138_v49 = vpack.c.bf16 %v1557_v33, %v1555_v31  ;;  %986 = vmatmul.mubr.f32.gmra.mrb[6].mxu1 %v6901_v34  ;;  %v649_v58 = vrot.slane %v535_v52, 2  ;;  %v408_v61 = vld [vmem:[#allocation5 + $0x20] sm:$0xff]  ;;  %v410_v63 = vld [vmem:[#allocation5 + $0x30] sm:$0xff]  ;;  %v5142_v6 = vpack.c.bf16 %v1561_v55, %v1559_v54 }
 0x11c   :  { %991 = vmatprep.mubr.f32.mxu1 %v7918_v0  ;;  %v1560_v4 = vld [vmem:[#allocation8 + $0x430] sm:$0xff]  ;;  %v413_v7 = vld [vmem:[#allocation5 + $0x48] sm:$0xff]  ;;  %v1565_v11 = vld [vmem:[#allocation8 + $0x458] sm:$0xff]  ;;  %v5016_v16 = vpack.c.bf16 %v410_v63, %v408_v61 }
 0x11d   :  { %4965 = vmatpush1.bf16.msra.mxu0 %v4964_v43  ;;  %v640_v43 = vrot.slane %v529_v36, 2  ;;  %v538_v5 = vld [vmem:[#allocation2 + $0x130] sm:$0xfc]  ;;  %v415_v8 = vld [vmem:[#allocation5 + $0x58] sm:$0xff]  ;;  %v1563_v10 = vld [vmem:[#allocation8 + $0x448] sm:$0xff] }
 0x11e   :  { %5125 = vmatpush1.bf16.msra.mxu1 %v5124_v46  ;;  %4967 = vmatprep.subr.bf16.mxu0 %v4966_v47  ;;  %v1554_v46 = vld [vmem:[#allocation8 + $0x400] sm:$0xff]  ;;  %v1556_v47 = vld [vmem:[#allocation8 + $0x410] sm:$0xff]  ;;  %v657_v13 = vrot.slane %v538_v5, 2  ;;  %v5018_v20 = vpack.c.bf16 %v415_v8, %v413_v7  ;;  %v5146_v24 = vpack.c.bf16 %v1565_v11, %v1563_v10  ;;  %v1569_v29 = vld [vmem:[#allocation8 + $0x478] sm:$0xff] }
 0x11f   :  { %5127 = vmatprep.subr.bf16.mxu1 %v5126_v51  ;;  %v532_v51 = vld [vmem:[#allocation2 + $0x100] sm:$0xfc]  ;;  %v6906_v56 = vsel %vm596_vm0, %v639_v42, %v640_v43  ;;  %v5140_v1 = vpack.c.bf16 %v1556_v47, %v1554_v46  ;;  %v414_v18 = vld [vmem:[#allocation5 + $0x50] sm:$0xff]  ;;  %v417_v26 = vld [vmem:[#allocation5 + $0x68] sm:$0xff] }
 0x120   :  { %7952 = vst [vmem:[#allocation36_spill] sm:$0xff] %v6906_v56  ;;  %v648_v57 = vrot.slane %v532_v51, 2  ;;  %992 = vmatmul.mubr.f32.gmra.mrb[8].mxu1 %v6906_v56  ;;  %v1562_v21 = vld [vmem:[#allocation8 + $0x440] sm:$0xff]  ;;  %v1564_v25 = vld [vmem:[#allocation8 + $0x450] sm:$0xff]  ;;  %v215_v38 = vld [vmem:[#allocation2 + $0x20] sm:$0x1] }
 0x121   :  { %4969 = vmatpush1.bf16.msra.mxu0 %v4968_v60  ;;  %v5012_v60 = vpack.c.bf16 %v406_v41, %v404_v39  ;;  %997 = vmatprep.mubr.f32.mxu1 %v7918_v0  ;;  %v419_v27 = vld [vmem:[#allocation5 + $0x78] sm:$0xff]  ;;  %v212_v33 = vld [vmem:[#allocation2 + $0x8] sm:$0xfe]  ;;  %v416_v36 = vld [vmem:[#allocation5 + $0x60] sm:$0xff]  ;;  %v5148_v41 = vpack.c.bf16 %v1564_v25, %v1562_v21  ;;  %v312_v46 = vrot.slane %v215_v38, 1 }
 0x122   :  { %5129 = vmatpush1.bf16.msra.mxu1 %v5128_v2  ;;  %4971 = vmatprep.subr.bf16.mxu0 %v4970_v3  ;;  %v5014_v2 = vpack.c.bf16 %v411_v50, %v409_v48  ;;  %v1558_v3 = vld [vmem:[#allocation8 + $0x420] sm:$0xff]  ;;  %v6915_v12 = vsel %vm596_vm0, %v648_v57, %v649_v58  ;;  %v418_v37 = vld [vmem:[#allocation5 + $0x70] sm:$0xff]  ;;  %v311_v39 = vrot.slane %v212_v33, 1  ;;  %v5022_v42 = vpack.c.bf16 %v419_v27, %v417_v26  ;;  %v423_v48 = vld [vmem:[#allocation5 + $0x98] sm:$0xff] }
 0x123   :  { %5131 = vmatprep.subr.bf16.mxu1 %v5130_v9  ;;  %v541_v9 = vld [vmem:[#allocation2 + $0x148] sm:$0x3]  ;;  %7953 = vst [vmem:[#allocation37_spill] sm:$0xff] %v6915_v12  ;;  %v5144_v19 = vpack.c.bf16 %v1560_v4, %v1558_v3  ;;  %v1573_v50 = vld [vmem:[#allocation8 + $0x498] sm:$0xff]  ;;  %v510_v55 = vld [vmem:[#allocation2 + $0x50] sm:$0x3]  ;;  %v5024_v57 = vpack.c.bf16 %v418_v37, %v416_v36 }
 0x124   :  { %v658_v14 = vrot.slane %v541_v9, 2  ;;  %998 = vmatmul.mubr.f32.gmra.mrb[10].mxu1 %v6915_v12  ;;  %v1566_v43 = vld [vmem:[#allocation8 + $0x460] sm:$0xff]  ;;  %v507_v54 = vld [vmem:[#allocation2 + $0x38] sm:$0xfc]  ;;  %v6928_v58 = vsel %vm307_vm1, %v311_v39, %v312_v46  ;;  %v610_v61 = vrot.slane %v510_v55, 2  ;;  %v422_v4 = vld [vmem:[#allocation5 + $0x90] sm:$0xff] }
 0x125   :  { %4973 = vmatpush1.bf16.msra.mxu0 %v4972_v17  ;;  %v412_v17 = vld [vmem:[#allocation5 + $0x40] sm:$0xff]  ;;  %1003 = vmatprep.mubr.f32.mxu1 %v7918_v0  ;;  %v506_v63 = vld [vmem:[#allocation2 + $0x30] sm:$0xfc]  ;;  %v425_v10 = vld [vmem:[#allocation5 + $0xa8] sm:$0xff] }
 0x126   :  { %5133 = vmatpush1.bf16.msra.mxu1 %v5132_v22  ;;  %4975 = vmatprep.subr.bf16.mxu0 %v4974_v23  ;;  %v544_v22 = vld [vmem:[#allocation2 + $0x160] sm:$0xfc]  ;;  %v547_v23 = vld [vmem:[#allocation2 + $0x178] sm:$0x3]  ;;  %v6920_v30 = vsel %vm596_vm0, %v657_v13, %v658_v14  ;;  %v5020_v35 = vpack.c.bf16 %v414_v18, %v412_v17  ;;  %v606_v7 = vrot.slane %v506_v63, 2  ;;  %v1575_v13 = vld [vmem:[#allocation8 + $0x4a8] sm:$0xff] }
 0x127   :  { %5135 = vmatprep.subr.bf16.mxu1 %v5134_v28  ;;  %v1567_v28 = vld [vmem:[#allocation8 + $0x468] sm:$0xff]  ;;  %7954 = vst [vmem:[#allocation38_spill] sm:$0xff] %v6920_v30  ;;  %v666_v31 = vrot.slane %v544_v22, 2  ;;  %v420_v51 = vld [vmem:[#allocation5 + $0x80] sm:$0xff]  ;;  %v427_v11 = vld [vmem:[#allocation5 + $0xb8] sm:$0xff] }
 0x128   :  { %v5150_v47 = vpack.c.bf16 %v1569_v29, %v1567_v28  ;;  %1004 = vmatmul.mubr.f32.gmra.mrb[12].mxu1 %v6920_v30  ;;  %v1570_v5 = vld [vmem:[#allocation8 + $0x480] sm:$0xff]  ;;  %v426_v18 = vld [vmem:[#allocation5 + $0xb0] sm:$0xff]  ;;  %v5030_v25 = vpack.c.bf16 %v427_v11, %v425_v10  ;;  %v516_v27 = vld [vmem:[#allocation2 + $0x80] sm:$0x3] }
 0x129   :  { %4977 = vmatpush1.bf16.msra.mxu0 %v4976_v32  ;;  %v667_v32 = vrot.slane %v547_v23, 2  ;;  %1009 = vmatprep.mubr.f32.mxu1 %v7918_v0  ;;  %v424_v17 = vld [vmem:[#allocation5 + $0xa0] sm:$0xff]  ;;  %v1576_v22 = vld [vmem:[#allocation8 + $0x4b0] sm:$0xff]  ;;  %v513_v23 = vld [vmem:[#allocation2 + $0x68] sm:$0xfc] }
 0x12a   :  { %5137 = vmatpush1.bf16.msra.mxu1 %v5136_v44  ;;  %5011 = vmatprep.subr.bf16.mxu0 %v5010_v45  ;;  %v1568_v44 = vld [vmem:[#allocation8 + $0x470] sm:$0xff]  ;;  %v421_v45 = vld [vmem:[#allocation5 + $0x88] sm:$0xff]  ;;  %v618_v28 = vrot.slane %v513_v23, 2  ;;  %v512_v29 = vld [vmem:[#allocation2 + $0x60] sm:$0xfc] }
 0x12b   :  { %5139 = vmatprep.subr.bf16.mxu1 %v5138_v49  ;;  %v1571_v49 = vld [vmem:[#allocation8 + $0x488] sm:$0xff]  ;;  %v6925_v52 = vsel %vm596_vm0, %v666_v31, %v667_v32  ;;  %v5026_v3 = vpack.c.bf16 %v423_v48, %v421_v45  ;;  %v1574_v21 = vld [vmem:[#allocation8 + $0x4a0] sm:$0xff]  ;;  %v431_v32 = vld [vmem:[#allocation5 + $0xd8] sm:$0xff]  ;;  %v615_v37 = vrot.slane %v512_v29, 2 }
 0x12c   :  { %855 = vmatmul.mubr.f32.vlgmr.msra.gmra.mrb[0].mxu0 %v6909_v59  ;;  %7955 = vst [vmem:[#allocation39_spill] sm:$0xff] %v6925_v52  ;;  %v5154_v9 = vpack.c.bf16 %v1573_v50, %v1571_v49  ;;  %1010 = vmatmul.mubr.f32.gmra.mrb[14].mxu1 %v6925_v52  ;;  %v429_v26 = vld [vmem:[#allocation5 + $0xc8] sm:$0xff]  ;;  %v515_v36 = vld [vmem:[#allocation2 + $0x78] sm:$0x3]  ;;  %v1581_v38 = vld [vmem:[#allocation8 + $0x4d8] sm:$0xff]  ;;  %v5160_v49 = vpack.c.bf16 %v1576_v22, %v1574_v21 }
 0x12d   :  { %5013 = vmatpush1.bf16.msra.mxu0 %v5012_v60  ;;  %v609_v60 = vrot.slane %v507_v54, 2  ;;  %1682 = vmatprep.mubr.f32.mxu1 %v6928_v58  ;;  %v1579_v33 = vld [vmem:[#allocation8 + $0x4c8] sm:$0xff]  ;;  %v428_v39 = vld [vmem:[#allocation5 + $0xc0] sm:$0xff]  ;;  %v1580_v45 = vld [vmem:[#allocation8 + $0x4d0] sm:$0xff]  ;;  %v5034_v50 = vpack.c.bf16 %v431_v32, %v429_v26 }
 0x12e   :  { %5141 = vmatpush1.bf16.msra.mxu1 %v5140_v1  ;;  %5015 = vmatprep.subr.bf16.mxu0 %v5014_v2  ;;  %v509_v1 = vld [vmem:[#allocation2 + $0x48] sm:$0x3]  ;;  %v5152_v2 = vpack.c.bf16 %v1568_v44, %v1566_v43  ;;  %v5032_v43 = vpack.c.bf16 %v426_v18, %v424_v17  ;;  %v1585_v54 = vld [vmem:[#allocation8 + $0x4f8] sm:$0xff]  ;;  %v6962_v10 = vld [vmem:[#allocation8 + $0x4f0] sm:$0xff] }
 0x12f   :  { %5143 = vmatprep.subr.bf16.mxu1 %v5142_v6  ;;  %v1572_v6 = vld [vmem:[#allocation8 + $0x490] sm:$0xff]  ;;  %v607_v8 = vrot.slane %v509_v1, 2  ;;  %v6932_v14 = vsel %vm596_vm0, %v609_v60, %v610_v61  ;;  %v6940_v44 = vld [vmem:[#allocation8 + $0x4c0] sm:$0xff]  ;;  %v5162_v60 = vpack.c.bf16 %v1581_v38, %v1579_v33  ;;  %v519_v63 = vld [vmem:[#allocation2 + $0x98] sm:$0xfc] }
 0x130   :  { %860 = vmatprep.mubr.f32.mxu0 %v6932_v14  ;;  %v433_v46 = vld [vmem:[#allocation5 + $0xe8] sm:$0xff]  ;;  %v6947_v55 = vld [vmem:[#allocation2] sm:$0xfe]  ;;  %v6952_v61 = vld [vmem:[#allocation2 + $0x18] sm:$0x1]  ;;  %v5164_v17 = vpack.c.bf16 %v1580_v45, %v6940_v44 }
 0x131   :  { %5017 = vmatpush1.bf16.msra.mxu0 %v5016_v16  ;;  %v1577_v16 = vld [vmem:[#allocation8 + $0x4b8] sm:$0xff]  ;;  %v522_v1 = vld [vmem:[#allocation2 + $0xb0] sm:$0x3]  ;;  %v6964_v11 = vld [vmem:[#allocation5 + $0x108] sm:$0xff]  ;;  %v309_v26 = vrot.slane %v6952_v61, 1 }
 0x132   :  { %5145 = vmatpush1.bf16.msra.mxu1 %v5144_v19  ;;  %5019 = vmatprep.subr.bf16.mxu0 %v5018_v20  ;;  %v6937_v19 = vsel %vm596_vm0, %v606_v7, %v607_v8  ;;  %v5028_v20 = vpack.c.bf16 %v422_v4, %v420_v51  ;;  %v5158_v31 = vpack.c.bf16 %v1577_v16, %v1575_v13  ;;  %v6945_v51 = vld [vmem:[#allocation8 + $0x4e8] sm:$0xff]  ;;  %v627_v4 = vrot.slane %v519_v63, 2  ;;  %v521_v7 = vld [vmem:[#allocation2 + $0xa8] sm:$0x3]  ;;  %v6969_v22 = vld [vmem:[#allocation8 + $0x518] sm:$0xff] }
 0x133   :  { %5147 = vmatprep.subr.bf16.mxu1 %v5146_v24  ;;  %v5156_v24 = vpack.c.bf16 %v1572_v6, %v1570_v5  ;;  %861 = vmatmul.mubr.f32.gmra.mrb[2].mxu0 %v6937_v19  ;;  %v628_v5 = vrot.slane %v522_v1, 2  ;;  %v518_v6 = vld [vmem:[#allocation2 + $0x90] sm:$0xfc]  ;;  %v625_v16 = vrot.slane %v521_v7, 2  ;;  %v6967_v21 = vld [vmem:[#allocation8 + $0x508] sm:$0xff]  ;;  %v6996_v38 = vld [vmem:[#allocation8 + $0x500] sm:$0xff] }
 0x134   :  { %v624_v13 = vrot.slane %v518_v6, 2  ;;  %v6987_v32 = vld [vmem:[#allocation5 + $0x110] sm:$0xff]  ;;  %v524_v44 = vld [vmem:[#allocation2 + $0xc0] sm:$0xfc]  ;;  %v7013_v63 = vld [vmem:[#allocation8 + $0x538] sm:$0xff] }
 0x135   :  { %5021 = vmatpush1.bf16.msra.mxu0 %v5020_v35  ;;  %v619_v35 = vrot.slane %v516_v27, 2  ;;  %v6972_v23 = vsel %vm596_vm0, %v627_v4, %v628_v5  ;;  %v6977_v27 = vld [vmem:[#allocation2 + $0x38] sm:$0xfe]  ;;  %v6989_v33 = vld [vmem:[#allocation2 + $0x30] sm:$0xfe]  ;;  %v7015_v1 = vld [vmem:[#allocation5 + $0x120] sm:$0xff] }
 0x136   :  { %5149 = vmatpush1.bf16.msra.mxu1 %v5148_v41  ;;  %5023 = vmatprep.subr.bf16.mxu0 %v5022_v42  ;;  %v430_v41 = vld [vmem:[#allocation5 + $0xd0] sm:$0xff]  ;;  %v616_v42 = vrot.slane %v515_v36, 2  ;;  %v6983_v29 = vsel %vm596_vm0, %v624_v13, %v625_v16  ;;  %v525_v36 = vld [vmem:[#allocation2 + $0xc8] sm:$0xfc]  ;;  %v317_v4 = vrot.slane %v6989_v33, 1  ;;  %v7021_v6 = vld [vmem:[#allocation8 + $0x520] sm:$0xff] }
 0x137   :  { %5151 = vmatprep.subr.bf16.mxu1 %v5150_v47  ;;  %v435_v47 = vld [vmem:[#allocation5 + $0xf8] sm:$0xff]  ;;  %v6943_v48 = vsel %vm596_vm0, %v618_v28, %v619_v35  ;;  %v5036_v8 = vpack.c.bf16 %v430_v41, %v428_v39  ;;  %v6979_v28 = vld [vmem:[#allocation2 + $0x50] sm:$0x1]  ;;  %v6991_v35 = vld [vmem:[#allocation2 + $0x48] sm:$0x1] }
 0x138   :  { %866 = vmatprep.mubr.f32.mxu0 %v6943_v48  ;;  %v5038_v18 = vpack.c.bf16 %v435_v47, %v433_v46  ;;  %v6998_v39 = vld [vmem:[#allocation8 + $0x510] sm:$0xff]  ;;  %v7000_v41 = vld [vmem:[#allocation5 + $0x128] sm:$0xff]  ;;  %v321_v61 = vrot.slane %v6979_v28, 1  ;;  %v318_v5 = vrot.slane %v6991_v35, 1  ;;  %v227_v16 = vld [vmem:[#allocation2 + $0x80] sm:$0x1] }
 0x139   :  { %5025 = vmatpush1.bf16.msra.mxu0 %v5024_v57  ;;  %v6950_v57 = vsel %vm596_vm0, %v615_v37, %v616_v42  ;;  %v528_v42 = vld [vmem:[#allocation2 + $0xe0] sm:$0x3]  ;;  %v7005_v47 = vld [vmem:[#allocation5 + $0x138] sm:$0xff]  ;;  %v534_v33 = vld [vmem:[#allocation2 + $0x110] sm:$0x3] }
 0x13a   :  { %5153 = vmatpush1.bf16.msra.mxu1 %v5152_v2  ;;  %5027 = vmatprep.subr.bf16.mxu0 %v5026_v3  ;;  %v6955_v2 = vld [vmem:[#allocation5 + $0xe0] sm:$0xff]  ;;  %v6957_v3 = vld [vmem:[#allocation5 + $0xf0] sm:$0xff]  ;;  %v7034_v13 = vld [vmem:[#allocation5 + $0x158] sm:$0xff] }
 0x13b   :  { %5155 = vmatprep.subr.bf16.mxu1 %v5154_v9  ;;  %867 = vmatmul.mubr.f32.gmra.mrb[4].mxu0 %v6950_v57  ;;  %v6960_v9 = vld [vmem:[#allocation8 + $0x4e0] sm:$0xff]  ;;  %v5040_v37 = vpack.c.bf16 %v6957_v3, %v6955_v2  ;;  %v7017_v2 = vld [vmem:[#allocation5 + $0x130] sm:$0xff]  ;;  %v7053_v28 = vld [vmem:[#allocation8 + $0x558] sm:$0xff] }
 0x13c   :  { %872 = vmatprep.mubr.f32.mxu0 %v6972_v23  ;;  %v5168_v45 = vpack.c.bf16 %v6962_v10, %v6960_v9  ;;  %v7023_v7 = vld [vmem:[#allocation8 + $0x530] sm:$0xff]  ;;  %v7172_v0 = vld [vmem:[#allocation8 + $0x5a8] sm:$0xff]  ;;  %v543_v52 = vld [vmem:[#allocation2 + $0x158] sm:$0xfc] }
 0x13d   :  { %5029 = vmatpush1.bf16.msra.mxu0 %v5028_v20  ;;  %v439_v20 = vld [vmem:[#allocation5 + $0x118] sm:$0xff]  ;;  %v546_v30 = vld [vmem:[#allocation2 + $0x170] sm:$0x3]  ;;  %v465_v56 = vld [vmem:[#allocation5 + $0x1e8] sm:$0xff] }
 0x13e   :  { %5157 = vmatpush1.bf16.msra.mxu1 %v5156_v24  ;;  %5031 = vmatprep.subr.bf16.mxu0 %v5030_v25  ;;  %v5166_v24 = vpack.c.bf16 %v1585_v54, %v6945_v51  ;;  %v308_v25 = vrot.slane %v6947_v55, 1  ;;  %v5042_v46 = vpack.c.bf16 %v439_v20, %v6964_v11  ;;  %v527_v51 = vld [vmem:[#allocation2 + $0xd8] sm:$0x3]  ;;  %v633_v54 = vrot.slane %v524_v44, 2  ;;  %v7032_v11 = vld [vmem:[#allocation5 + $0x148] sm:$0xff]  ;;  %v7068_v44 = vld [vmem:[#allocation5 + $0x140] sm:$0xff] }
 0x13f   :  { %5159 = vmatprep.subr.bf16.mxu1 %v5158_v31  ;;  %v6985_v31 = vld [vmem:[#allocation5 + $0x100] sm:$0xff]  ;;  %873 = vmatmul.mubr.f32.gmra.mrb[6].mxu0 %v6983_v29  ;;  %v5170_v55 = vpack.c.bf16 %v6969_v22, %v6967_v21  ;;  %v634_v3 = vrot.slane %v527_v51, 2  ;;  %v5172_v22 = vpack.c.bf16 %v6998_v39, %v6996_v38  ;;  %v533_v38 = vld [vmem:[#allocation2 + $0x108] sm:$0x3]  ;;  %v7080_v51 = vld [vmem:[#allocation2 + $0x90] sm:$0xfe] }
 0x140   :  { %v5044_v10 = vpack.c.bf16 %v6987_v32, %v6985_v31  ;;  %v7045_v21 = vsel %vm307_vm1, %v308_v25, %v309_v26  ;;  %v7055_v31 = vld [vmem:[#allocation2 + $0x98] sm:$0xfe]  ;;  %v5048_v25 = vpack.c.bf16 %v7017_v2, %v7015_v1  ;;  %v7089_v2 = vld [vmem:[#allocation5 + $0x168] sm:$0xff] }
 0x141   :  { %5033 = vmatpush1.bf16.msra.mxu0 %v5032_v43  ;;  %v636_v43 = vrot.slane %v525_v36, 2  ;;  %v7042_v20 = vsel %vm596_vm0, %v633_v54, %v634_v3  ;;  %v531_v32 = vld [vmem:[#allocation2 + $0xf8] sm:$0xfc]  ;;  %v646_v36 = vrot.slane %v534_v33, 2  ;;  %v239_v33 = vld [vmem:[#allocation2 + $0xe0] sm:$0x1] }
 0x142   :  { %5161 = vmatpush1.bf16.msra.mxu1 %v5160_v49  ;;  %5035 = vmatprep.subr.bf16.mxu0 %v5034_v50  ;;  %v7007_v49 = vld [vmem:[#allocation8 + $0x528] sm:$0xff]  ;;  %v637_v50 = vrot.slane %v528_v42, 2  ;;  %v645_v26 = vrot.slane %v531_v32, 2  ;;  %v7091_v3 = vld [vmem:[#allocation5 + $0x178] sm:$0xff] }
 0x143   :  { %5163 = vmatprep.subr.bf16.mxu1 %v5162_v60  ;;  %v320_v60 = vrot.slane %v6977_v27, 1  ;;  %v7051_v27 = vld [vmem:[#allocation8 + $0x548] sm:$0xff]  ;;  %v5174_v35 = vpack.c.bf16 %v7013_v63, %v7007_v49  ;;  %v7076_v49 = vld [vmem:[#allocation8 + $0x540] sm:$0xff]  ;;  %v1612_v12 = vld [vmem:[#allocation8 + $0x5d0] sm:$0xff] }
 0x144   :  { %v7028_v9 = vsel %vm596_vm0, %v636_v43, %v637_v50  ;;  %v330_v43 = vrot.slane %v227_v16, 1  ;;  %v7078_v50 = vld [vmem:[#allocation8 + $0x550] sm:$0xff]  ;;  %v7083_v54 = vsel %vm596_vm0, %v645_v26, %v646_v36  ;;  %v7104_v16 = vld [vmem:[#allocation5 + $0x160] sm:$0xff]  ;;  %v7119_v32 = vld [vmem:[#allocation5 + $0x188] sm:$0xff] }
 0x145   :  { %5037 = vmatpush1.bf16.msra.mxu0 %v5036_v8  ;;  %v7025_v8 = vld [vmem:[#allocation2 + $0x68] sm:$0xfe]  ;;  %878 = vmatprep.mubr.f32.mxu0 %v7028_v9  ;;  %v7063_v39 = vsel %vm307_vm1, %v320_v60, %v321_v61  ;;  %v643_v60 = vrot.slane %v533_v38, 2  ;;  %v5050_v61 = vpack.c.bf16 %v7034_v13, %v7032_v11  ;;  %v5180_v38 = vpack.c.bf16 %v7078_v50, %v7076_v49  ;;  %v238_v49 = vld [vmem:[#allocation2 + $0xd8] sm:$0x1] }
 0x146   :  { %5165 = vmatpush1.bf16.msra.mxu1 %v5164_v17  ;;  %5039 = vmatprep.subr.bf16.mxu0 %v5038_v18  ;;  %v7036_v17 = vld [vmem:[#allocation2 + $0x60] sm:$0xfe]  ;;  %v7038_v18 = vld [vmem:[#allocation2 + $0x78] sm:$0x1]  ;;  %v329_v42 = vrot.slane %v7025_v8, 1  ;;  %v493_v34 = vld [vmem:[#allocation5 + $0x2c8] sm:$0xff] }
 0x147   :  { %5167 = vmatprep.subr.bf16.mxu1 %v5166_v24  ;;  %v5046_v24 = vpack.c.bf16 %v7005_v47, %v7000_v41  ;;  %879 = vmatmul.mubr.f32.gmra.mrb[8].mxu0 %v7042_v20  ;;  %v5176_v41 = vpack.c.bf16 %v7023_v7, %v7021_v6  ;;  %v7074_v47 = vsel %vm307_vm1, %v317_v4, %v318_v5  ;;  %v326_v63 = vrot.slane %v7036_v17, 1  ;;  %v7094_v5 = vld [vmem:[#allocation8 + $0x568] sm:$0xff]  ;;  %v7099_v8 = vld [vmem:[#allocation8 + $0x578] sm:$0xff] }
 0x148   :  { %v327_v1 = vrot.slane %v7038_v18, 1  ;;  %v338_v4 = vrot.slane %v7055_v31, 1  ;;  %v5178_v6 = vpack.c.bf16 %v7053_v28, %v7051_v27  ;;  %v537_v11 = vld [vmem:[#allocation2 + $0x128] sm:$0xfc]  ;;  %v7102_v13 = vsel %vm307_vm1, %v329_v42, %v330_v43  ;;  %v7106_v17 = vld [vmem:[#allocation5 + $0x170] sm:$0xff]  ;;  %884 = vmatprep.mubr.f32.mxu0 %v7083_v54  ;;  %v7115_v28 = vld [vmem:[#allocation8 + $0x560] sm:$0xff] }
 0x149   :  { %5041 = vmatpush1.bf16.msra.mxu0 %v5040_v37  ;;  %v530_v37 = vld [vmem:[#allocation2 + $0xf0] sm:$0xfc]  ;;  %v335_v18 = vrot.slane %v7080_v51, 1  ;;  %v654_v36 = vrot.slane %v537_v11, 2  ;;  %v5054_v42 = vpack.c.bf16 %v7091_v3, %v7089_v2  ;;  %v242_v3 = vld [vmem:[#allocation2 + $0xf8] sm:$0xfe] }
 0x14a   :  { %5169 = vmatpush1.bf16.msra.mxu1 %v5168_v45  ;;  %5043 = vmatprep.subr.bf16.mxu0 %v5042_v46  ;;  %v7070_v45 = vld [vmem:[#allocation5 + $0x150] sm:$0xff]  ;;  %v497_v62 = vld [vmem:[#allocation5 + $0x2e8] sm:$0xff]  ;;  %v499_v53 = vld [vmem:[#allocation5 + $0x2f8] sm:$0xff] }
 0x14b   :  { %5171 = vmatprep.subr.bf16.mxu1 %v5170_v55  ;;  %v233_v46 = vld [vmem:[#allocation2 + $0xb0] sm:$0x1]  ;;  %v642_v55 = vrot.slane %v530_v37, 2  ;;  %v5052_v27 = vpack.c.bf16 %v7070_v45, %v7068_v44  ;;  %v7117_v31 = vld [vmem:[#allocation8 + $0x570] sm:$0xff]  ;;  %v536_v45 = vld [vmem:[#allocation2 + $0x120] sm:$0xfc] }
 0x14c   :  { %v339_v7 = vrot.slane %v233_v46, 1  ;;  %v455_v44 = vld [vmem:[#allocation5 + $0x198] sm:$0xff]  ;;  %v7161_v11 = vld [vmem:[#allocation2 + $0xf0] sm:$0xfe] }
 0x14d   :  { %5045 = vmatpush1.bf16.msra.mxu0 %v5044_v10  ;;  %1683 = vmatmul.mubr.f32.vlgmr.msra.gmra.mrb[16].mxu1 %v7045_v21  ;;  %v232_v10 = vld [vmem:[#allocation2 + $0xa8] sm:$0x1]  ;;  %v7124_v26 = vsel %vm596_vm0, %v642_v55, %v643_v60  ;;  %v539_v46 = vld [vmem:[#allocation2 + $0x138] sm:$0x3]  ;;  %v7137_v55 = vld [vmem:[#allocation8 + $0x588] sm:$0xff] }
 0x14e   :  { %5173 = vmatpush1.bf16.msra.mxu1 %v5172_v22  ;;  %5047 = vmatprep.subr.bf16.mxu0 %v5046_v24  ;;  %v7109_v22 = vld [vmem:[#allocation2 + $0xc8] sm:$0xfe]  ;;  %v540_v24 = vld [vmem:[#allocation2 + $0x140] sm:$0x3]  ;;  %v336_v43 = vrot.slane %v232_v10, 1  ;;  %v7142_v50 = vsel %vm307_vm1, %v338_v4, %v339_v7  ;;  %v7155_v4 = vld [vmem:[#allocation8 + $0x590] sm:$0xff] }
 0x14f   :  { %1688 = vmatprep.mubr.f32.mxu1 %v7063_v39  ;;  %5175 = vmatprep.subr.bf16.mxu1 %v5174_v35  ;;  %v7121_v35 = vld [vmem:[#allocation2 + $0xc0] sm:$0xfe]  ;;  %v655_v37 = vrot.slane %v540_v24, 2  ;;  %v347_v51 = vrot.slane %v7109_v22, 1  ;;  %v7157_v7 = vld [vmem:[#allocation5 + $0x1a8] sm:$0xff]  ;;  %v651_v24 = vrot.slane %v536_v45, 2 }
 0x150   :  { %v7139_v60 = vld [vmem:[#allocation8 + $0x598] sm:$0xff]  ;;  %v344_v2 = vrot.slane %v7121_v35, 1  ;;  %885 = vmatmul.mubr.f32.gmra.mrb[10].mxu0 %v7124_v26  ;;  %v245_v10 = vld [vmem:[#allocation2 + $0x110] sm:$0x1]  ;;  %v345_v35 = vrot.slane %v238_v49, 1  ;;  %v7187_v45 = vld [vmem:[#allocation8 + $0x5b0] sm:$0xff] }
 0x151   :  { %5049 = vmatpush1.bf16.msra.mxu0 %v5048_v25  ;;  %1689 = vmatmul.mubr.f32.gmra.mrb[18].mxu1 %v7074_v47  ;;  %v7127_v25 = vsel %vm307_vm1, %v326_v63, %v327_v1  ;;  %v7144_v63 = vld [vmem:[#allocation5 + $0x180] sm:$0xff]  ;;  %v7146_v1 = vld [vmem:[#allocation5 + $0x190] sm:$0xff]  ;;  %v7164_v22 = vsel %vm596_vm0, %v654_v36, %v655_v37  ;;  %v5186_v36 = vpack.c.bf16 %v7139_v60, %v7137_v55  ;;  %v248_v55 = vld [vmem:[#allocation2 + $0x128] sm:$0xfe]  ;;  %v663_v49 = vrot.slane %v543_v52, 2 }
 0x152   :  { %5177 = vmatpush1.bf16.msra.mxu1 %v5176_v41  ;;  %5051 = vmatprep.subr.bf16.mxu0 %v5050_v61  ;;  %v5182_v41 = vpack.c.bf16 %v7099_v8, %v7094_v5  ;;  %v348_v61 = vrot.slane %v239_v33, 1  ;;  %v5056_v5 = vpack.c.bf16 %v7106_v17, %v7104_v16  ;;  %v7159_v8 = vld [vmem:[#allocation5 + $0x1b8] sm:$0xff]  ;;  %7956 = vst [vmem:[#allocation40_spill] sm:$0xff] %v7164_v22  ;;  %v251_v60 = vld [vmem:[#allocation2 + $0x140] sm:$0x1]  ;;  %v1611_v52 = vld [vmem:[#allocation8 + $0x5c8] sm:$0xff] }
 0x153   :  { %1694 = vmatprep.mubr.f32.mxu1 %v7102_v13  ;;  %5179 = vmatprep.subr.bf16.mxu1 %v5178_v6  ;;  %v7153_v6 = vld [vmem:[#allocation8 + $0x580] sm:$0xff]  ;;  %v7167_v16 = vsel %vm307_vm1, %v335_v18, %v336_v43  ;;  %v5184_v17 = vpack.c.bf16 %v7117_v31, %v7115_v28  ;;  %v5058_v33 = vpack.c.bf16 %v455_v44, %v7119_v32  ;;  %v1609_v37 = vld [vmem:[#allocation8 + $0x5b8] sm:$0xff]  ;;  %v356_v28 = vrot.slane %v242_v3, 1  ;;  %v7182_v32 = vld [vmem:[#allocation5 + $0x1b0] sm:$0xff] }
 0x154   :  { %v244_v18 = vld [vmem:[#allocation2 + $0x108] sm:$0x1]  ;;  %v357_v31 = vrot.slane %v245_v10, 1  ;;  %v353_v43 = vrot.slane %v7161_v11, 1  ;;  %890 = vmatprep.mubr.f32.mxu0 %v7164_v22  ;;  %v7199_v3 = vsel %vm307_vm1, %v344_v2, %v345_v35  ;;  %v463_v10 = vld [vmem:[#allocation5 + $0x1d8] sm:$0xff]  ;;  %v462_v35 = vld [vmem:[#allocation5 + $0x1d0] sm:$0xff] }
 0x155   :  { %5053 = vmatpush1.bf16.msra.mxu0 %v5052_v27  ;;  %1695 = vmatmul.mubr.f32.gmra.mrb[20].mxu1 %v7127_v25  ;;  %v652_v27 = vrot.slane %v539_v46, 2  ;;  %v7185_v44 = vld [vmem:[#allocation8 + $0x5a0] sm:$0xff]  ;;  %v5060_v46 = vpack.c.bf16 %v7146_v1, %v7144_v63  ;;  %v5062_v63 = vpack.c.bf16 %v7159_v8, %v7157_v7  ;;  %v354_v1 = vrot.slane %v244_v18, 1  ;;  %v542_v11 = vld [vmem:[#allocation2 + $0x150] sm:$0xfc]  ;;  %v1613_v8 = vld [vmem:[#allocation8 + $0x5d8] sm:$0xff] }
 0x156   :  { %5181 = vmatpush1.bf16.msra.mxu1 %v5180_v38  ;;  %5055 = vmatprep.subr.bf16.mxu0 %v5054_v42  ;;  %v7177_v38 = vld [vmem:[#allocation5 + $0x1a0] sm:$0xff]  ;;  %v7180_v42 = vsel %vm307_vm1, %v347_v51, %v348_v61  ;;  %v7196_v51 = vld [vmem:[#allocation5 + $0x1c8] sm:$0xff]  ;;  %v664_v61 = vrot.slane %v546_v30, 2  ;;  %v5190_v30 = vpack.c.bf16 %v1609_v37, %v7172_v0  ;;  %v7208_v2 = vsel %vm307_vm1, %v356_v28, %v357_v31  ;;  %v254_v28 = vld [vmem:[#allocation2 + $0x158] sm:$0xfe] }
 0x157   :  { %1700 = vmatprep.mubr.f32.mxu1 %v7142_v50  ;;  %5183 = vmatprep.subr.bf16.mxu1 %v5182_v41  ;;  %v7194_v41 = vsel %vm596_vm0, %v651_v24, %v652_v27  ;;  %v545_v24 = vld [vmem:[#allocation2 + $0x168] sm:$0x3]  ;;  %v247_v27 = vld [vmem:[#allocation2 + $0x120] sm:$0xfe]  ;;  %v366_v7 = vrot.slane %v251_v60, 1  ;;  %v5192_v0 = vpack.c.bf16 %v7187_v45, %v7185_v44  ;;  %v660_v37 = vrot.slane %v542_v11, 2 }
 0x158   :  { %7957 = vst [vmem:[#allocation41_spill] sm:$0xff] %v7194_v41  ;;  %891 = vmatmul.mubr.f32.gmra.mrb[12].mxu0 %v7194_v41  ;;  %v661_v18 = vrot.slane %v545_v24, 2  ;;  %v7220_v31 = vsel %vm307_vm1, %v353_v43, %v354_v1  ;;  %v1610_v60 = vld [vmem:[#allocation8 + $0x5c0] sm:$0xff]  ;;  %v5194_v44 = vpack.c.bf16 %v1613_v8, %v1611_v52  ;;  %v467_v45 = vld [vmem:[#allocation5 + $0x1f8] sm:$0xff]  ;;  %v374_v43 = vrot.slane %v254_v28, 1  ;;  %v466_v52 = vld [vmem:[#allocation5 + $0x1f0] sm:$0xff] }
 0x159   :  { %5057 = vmatpush1.bf16.msra.mxu0 %v5056_v5  ;;  %1701 = vmatmul.mubr.f32.gmra.mrb[22].mxu1 %v7167_v16  ;;  %v5188_v5 = vpack.c.bf16 %v7155_v4, %v7153_v6  ;;  %v5064_v6 = vpack.c.bf16 %v7182_v32, %v7177_v38  ;;  %v365_v4 = vrot.slane %v248_v55, 1  ;;  %v257_v38 = vld [vmem:[#allocation2 + $0x170] sm:$0x1]  ;;  %v5066_v32 = vpack.c.bf16 %v463_v10, %v7196_v51  ;;  %v1617_v1 = vld [vmem:[#allocation8 + $0x5f8] sm:$0xff]  ;;  %v1614_v8 = vld [vmem:[#allocation8 + $0x5e0] sm:$0xff] }
 0x15a   :  { %5185 = vmatpush1.bf16.msra.mxu1 %v5184_v17  ;;  %5059 = vmatprep.subr.bf16.mxu0 %v5058_v33  ;;  %v250_v17 = vld [vmem:[#allocation2 + $0x138] sm:$0x1]  ;;  %v460_v33 = vld [vmem:[#allocation5 + $0x1c0] sm:$0xff]  ;;  %v1615_v51 = vld [vmem:[#allocation8 + $0x5e8] sm:$0xff]  ;;  %v5196_v11 = vpack.c.bf16 %v1612_v12, %v1610_v60  ;;  %v7230_v24 = vsel %vm596_vm0, %v660_v37, %v661_v18 }
 0x15b   :  { %1706 = vmatprep.mubr.f32.mxu1 %v7180_v42  ;;  %5187 = vmatprep.subr.bf16.mxu1 %v5186_v36  ;;  %v7217_v36 = vsel %vm596_vm0, %v663_v49, %v664_v61  ;;  %v363_v55 = vrot.slane %v250_v17, 1  ;;  %v253_v49 = vld [vmem:[#allocation2 + $0x150] sm:$0xfe]  ;;  %v256_v61 = vld [vmem:[#allocation2 + $0x168] sm:$0x1]  ;;  %v5068_v10 = vpack.c.bf16 %v462_v35, %v460_v33  ;;  %7959 = vst [vmem:[#allocation43_spill] sm:$0xff] %v7230_v24 }
 0x15c   :  { %7958 = vst [vmem:[#allocation42_spill] sm:$0xff] %v7217_v36  ;;  %896 = vmatprep.mubr.f32.mxu0 %v7217_v36  ;;  %v5070_v17 = vpack.c.bf16 %v467_v45, %v465_v56  ;;  %v1616_v28 = vld [vmem:[#allocation8 + $0x5f0] sm:$0xff]  ;;  %v5198_v12 = vpack.c.bf16 %v1617_v1, %v1615_v51  ;;  %v216_v37 = vld [vmem:[#allocation2 + $0x28] sm:$0x1]  ;;  %v1426_v18 = vld [vmem:[#allocation8 + $0x8] sm:$0xff] }
 0x15d   :  { %5061 = vmatpush1.bf16.msra.mxu0 %v5060_v46  ;;  %1707 = vmatmul.mubr.f32.gmra.mrb[24].mxu1 %v7199_v3  ;;  %v362_v46 = vrot.slane %v247_v27, 1  ;;  %v471_v33 = vld [vmem:[#allocation5 + $0x218] sm:$0xff]  ;;  %v213_v35 = vld [vmem:[#allocation2 + $0x10] sm:$0xfe]  ;;  %v468_v60 = vld [vmem:[#allocation5 + $0x200] sm:$0xff] }
 0x15e   :  { %5189 = vmatpush1.bf16.msra.mxu1 %v5188_v5  ;;  %5063 = vmatprep.subr.bf16.mxu0 %v5062_v63  ;;  %v7225_v5 = vsel %vm307_vm1, %v365_v4, %v366_v7  ;;  %v375_v63 = vrot.slane %v257_v38, 1  ;;  %v371_v4 = vrot.slane %v253_v49, 1  ;;  %v372_v7 = vrot.slane %v256_v61, 1  ;;  %v1428_v38 = vld [vmem:[#allocation8 + $0x18] sm:$0xff]  ;;  %v473_v51 = vld [vmem:[#allocation5 + $0x228] sm:$0xff] }
 0x15f   :  { %1712 = vmatprep.mubr.f32.mxu1 %v7208_v2  ;;  %5191 = vmatprep.subr.bf16.mxu1 %v5190_v30  ;;  %v464_v30 = vld [vmem:[#allocation5 + $0x1e0] sm:$0xff]  ;;  %v7233_v27 = vsel %vm307_vm1, %v362_v46, %v363_v55  ;;  %v314_v45 = vrot.slane %v213_v35, 1  ;;  %v315_v49 = vrot.slane %v216_v37, 1  ;;  %v5202_v61 = vpack.c.bf16 %v1428_v38, %v1426_v18  ;;  %v475_v1 = vld [vmem:[#allocation5 + $0x238] sm:$0xff]  ;;  %v477_v35 = vld [vmem:[#allocation5 + $0x248] sm:$0xff] }
 0x160   :  { %897 = vmatmul.mubr.f32.gmra.mrb[14].mxu0 %v7230_v24  ;;  %v5072_v56 = vpack.c.bf16 %v466_v52, %v464_v30  ;;  %v7242_v46 = vsel %vm307_vm1, %v371_v4, %v372_v7  ;;  %v472_v4 = vld [vmem:[#allocation5 + $0x220] sm:$0xff]  ;;  %v474_v7 = vld [vmem:[#allocation5 + $0x230] sm:$0xff]  ;;  %v479_v37 = vld [vmem:[#allocation5 + $0x258] sm:$0xff] }
 0x161   :  { %5065 = vmatpush1.bf16.msra.mxu0 %v5064_v6  ;;  %1713 = vmatmul.mubr.f32.gmra.mrb[26].mxu1 %v7220_v31  ;;  %v469_v6 = vld [vmem:[#allocation5 + $0x208] sm:$0xff]  ;;  %v7248_v52 = vsel %vm307_vm1, %v314_v45, %v315_v49  ;;  %v1436_v38 = vld [vmem:[#allocation8 + $0x58] sm:$0xff]  ;;  %v258_v36 = vld [vmem:[#allocation2 + $0x178] sm:$0x1] }
 0x162   :  { %5193 = vmatpush1.bf16.msra.mxu1 %v5192_v0  ;;  %5067 = vmatprep.subr.bf16.mxu0 %v5066_v32  ;;  %v7238_v0 = vsel %vm307_vm1, %v374_v43, %v375_v63  ;;  %v5200_v32 = vpack.c.bf16 %v1616_v28, %v1614_v8  ;;  %v5074_v55 = vpack.c.bf16 %v471_v33, %v469_v6  ;;  %v1425_v43 = vld [vmem:[#allocation8] sm:$0xff]  ;;  %v1427_v63 = vld [vmem:[#allocation8 + $0x10] sm:$0xff]  ;;  %v7960_v28 = vmov 0.0   ;;  %v1434_v18 = vld [vmem:[#allocation8 + $0x48] sm:$0xff] }
 0x163   :  { %1718 = vmatprep.mubr.f32.mxu1 %v7225_v5  ;;  %5195 = vmatprep.subr.bf16.mxu1 %v5194_v44  ;;  %v470_v44 = vld [vmem:[#allocation5 + $0x210] sm:$0xff]  ;;  %v1429_v8 = vld [vmem:[#allocation8 + $0x20] sm:$0xff]  ;;  %v5078_v6 = vpack.c.bf16 %v475_v1, %v473_v51  ;;  %v5210_v49 = vpack.c.bf16 %v1436_v38, %v1434_v18  ;;  %v1440_v1 = vld [vmem:[#allocation8 + $0x78] sm:$0xff] }
 0x164   :  { %1080 = vmatprep.mubr.f32.mxu0 %v6928_v58  ;;  %v5076_v30 = vpack.c.bf16 %v470_v44, %v468_v60  ;;  %v1431_v33 = vld [vmem:[#allocation8 + $0x30] sm:$0xff]  ;;  %v476_v60 = vld [vmem:[#allocation5 + $0x240] sm:$0xff]  ;;  %v1438_v51 = vld [vmem:[#allocation8 + $0x68] sm:$0xff] }
 0x165   :  { %5069 = vmatpush1.bf16.msra.mxu0 %v5068_v10  ;;  %1719 = vmatmul.mubr.f32.gmra.mrb[28].mxu1 %v7233_v27  ;;  %v1430_v10 = vld [vmem:[#allocation8 + $0x28] sm:$0xff]  ;;  %v1433_v45 = vld [vmem:[#allocation8 + $0x40] sm:$0xff]  ;;  %v1444_v38 = vld [vmem:[#allocation8 + $0x98] sm:$0xff] }
 0x166   :  { %5197 = vmatpush1.bf16.msra.mxu1 %v5196_v11  ;;  %5071 = vmatprep.subr.bf16.mxu0 %v5070_v17  ;;  %v1432_v11 = vld [vmem:[#allocation8 + $0x38] sm:$0xff]  ;;  %v5204_v17 = vpack.c.bf16 %v1427_v63, %v1425_v43  ;;  %v478_v44 = vld [vmem:[#allocation5 + $0x250] sm:$0xff]  ;;  %v481_v43 = vld [vmem:[#allocation5 + $0x268] sm:$0xff] }
 0x167   :  { %1724 = vmatprep.mubr.f32.mxu1 %v7238_v0  ;;  %5199 = vmatprep.subr.bf16.mxu1 %v5198_v12  ;;  %v5206_v12 = vpack.c.bf16 %v1432_v11, %v1430_v10  ;;  %v483_v63 = vld [vmem:[#allocation5 + $0x278] sm:$0xff]  ;;  %v5084_v10 = vpack.c.bf16 %v478_v44, %v476_v60  ;;  %v480_v11 = vld [vmem:[#allocation5 + $0x260] sm:$0xff]  ;;  %v1442_v18 = vld [vmem:[#allocation8 + $0x88] sm:$0xff] }
 0x168   :  { %v486_v44 = vld [vmem:[#allocation5 + $0x290] sm:$0xff]  ;;  %v2649_v24 = vld [vmem:[#allocation11 + $0x318] sm:$0xff] }
 0x169   :  { %5073 = vmatpush1.bf16.msra.mxu0 %v5072_v56  ;;  %1725 = vmatmul.mubr.f32.gmra.mrb[30].mxu1 %v7242_v46  ;;  %v5080_v56 = vpack.c.bf16 %v474_v7, %v472_v4  ;;  %v5086_v4 = vpack.c.bf16 %v483_v63, %v481_v43  ;;  %v1437_v7 = vld [vmem:[#allocation8 + $0x60] sm:$0xff]  ;;  %v1443_v43 = vld [vmem:[#allocation8 + $0x90] sm:$0xff] }
 0x16a   :  { %5201 = vmatpush1.bf16.msra.mxu1 %v5200_v32  ;;  %5075 = vmatprep.subr.bf16.mxu0 %v5074_v55  ;;  %v5208_v32 = vpack.c.bf16 %v1431_v33, %v1429_v8  ;;  %v5082_v55 = vpack.c.bf16 %v479_v37, %v477_v35  ;;  %v1439_v8 = vld [vmem:[#allocation8 + $0x70] sm:$0xff]  ;;  %v219_v35 = vld [vmem:[#allocation2 + $0x40] sm:$0xfe] }
 0x16b   :  { %1795 = vmatprep.mubr.f32.mxu1 %v7960_v28  ;;  %5203 = vmatprep.subr.bf16.mxu1 %v5202_v61  ;;  %v1435_v61 = vld [vmem:[#allocation8 + $0x50] sm:$0xff]  ;;  %v2689_v41 = vld [vmem:[#allocation11 + $0x458] sm:$0xff] }
 0x16c   :  { %1081 = vmatmul.mubr.f32.vlgmr.msra.gmra.mrb[16].mxu0 %v7045_v21  ;;  %v487_v33 = vld [vmem:[#allocation5 + $0x298] sm:$0xff] }
 0x16d   :  { %5077 = vmatpush1.bf16.msra.mxu0 %v5076_v30  ;;  %1796 = vmatmul.mubr.f32.vlgmr.msra.gmra.mrb[16].mxu1 %v7248_v52  ;;  %v482_v30 = vld [vmem:[#allocation5 + $0x270] sm:$0xff]  ;;  %v222_v37 = vld [vmem:[#allocation2 + $0x58] sm:$0x1]  ;;  %v2693_v22 = vld [vmem:[#allocation11 + $0x478] sm:$0xff] }
 0x16e   :  { %5205 = vmatpush1.bf16.msra.mxu1 %v5204_v17  ;;  %1086 = vmatprep.mubr.f32.mxu0 %v7063_v39  ;;  %v5212_v17 = vpack.c.bf16 %v1435_v61, %v1433_v45  ;;  %v324_v60 = vrot.slane %v222_v37, 1  ;;  %v5216_v45 = vpack.c.bf16 %v1439_v8, %v1437_v7  ;;  %v1441_v61 = vld [vmem:[#allocation8 + $0x80] sm:$0xff]  ;;  %v491_v37 = vld [vmem:[#allocation5 + $0x2b8] sm:$0xff] }
 0x16f   :  { %5079 = vmatprep.subr.bf16.mxu0 %v5078_v6  ;;  %5207 = vmatprep.subr.bf16.mxu1 %v5206_v12  ;;  %v485_v6 = vld [vmem:[#allocation5 + $0x288] sm:$0xff]  ;;  %v5214_v12 = vpack.c.bf16 %v1440_v1, %v1438_v51  ;;  %v225_v51 = vld [vmem:[#allocation2 + $0x70] sm:$0xfe]  ;;  %v5218_v1 = vpack.c.bf16 %v1444_v38, %v1442_v18  ;;  %v488_v8 = vld [vmem:[#allocation5 + $0x2a0] sm:$0xff] }
 0x170   :  { %1087 = vmatmul.mubr.f32.gmra.mrb[18].mxu0 %v7074_v47  ;;  %1801 = vmatprep.mubr.f32.mxu1 %v7960_v28  ;;  %v1445_v18 = vld [vmem:[#allocation8 + $0xa0] sm:$0xff] }
 0x171   :  { %5081 = vmatpush1.bf16.msra.mxu0 %v5080_v56  ;;  %1092 = vmatprep.mubr.f32.mxu0 %v7102_v13  ;;  %v323_v56 = vrot.slane %v219_v35, 1  ;;  %v489_v35 = vld [vmem:[#allocation5 + $0x2a8] sm:$0xff] }
 0x172   :  { %5209 = vmatpush1.bf16.msra.mxu1 %v5208_v32  ;;  %5083 = vmatprep.subr.bf16.mxu0 %v5082_v55  ;;  %v5088_v32 = vpack.c.bf16 %v482_v30, %v480_v11  ;;  %v484_v55 = vld [vmem:[#allocation5 + $0x280] sm:$0xff]  ;;  %v332_v11 = vrot.slane %v225_v51, 1  ;;  %v1446_v30 = vld [vmem:[#allocation8 + $0xa8] sm:$0xff] }
 0x173   :  { %5211 = vmatprep.subr.bf16.mxu1 %v5210_v49  ;;  %v5090_v49 = vpack.c.bf16 %v487_v33, %v485_v6  ;;  %v7260_v63 = vsel %vm307_vm1, %v323_v56, %v324_v60  ;;  %v5092_v7 = vpack.c.bf16 %v486_v44, %v484_v55  ;;  %v490_v6 = vld [vmem:[#allocation5 + $0x2b0] sm:$0xff]  ;;  %v5094_v33 = vpack.c.bf16 %v491_v37, %v489_v35  ;;  %v231_v56 = vld [vmem:[#allocation2 + $0xa0] sm:$0xfe]  ;;  %v234_v60 = vld [vmem:[#allocation2 + $0xb8] sm:$0x1] }
 0x174   :  { %1093 = vmatmul.mubr.f32.gmra.mrb[20].mxu0 %v7127_v25  ;;  %1802 = vmatmul.mubr.f32.gmra.mrb[18].mxu1 %v7260_v63  ;;  %v341_v55 = vrot.slane %v231_v56, 1  ;;  %v342_v44 = vrot.slane %v234_v60, 1  ;;  %v240_v35 = vld [vmem:[#allocation2 + $0xe8] sm:$0x1] }
 0x175   :  { %5085 = vmatpush1.bf16.msra.mxu0 %v5084_v10  ;;  %1098 = vmatprep.mubr.f32.mxu0 %v7142_v50  ;;  %v228_v10 = vld [vmem:[#allocation2 + $0x88] sm:$0x1]  ;;  %v351_v60 = vrot.slane %v240_v35, 1 }
 0x176   :  { %5213 = vmatpush1.bf16.msra.mxu1 %v5212_v17  ;;  %5087 = vmatprep.subr.bf16.mxu0 %v5086_v4  ;;  %v1448_v17 = vld [vmem:[#allocation8 + $0xb8] sm:$0xff]  ;;  %v333_v4 = vrot.slane %v228_v10, 1  ;;  %v1447_v10 = vld [vmem:[#allocation8 + $0xb0] sm:$0xff] }
 0x177   :  { %5215 = vmatprep.subr.bf16.mxu1 %v5214_v12  ;;  %1807 = vmatprep.mubr.f32.mxu1 %v7960_v28  ;;  %v5220_v12 = vpack.c.bf16 %v1443_v43, %v1441_v61  ;;  %v5222_v51 = vpack.c.bf16 %v1448_v17, %v1446_v30  ;;  %v5096_v61 = vpack.c.bf16 %v490_v6, %v488_v8  ;;  %v492_v30 = vld [vmem:[#allocation5 + $0x2c0] sm:$0xff]  ;;  %v494_v17 = vld [vmem:[#allocation5 + $0x2d0] sm:$0xff] }
 0x178   :  { %1099 = vmatmul.mubr.f32.gmra.mrb[22].mxu0 %v7167_v16  ;;  %v7267_v38 = vsel %vm307_vm1, %v332_v11, %v333_v4  ;;  %v7274_v43 = vsel %vm307_vm1, %v341_v55, %v342_v44  ;;  %v5224_v37 = vpack.c.bf16 %v1447_v10, %v1445_v18  ;;  %v1449_v4 = vld [vmem:[#allocation8 + $0xc0] sm:$0xff]  ;;  %v1454_v8 = vld [vmem:[#allocation8 + $0xe8] sm:$0xff]  ;;  %v1456_v6 = vld [vmem:[#allocation8 + $0xf8] sm:$0xff]  ;;  %v5102_v55 = vpack.c.bf16 %v499_v53, %v497_v62 }
 0x179   :  { %5089 = vmatpush1.bf16.msra.mxu0 %v5088_v32  ;;  %1104 = vmatprep.mubr.f32.mxu0 %v7180_v42  ;;  %v495_v32 = vld [vmem:[#allocation5 + $0x2d8] sm:$0xff]  ;;  %v496_v18 = vld [vmem:[#allocation5 + $0x2e0] sm:$0xff]  ;;  %v498_v44 = vld [vmem:[#allocation5 + $0x2f0] sm:$0xff]  ;;  %v5230_v35 = vpack.c.bf16 %v1456_v6, %v1454_v8 }
 0x17a   :  { %5217 = vmatpush1.bf16.msra.mxu1 %v5216_v45  ;;  %5091 = vmatprep.subr.bf16.mxu0 %v5090_v49  ;;  %v1450_v45 = vld [vmem:[#allocation8 + $0xc8] sm:$0xff]  ;;  %v1452_v49 = vld [vmem:[#allocation8 + $0xd8] sm:$0xff]  ;;  %v5098_v11 = vpack.c.bf16 %v495_v32, %v493_v34  ;;  %v252_v62 = vld [vmem:[#allocation2 + $0x148] sm:$0x1] }
 0x17b   :  { %5219 = vmatprep.subr.bf16.mxu1 %v5218_v1  ;;  %1808 = vmatmul.mubr.f32.gmra.mrb[20].mxu1 %v7267_v38  ;;  %v237_v1 = vld [vmem:[#allocation2 + $0xd0] sm:$0xfe]  ;;  %v5226_v15 = vpack.c.bf16 %v1452_v49, %v1450_v45  ;;  %v243_v34 = vld [vmem:[#allocation2 + $0x100] sm:$0xfe] }
 0x17c   :  { %1105 = vmatmul.mubr.f32.gmra.mrb[24].mxu0 %v7199_v3  ;;  %1813 = vmatprep.mubr.f32.mxu1 %v7960_v28  ;;  %v350_v56 = vrot.slane %v237_v1, 1  ;;  %v359_v10 = vrot.slane %v243_v34, 1  ;;  %v1453_v45 = vld [vmem:[#allocation8 + $0xe0] sm:$0xff]  ;;  %v1455_v49 = vld [vmem:[#allocation8 + $0xf0] sm:$0xff] }
 0x17d   :  { %5093 = vmatpush1.bf16.msra.mxu0 %v5092_v7  ;;  %1110 = vmatprep.mubr.f32.mxu0 %v7208_v2  ;;  %v1451_v7 = vld [vmem:[#allocation8 + $0xd0] sm:$0xff]  ;;  %v2646_v6 = vld [vmem:[#allocation11 + $0x300] sm:$0xff] }
 0x17e   :  { %5221 = vmatpush1.bf16.msra.mxu1 %v5220_v12  ;;  %5095 = vmatprep.subr.bf16.mxu0 %v5094_v33  ;;  %v7279_v12 = vsel %vm307_vm1, %v350_v56, %v351_v60  ;;  %v5100_v33 = vpack.c.bf16 %v494_v17, %v492_v30  ;;  %v5228_v32 = vpack.c.bf16 %v1451_v7, %v1449_v4  ;;  %v1458_v56 = vld [vmem:[#allocation8 + $0x108] sm:$0xff]  ;;  %v369_v4 = vrot.slane %v252_v62, 1  ;;  %v2648_v34 = vld [vmem:[#allocation11 + $0x310] sm:$0xff] }
 0x17f   :  { %5223 = vmatprep.subr.bf16.mxu1 %v5222_v51  ;;  %1814 = vmatmul.mubr.f32.gmra.mrb[22].mxu1 %v7274_v43  ;;  %v246_v51 = vld [vmem:[#allocation2 + $0x118] sm:$0x1]  ;;  %v2647_v60 = vld [vmem:[#allocation11 + $0x308] sm:$0xff]  ;;  %v5232_v7 = vpack.c.bf16 %v1455_v49, %v1453_v45 }
 0x180   :  { %1111 = vmatmul.mubr.f32.gmra.mrb[26].mxu0 %v7220_v31  ;;  %1819 = vmatprep.mubr.f32.mxu1 %v7960_v28  ;;  %v360_v1 = vrot.slane %v246_v51, 1  ;;  %v249_v53 = vld [vmem:[#allocation2 + $0x130] sm:$0xfe]  ;;  %v5394_v8 = vpack.c.bf16 %v2649_v24, %v2647_v60 }
 0x181   :  { %5097 = vmatpush1.bf16.msra.mxu0 %v5096_v61  ;;  %1116 = vmatprep.mubr.f32.mxu0 %v7225_v5  ;;  %v1460_v61 = vld [vmem:[#allocation8 + $0x118] sm:$0xff]  ;;  %v368_v17 = vrot.slane %v249_v53, 1  ;;  %v2651_v51 = vld [vmem:[#allocation11 + $0x328] sm:$0xff] }
 0x182   :  { %5225 = vmatpush1.bf16.msra.mxu1 %v5224_v37  ;;  %5099 = vmatprep.subr.bf16.mxu0 %v5098_v11  ;;  %v7286_v30 = vsel %vm307_vm1, %v359_v10, %v360_v1  ;;  %v1457_v37 = vld [vmem:[#allocation8 + $0x100] sm:$0xff]  ;;  %v1459_v11 = vld [vmem:[#allocation8 + $0x110] sm:$0xff]  ;;  %v5234_v10 = vpack.c.bf16 %v1460_v61, %v1458_v56 }
 0x183   :  { %5227 = vmatprep.subr.bf16.mxu1 %v5226_v15  ;;  %1820 = vmatmul.mubr.f32.gmra.mrb[24].mxu1 %v7279_v12  ;;  %v5104_v15 = vpack.c.bf16 %v498_v44, %v496_v18  ;;  %v2653_v1 = vld [vmem:[#allocation11 + $0x338] sm:$0xff]  ;;  %v1462_v18 = vld [vmem:[#allocation8 + $0x128] sm:$0xff]  ;;  %v7293_v53 = vsel %vm307_vm1, %v368_v17, %v369_v4  ;;  %v5236_v45 = vpack.c.bf16 %v1459_v11, %v1457_v37  ;;  %v2652_v60 = vld [vmem:[#allocation11 + $0x330] sm:$0xff] }
 0x184   :  { %1117 = vmatmul.mubr.f32.gmra.mrb[28].mxu0 %v7233_v27  ;;  %1825 = vmatprep.mubr.f32.mxu1 %v7960_v28  ;;  %v1464_v44 = vld [vmem:[#allocation8 + $0x138] sm:$0xff]  ;;  %v5398_v49 = vpack.c.bf16 %v2653_v1, %v2651_v51  ;;  %v2650_v56 = vld [vmem:[#allocation11 + $0x320] sm:$0xff]  ;;  %v1463_v62 = vld [vmem:[#allocation8 + $0x130] sm:$0xff] }
 0x185   :  { %5101 = vmatpush1.bf16.msra.mxu0 %v5100_v33  ;;  %1122 = vmatprep.mubr.f32.mxu0 %v7238_v0  ;;  %v255_v33 = vld [vmem:[#allocation2 + $0x160] sm:$0xfe]  ;;  %v5238_v61 = vpack.c.bf16 %v1464_v44, %v1462_v18  ;;  %v2655_v17 = vld [vmem:[#allocation11 + $0x348] sm:$0xff]  ;;  %v5400_v37 = vpack.c.bf16 %v2652_v60, %v2650_v56  ;;  %v2660_v60 = vld [vmem:[#allocation11 + $0x370] sm:$0xff] }
 0x186   :  { %5229 = vmatpush1.bf16.msra.mxu1 %v5228_v32  ;;  %5103 = vmatprep.subr.bf16.mxu0 %v5102_v55  ;;  %v377_v24 = vrot.slane %v255_v33, 1  ;;  %v378_v32 = vrot.slane %v258_v36, 1  ;;  %v5396_v55 = vpack.c.bf16 %v2648_v34, %v2646_v6  ;;  %v2657_v4 = vld [vmem:[#allocation11 + $0x358] sm:$0xff]  ;;  %v1466_v36 = vld [vmem:[#allocation8 + $0x148] sm:$0xff]  ;;  %v1467_v33 = vld [vmem:[#allocation8 + $0x150] sm:$0xff] }
 0x187   :  { %5231 = vmatprep.subr.bf16.mxu1 %v5230_v35  ;;  %1826 = vmatmul.mubr.f32.gmra.mrb[26].mxu1 %v7286_v30  ;;  %v1461_v35 = vld [vmem:[#allocation8 + $0x120] sm:$0xff]  ;;  %v2659_v18 = vld [vmem:[#allocation11 + $0x368] sm:$0xff] }
 0x188   :  { %1123 = vmatmul.mubr.f32.gmra.mrb[30].mxu0 %v7242_v46  ;;  %1831 = vmatprep.mubr.f32.mxu1 %v7960_v28  ;;  %v7300_v6 = vsel %vm307_vm1, %v377_v24, %v378_v32  ;;  %v1402_v11 = vld [vmem:[#allocation2 + $0x8] sm:$0xff]  ;;  %v2661_v44 = vld [vmem:[#allocation11 + $0x378] sm:$0xff] }
 0x189   :  { %5105 = vmatpush1.bf16.msra.mxu0 %v5104_v15  ;;  %1193 = vmatprep.mubr.f32.mxu0 %v7960_v28  ;;  %v1468_v15 = vld [vmem:[#allocation8 + $0x158] sm:$0xff]  ;;  %v1465_v34 = vld [vmem:[#allocation8 + $0x140] sm:$0xff]  ;;  %v1470_v24 = vld [vmem:[#allocation8 + $0x168] sm:$0xff] }
 0x18a   :  { %5233 = vmatpush1.bf16.msra.mxu1 %v5232_v7  ;;  %5395 = vmatprep.subr.bf16.mxu0 %v5394_v8  ;;  %v5240_v7 = vpack.c.bf16 %v1463_v62, %v1461_v35  ;;  %v5402_v8 = vpack.c.bf16 %v2657_v4, %v2655_v17  ;;  %v2654_v51 = vld [vmem:[#allocation11 + $0x340] sm:$0xff]  ;;  %v5242_v1 = vpack.c.bf16 %v1468_v15, %v1466_v36  ;;  %v1472_v32 = vld [vmem:[#allocation8 + $0x178] sm:$0xff]  ;;  %v1471_v62 = vld [vmem:[#allocation8 + $0x170] sm:$0xff] }
 0x18b   :  { %5235 = vmatprep.subr.bf16.mxu1 %v5234_v10  ;;  %1832 = vmatmul.mubr.f32.gmra.mrb[28].mxu1 %v7293_v53  ;;  %v2656_v10 = vld [vmem:[#allocation11 + $0x350] sm:$0xff]  ;;  %v1469_v35 = vld [vmem:[#allocation8 + $0x160] sm:$0xff]  ;;  %v2663_v17 = vld [vmem:[#allocation11 + $0x388] sm:$0xff] }
 0x18c   :  { %1194 = vmatmul.mubr.f32.vlgmr.msra.gmra.mrb[16].mxu0 %v7248_v52  ;;  %1837 = vmatprep.mubr.f32.mxu1 %v7960_v28  ;;  %v2658_v56 = vld [vmem:[#allocation11 + $0x360] sm:$0xff]  ;;  %v2665_v4 = vld [vmem:[#allocation11 + $0x398] sm:$0xff] }
 0x18d   :  { %5397 = vmatpush1.bf16.msra.mxu0 %v5396_v55  ;;  %1199 = vmatprep.mubr.f32.mxu0 %v7960_v28  ;;  %v5404_v55 = vpack.c.bf16 %v2656_v10, %v2654_v51  ;;  %v1474_v36 = vld [vmem:[#allocation8 + $0x188] sm:$0xff]  ;;  %v1476_v15 = vld [vmem:[#allocation8 + $0x198] sm:$0xff] }
 0x18e   :  { %5237 = vmatpush1.bf16.msra.mxu1 %v5236_v45  ;;  %5399 = vmatprep.subr.bf16.mxu0 %v5398_v49  ;;  %v5244_v45 = vpack.c.bf16 %v1467_v33, %v1465_v34  ;;  %v5406_v49 = vpack.c.bf16 %v2661_v44, %v2659_v18  ;;  %v2662_v34 = vld [vmem:[#allocation11 + $0x380] sm:$0xff]  ;;  %v2664_v51 = vld [vmem:[#allocation11 + $0x390] sm:$0xff]  ;;  %v5250_v10 = vpack.c.bf16 %v1476_v15, %v1474_v36  ;;  %v2667_v33 = vld [vmem:[#allocation11 + $0x3a8] sm:$0xff] }
 0x18f   :  { %5239 = vmatprep.subr.bf16.mxu1 %v5238_v61  ;;  %1838 = vmatmul.mubr.f32.gmra.mrb[30].mxu1 %v7300_v6  ;;  %v5246_v61 = vpack.c.bf16 %v1472_v32, %v1470_v24  ;;  %v2669_v18 = vld [vmem:[#allocation11 + $0x3b8] sm:$0xff]  ;;  %v1478_v44 = vld [vmem:[#allocation8 + $0x1a8] sm:$0xff]  ;;  %v5412_v32 = vpack.c.bf16 %v2664_v51, %v2662_v34  ;;  %v2672_v34 = vld [vmem:[#allocation11 + $0x3d0] sm:$0xff] }
 0x190   :  { %1200 = vmatmul.mubr.f32.gmra.mrb[18].mxu0 %v7260_v63  ;;  %1908 = vmatprep.mubr.f32.mxu1 %v1402_v11  ;;  %v5248_v11 = vpack.c.bf16 %v1471_v62, %v1469_v35  ;;  %v1480_v24 = vld [vmem:[#allocation8 + $0x1b8] sm:$0xff]  ;;  %v2666_v35 = vld [vmem:[#allocation11 + $0x3a0] sm:$0xff]  ;;  %v2671_v62 = vld [vmem:[#allocation11 + $0x3c8] sm:$0xff] }
 0x191   :  { %5401 = vmatpush1.bf16.msra.mxu0 %v5400_v37  ;;  %1205 = vmatprep.mubr.f32.mxu0 %v7960_v28  ;;  %v5408_v37 = vpack.c.bf16 %v2660_v60, %v2658_v56  ;;  %v2668_v56 = vld [vmem:[#allocation11 + $0x3b0] sm:$0xff]  ;;  %v5254_v60 = vpack.c.bf16 %v1480_v24, %v1478_v44 }
 0x192   :  { %5241 = vmatpush1.bf16.msra.mxu1 %v5240_v7  ;;  %5403 = vmatprep.subr.bf16.mxu0 %v5402_v8  ;;  %v5410_v7 = vpack.c.bf16 %v2665_v4, %v2663_v17  ;;  %v1473_v8 = vld [vmem:[#allocation8 + $0x180] sm:$0xff]  ;;  %v1482_v4 = vld [vmem:[#allocation8 + $0x1c8] sm:$0xff]  ;;  %v1484_v36 = vld [vmem:[#allocation8 + $0x1d8] sm:$0xff]  ;;  %v5416_v15 = vpack.c.bf16 %v2668_v56, %v2666_v35 }
 0x193   :  { %5243 = vmatprep.subr.bf16.mxu1 %v5242_v1  ;;  %v1475_v1 = vld [vmem:[#allocation8 + $0x190] sm:$0xff]  ;;  %v2673_v17 = vld [vmem:[#allocation11 + $0x3d8] sm:$0xff]  ;;  %v5258_v51 = vpack.c.bf16 %v1484_v36, %v1482_v4 }
 0x194   :  { %1206 = vmatmul.mubr.f32.gmra.mrb[20].mxu0 %v7267_v38  ;;  %v1488_v44 = vld [vmem:[#allocation8 + $0x1f8] sm:$0xff] }
 0x195   :  { %5405 = vmatpush1.bf16.msra.mxu0 %v5404_v55  ;;  %1211 = vmatprep.mubr.f32.mxu0 %v7960_v28  ;;  %v5252_v55 = vpack.c.bf16 %v1475_v1, %v1473_v8  ;;  %v2670_v8 = vld [vmem:[#allocation11 + $0x3c0] sm:$0xff]  ;;  %v2675_v1 = vld [vmem:[#allocation11 + $0x3e8] sm:$0xff]  ;;  %v2676_v35 = vld [vmem:[#allocation11 + $0x3f0] sm:$0xff] }
 0x196   :  { %5245 = vmatpush1.bf16.msra.mxu1 %v5244_v45  ;;  %5407 = vmatprep.subr.bf16.mxu0 %v5406_v49  ;;  %v5414_v45 = vpack.c.bf16 %v2669_v18, %v2667_v33  ;;  %v1477_v49 = vld [vmem:[#allocation8 + $0x1a0] sm:$0xff]  ;;  %v1486_v18 = vld [vmem:[#allocation8 + $0x1e8] sm:$0xff]  ;;  %v5420_v24 = vpack.c.bf16 %v2672_v34, %v2670_v8  ;;  %v1492_v4 = vld [vmem:[#allocation8 + $0x218] sm:$0xff] }
 0x197   :  { %5247 = vmatprep.subr.bf16.mxu1 %v5246_v61  ;;  %v1479_v61 = vld [vmem:[#allocation8 + $0x1b0] sm:$0xff]  ;;  %v2677_v33 = vld [vmem:[#allocation11 + $0x3f8] sm:$0xff]  ;;  %v5262_v56 = vpack.c.bf16 %v1488_v44, %v1486_v18 }
 0x198   :  { %1212 = vmatmul.mubr.f32.gmra.mrb[22].mxu0 %v7274_v43  ;;  %v1489_v34 = vld [vmem:[#allocation8 + $0x200] sm:$0xff] }
 0x199   :  { %5409 = vmatpush1.bf16.msra.mxu0 %v5408_v37  ;;  %1217 = vmatprep.mubr.f32.mxu0 %v7960_v28  ;;  %v5256_v37 = vpack.c.bf16 %v1479_v61, %v1477_v49  ;;  %v2674_v49 = vld [vmem:[#allocation11 + $0x3e0] sm:$0xff]  ;;  %v2679_v61 = vld [vmem:[#allocation11 + $0x408] sm:$0xff]  ;;  %v2685_v18 = vld [vmem:[#allocation11 + $0x438] sm:$0xff] }
 0x19a   :  { %5249 = vmatpush1.bf16.msra.mxu1 %v5248_v11  ;;  %5411 = vmatprep.subr.bf16.mxu0 %v5410_v7  ;;  %v5418_v11 = vpack.c.bf16 %v2673_v17, %v2671_v62  ;;  %v1481_v7 = vld [vmem:[#allocation8 + $0x1c0] sm:$0xff]  ;;  %v1490_v17 = vld [vmem:[#allocation8 + $0x208] sm:$0xff]  ;;  %v5424_v36 = vpack.c.bf16 %v2676_v35, %v2674_v49  ;;  %v2684_v49 = vld [vmem:[#allocation11 + $0x430] sm:$0xff] }
 0x19b   :  { %5251 = vmatprep.subr.bf16.mxu1 %v5250_v10  ;;  %v1483_v10 = vld [vmem:[#allocation8 + $0x1d0] sm:$0xff]  ;;  %v2681_v62 = vld [vmem:[#allocation11 + $0x418] sm:$0xff]  ;;  %v5266_v8 = vpack.c.bf16 %v1492_v4, %v1490_v17 }
 0x19c   :  { %1218 = vmatmul.mubr.f32.gmra.mrb[24].mxu0 %v7279_v12  ;;  %v1401_v44 = vld [vmem:[#allocation2] sm:$0xff]  ;;  %v2687_v4 = vld [vmem:[#allocation11 + $0x448] sm:$0xff] }
 0x19d   :  { %5413 = vmatpush1.bf16.msra.mxu0 %v5412_v32  ;;  %1223 = vmatprep.mubr.f32.mxu0 %v7960_v28  ;;  %v5260_v32 = vpack.c.bf16 %v1483_v10, %v1481_v7  ;;  %v2680_v7 = vld [vmem:[#allocation11 + $0x410] sm:$0xff]  ;;  %v1494_v10 = vld [vmem:[#allocation8 + $0x228] sm:$0xff] }
 0x19e   :  { %5253 = vmatpush1.bf16.msra.mxu1 %v5252_v55  ;;  %5415 = vmatprep.subr.bf16.mxu0 %v5414_v45  ;;  %v5422_v55 = vpack.c.bf16 %v2677_v33, %v2675_v1  ;;  %v1485_v45 = vld [vmem:[#allocation8 + $0x1e0] sm:$0xff]  ;;  %v1496_v1 = vld [vmem:[#allocation8 + $0x238] sm:$0xff]  ;;  %v2683_v33 = vld [vmem:[#allocation11 + $0x428] sm:$0xff] }
 0x19f   :  { %5255 = vmatprep.subr.bf16.mxu1 %v5254_v60  ;;  %v1487_v60 = vld [vmem:[#allocation8 + $0x1f0] sm:$0xff]  ;;  %v5270_v35 = vpack.c.bf16 %v1496_v1, %v1494_v10  ;;  %v1500_v17 = vld [vmem:[#allocation8 + $0x258] sm:$0xff]  ;;  %v1502_v1 = vld [vmem:[#allocation8 + $0x268] sm:$0xff] }
 0x1a0   :  { %1224 = vmatmul.mubr.f32.gmra.mrb[26].mxu0 %v7286_v30  ;;  %v1499_v10 = vld [vmem:[#allocation8 + $0x250] sm:$0xff] }
 0x1a1   :  { %5417 = vmatpush1.bf16.msra.mxu0 %v5416_v15  ;;  %1229 = vmatprep.mubr.f32.mxu0 %v7960_v28  ;;  %v5264_v15 = vpack.c.bf16 %v1487_v60, %v1485_v45  ;;  %v2682_v45 = vld [vmem:[#allocation11 + $0x420] sm:$0xff] }
 0x1a2   :  { %5257 = vmatpush1.bf16.msra.mxu1 %v5256_v37  ;;  %5419 = vmatprep.subr.bf16.mxu0 %v5418_v11  ;;  %v5426_v37 = vpack.c.bf16 %v2681_v62, %v2679_v61  ;;  %v2678_v11 = vld [vmem:[#allocation11 + $0x400] sm:$0xff]  ;;  %v1495_v61 = vld [vmem:[#allocation8 + $0x230] sm:$0xff] }
 0x1a3   :  { %5259 = vmatprep.subr.bf16.mxu1 %v5258_v51  ;;  %v1491_v51 = vld [vmem:[#allocation8 + $0x210] sm:$0xff]  ;;  %v1493_v60 = vld [vmem:[#allocation8 + $0x220] sm:$0xff]  ;;  %v1498_v62 = vld [vmem:[#allocation8 + $0x248] sm:$0xff] }
 0x1a4   :  { %1230 = vmatmul.mubr.f32.gmra.mrb[28].mxu0 %v7293_v53 }
 0x1a5   :  { %5421 = vmatpush1.bf16.msra.mxu0 %v5420_v24  ;;  %1235 = vmatprep.mubr.f32.mxu0 %v7960_v28  ;;  %v5428_v24 = vpack.c.bf16 %v2680_v7, %v2678_v11  ;;  %v5432_v11 = vpack.c.bf16 %v2684_v49, %v2682_v45  ;;  %v2688_v7 = vld [vmem:[#allocation11 + $0x450] sm:$0xff]  ;;  %v2690_v45 = vld [vmem:[#allocation11 + $0x460] sm:$0xff] }
 0x1a6   :  { %5261 = vmatpush1.bf16.msra.mxu1 %v5260_v32  ;;  %5423 = vmatprep.subr.bf16.mxu0 %v5422_v55  ;;  %v5268_v32 = vpack.c.bf16 %v1491_v51, %v1489_v34  ;;  %v1405_v55 = vld [vmem:[#allocation2 + $0x38] sm:$0xff]  ;;  %v5434_v34 = vpack.c.bf16 %v2689_v41, %v2687_v4  ;;  %v1497_v51 = vld [vmem:[#allocation8 + $0x240] sm:$0xff] }
 0x1a7   :  { %5263 = vmatprep.subr.bf16.mxu1 %v5262_v56  ;;  %v5430_v56 = vpack.c.bf16 %v2685_v18, %v2683_v33  ;;  %v1504_v33 = vld [vmem:[#allocation8 + $0x278] sm:$0xff]  ;;  %v2691_v18 = vld [vmem:[#allocation11 + $0x468] sm:$0xff] }
 0x1a8   :  { %1236 = vmatmul.mubr.f32.gmra.mrb[30].mxu0 %v7300_v6  ;;  %v2692_v49 = vld [vmem:[#allocation11 + $0x470] sm:$0xff]  ;;  %v5438_v41 = vpack.c.bf16 %v2693_v22, %v2691_v18  ;;  %v2697_v4 = vld [vmem:[#allocation11 + $0x498] sm:$0xff] }
 0x1a9   :  { %5425 = vmatpush1.bf16.msra.mxu0 %v5424_v36  ;;  %2806 = vmatprep.mubr.f32.mxu0 %v6928_v58  ;;  %v1404_v36 = vld [vmem:[#allocation2 + $0x30] sm:$0xff]  ;;  %v5272_v58 = vpack.c.bf16 %v1495_v61, %v1493_v60  ;;  %v2701_v18 = vld [vmem:[#allocation11 + $0x4b8] sm:$0xff] }
 0x1aa   :  { %5265 = vmatpush1.bf16.msra.mxu1 %v5264_v15  ;;  %5427 = vmatprep.subr.bf16.mxu0 %v5426_v37  ;;  %v1408_v15 = vld [vmem:[#allocation2 + $0x68] sm:$0xff]  ;;  %v1503_v60 = vld [vmem:[#allocation8 + $0x270] sm:$0xff] }
 0x1ab   :  { %5267 = vmatprep.subr.bf16.mxu1 %v5266_v8  ;;  %v2686_v37 = vld [vmem:[#allocation11 + $0x440] sm:$0xff]  ;;  %v5274_v8 = vpack.c.bf16 %v1500_v17, %v1498_v62  ;;  %v1508_v62 = vld [vmem:[#allocation8 + $0x298] sm:$0xff]  ;;  %v2695_v17 = vld [vmem:[#allocation11 + $0x488] sm:$0xff] }
 0x1ac   :  { %v1506_v61 = vld [vmem:[#allocation8 + $0x288] sm:$0xff]  ;;  %v5442_v22 = vpack.c.bf16 %v2697_v4, %v2695_v17  ;;  %v2705_v4 = vld [vmem:[#allocation11 + $0x4d8] sm:$0xff] }
 0x1ad   :  { %1909 = vmatmul.mubr.f32.vlgmr.msra.gmra.mrb[16].mxu1 %v1401_v44  ;;  %5429 = vmatpush1.bf16.msra.mxu0 %v5428_v24  ;;  %v1407_v44 = vld [vmem:[#allocation2 + $0x60] sm:$0xff]  ;;  %v5436_v24 = vpack.c.bf16 %v2688_v7, %v2686_v37  ;;  %v2696_v7 = vld [vmem:[#allocation11 + $0x490] sm:$0xff]  ;;  %v2703_v17 = vld [vmem:[#allocation11 + $0x4c8] sm:$0xff] }
 0x1ae   :  { %5269 = vmatpush1.bf16.msra.mxu1 %v5268_v32  ;;  %1914 = vmatprep.mubr.f32.mxu1 %v1405_v55  ;;  %v5276_v32 = vpack.c.bf16 %v1499_v10, %v1497_v51  ;;  %v1411_v55 = vld [vmem:[#allocation2 + $0x98] sm:$0xff]  ;;  %v2694_v37 = vld [vmem:[#allocation11 + $0x480] sm:$0xff] }
 0x1af   :  { %5271 = vmatprep.subr.bf16.mxu1 %v5270_v35  ;;  %5431 = vmatprep.subr.bf16.mxu0 %v5430_v56  ;;  %v5278_v35 = vpack.c.bf16 %v1504_v33, %v1502_v1  ;;  %v1501_v56 = vld [vmem:[#allocation8 + $0x260] sm:$0xff]  ;;  %v1507_v51 = vld [vmem:[#allocation8 + $0x290] sm:$0xff]  ;;  %v1510_v10 = vld [vmem:[#allocation8 + $0x2a8] sm:$0xff] }
 0x1b0   :  { %v1512_v1 = vld [vmem:[#allocation8 + $0x2b8] sm:$0xff]  ;;  %v2699_v33 = vld [vmem:[#allocation11 + $0x4a8] sm:$0xff] }
 0x1b1   :  { %1915 = vmatmul.mubr.f32.gmra.mrb[18].mxu1 %v1404_v36  ;;  %5433 = vmatpush1.bf16.msra.mxu0 %v5432_v11  ;;  %v1410_v36 = vld [vmem:[#allocation2 + $0x90] sm:$0xff]  ;;  %v5440_v11 = vpack.c.bf16 %v2692_v49, %v2690_v45  ;;  %v2698_v45 = vld [vmem:[#allocation11 + $0x4a0] sm:$0xff] }
 0x1b2   :  { %5273 = vmatpush1.bf16.msra.mxu1 %v5272_v58  ;;  %1920 = vmatprep.mubr.f32.mxu1 %v1408_v15  ;;  %v5280_v58 = vpack.c.bf16 %v1503_v60, %v1501_v56  ;;  %v1414_v15 = vld [vmem:[#allocation2 + $0xc8] sm:$0xff]  ;;  %v2700_v49 = vld [vmem:[#allocation11 + $0x4b0] sm:$0xff] }
 0x1b3   :  { %5275 = vmatprep.subr.bf16.mxu1 %v5274_v8  ;;  %5435 = vmatprep.subr.bf16.mxu0 %v5434_v34  ;;  %v5282_v8 = vpack.c.bf16 %v1508_v62, %v1506_v61  ;;  %v1505_v34 = vld [vmem:[#allocation8 + $0x280] sm:$0xff]  ;;  %v1511_v60 = vld [vmem:[#allocation8 + $0x2b0] sm:$0xff]  ;;  %v1514_v61 = vld [vmem:[#allocation8 + $0x2c8] sm:$0xff] }
 0x1b4   :  { %v1509_v56 = vld [vmem:[#allocation8 + $0x2a0] sm:$0xff]  ;;  %v1516_v62 = vld [vmem:[#allocation8 + $0x2d8] sm:$0xff] }
 0x1b5   :  { %1921 = vmatmul.mubr.f32.gmra.mrb[20].mxu1 %v1407_v44  ;;  %5437 = vmatpush1.bf16.msra.mxu0 %v5436_v24  ;;  %v1413_v44 = vld [vmem:[#allocation2 + $0xc0] sm:$0xff]  ;;  %v5444_v24 = vpack.c.bf16 %v2696_v7, %v2694_v37  ;;  %v2704_v7 = vld [vmem:[#allocation11 + $0x4d0] sm:$0xff] }
 0x1b6   :  { %5277 = vmatpush1.bf16.msra.mxu1 %v5276_v32  ;;  %1926 = vmatprep.mubr.f32.mxu1 %v1411_v55  ;;  %v5284_v32 = vpack.c.bf16 %v1507_v51, %v1505_v34  ;;  %v1417_v55 = vld [vmem:[#allocation2 + $0xf8] sm:$0xff]  ;;  %v2702_v37 = vld [vmem:[#allocation11 + $0x4c0] sm:$0xff] }
 0x1b7   :  { %5279 = vmatprep.subr.bf16.mxu1 %v5278_v35  ;;  %5439 = vmatprep.subr.bf16.mxu0 %v5438_v41  ;;  %v5286_v35 = vpack.c.bf16 %v1512_v1, %v1510_v10  ;;  %v5446_v41 = vpack.c.bf16 %v2701_v18, %v2699_v33  ;;  %v1513_v34 = vld [vmem:[#allocation8 + $0x2c0] sm:$0xff]  ;;  %v1515_v51 = vld [vmem:[#allocation8 + $0x2d0] sm:$0xff]  ;;  %v1518_v10 = vld [vmem:[#allocation8 + $0x2e8] sm:$0xff] }
 0x1b8   :  { %v1520_v1 = vld [vmem:[#allocation8 + $0x2f8] sm:$0xff]  ;;  %v2707_v33 = vld [vmem:[#allocation11 + $0x4e8] sm:$0xff] }
 0x1b9   :  { %1927 = vmatmul.mubr.f32.gmra.mrb[22].mxu1 %v1410_v36  ;;  %5441 = vmatpush1.bf16.msra.mxu0 %v5440_v11  ;;  %v1416_v36 = vld [vmem:[#allocation2 + $0xf0] sm:$0xff]  ;;  %v5448_v11 = vpack.c.bf16 %v2700_v49, %v2698_v45  ;;  %v2709_v18 = vld [vmem:[#allocation11 + $0x4f8] sm:$0xff]  ;;  %v2706_v45 = vld [vmem:[#allocation11 + $0x4e0] sm:$0xff] }
 0x1ba   :  { %5281 = vmatpush1.bf16.msra.mxu1 %v5280_v58  ;;  %1932 = vmatprep.mubr.f32.mxu1 %v1414_v15  ;;  %v5288_v58 = vpack.c.bf16 %v1511_v60, %v1509_v56  ;;  %v1420_v15 = vld [vmem:[#allocation2 + $0x128] sm:$0xff]  ;;  %v2708_v49 = vld [vmem:[#allocation11 + $0x4f0] sm:$0xff] }
 0x1bb   :  { %5283 = vmatprep.subr.bf16.mxu1 %v5282_v8  ;;  %5443 = vmatprep.subr.bf16.mxu0 %v5442_v22  ;;  %v5290_v8 = vpack.c.bf16 %v1516_v62, %v1514_v61  ;;  %v5450_v22 = vpack.c.bf16 %v2705_v4, %v2703_v17  ;;  %v1517_v56 = vld [vmem:[#allocation8 + $0x2e0] sm:$0xff]  ;;  %v1519_v60 = vld [vmem:[#allocation8 + $0x2f0] sm:$0xff]  ;;  %v2072_v61 = vld [vmem:[#allocation8 + $0x608] sm:$0xff] }
 0x1bc   :  { %v2074_v62 = vld [vmem:[#allocation8 + $0x618] sm:$0xff]  ;;  %v2711_v17 = vld [vmem:[#allocation11 + $0x508] sm:$0xff] }
 0x1bd   :  { %1933 = vmatmul.mubr.f32.gmra.mrb[24].mxu1 %v1413_v44  ;;  %5445 = vmatpush1.bf16.msra.mxu0 %v5444_v24  ;;  %v1419_v44 = vld [vmem:[#allocation2 + $0x120] sm:$0xff]  ;;  %v5452_v24 = vpack.c.bf16 %v2704_v7, %v2702_v37  ;;  %v2712_v37 = vld [vmem:[#allocation11 + $0x510] sm:$0xff]  ;;  %v5298_v7 = vpack.c.bf16 %v2074_v62, %v2072_v61  ;;  %v2080_v61 = vld [vmem:[#allocation8 + $0x648] sm:$0xff] }
 0x1be   :  { %5285 = vmatpush1.bf16.msra.mxu1 %v5284_v32  ;;  %1938 = vmatprep.mubr.f32.mxu1 %v1417_v55  ;;  %v5292_v32 = vpack.c.bf16 %v1515_v51, %v1513_v34  ;;  %v1423_v55 = vld [vmem:[#allocation2 + $0x158] sm:$0xff]  ;;  %v2076_v51 = vld [vmem:[#allocation8 + $0x628] sm:$0xff] }
 0x1bf   :  { %5287 = vmatprep.subr.bf16.mxu1 %v5286_v35  ;;  %5447 = vmatprep.subr.bf16.mxu0 %v5446_v41  ;;  %v5294_v35 = vpack.c.bf16 %v1520_v1, %v1518_v10  ;;  %v5454_v41 = vpack.c.bf16 %v2709_v18, %v2707_v33  ;;  %v2713_v4 = vld [vmem:[#allocation11 + $0x518] sm:$0xff]  ;;  %v2073_v34 = vld [vmem:[#allocation8 + $0x610] sm:$0xff] }
 0x1c0   :  { %v2078_v10 = vld [vmem:[#allocation8 + $0x638] sm:$0xff]  ;;  %v2715_v1 = vld [vmem:[#allocation11 + $0x528] sm:$0xff] }
 0x1c1   :  { %1939 = vmatmul.mubr.f32.gmra.mrb[26].mxu1 %v1416_v36  ;;  %5449 = vmatpush1.bf16.msra.mxu0 %v5448_v11  ;;  %v5456_v36 = vpack.c.bf16 %v2708_v49, %v2706_v45  ;;  %v1422_v11 = vld [vmem:[#allocation2 + $0x150] sm:$0xff]  ;;  %v2717_v33 = vld [vmem:[#allocation11 + $0x538] sm:$0xff]  ;;  %v5302_v49 = vpack.c.bf16 %v2078_v10, %v2076_v51 }
 0x1c2   :  { %5289 = vmatpush1.bf16.msra.mxu1 %v5288_v58  ;;  %1944 = vmatprep.mubr.f32.mxu1 %v1420_v15  ;;  %v5296_v58 = vpack.c.bf16 %v1519_v60, %v1517_v56  ;;  %v2710_v15 = vld [vmem:[#allocation11 + $0x500] sm:$0xff]  ;;  %v1403_v18 = vld [vmem:[#allocation2 + $0x10] sm:$0xff]  ;;  %v2721_v60 = vld [vmem:[#allocation11 + $0x558] sm:$0xff] }
 0x1c3   :  { %5291 = vmatprep.subr.bf16.mxu1 %v5290_v8  ;;  %5451 = vmatprep.subr.bf16.mxu0 %v5450_v22  ;;  %v5458_v8 = vpack.c.bf16 %v2713_v4, %v2711_v17  ;;  %v2071_v22 = vld [vmem:[#allocation8 + $0x600] sm:$0xff]  ;;  %v2716_v45 = vld [vmem:[#allocation11 + $0x530] sm:$0xff]  ;;  %v2719_v56 = vld [vmem:[#allocation11 + $0x548] sm:$0xff] }
 0x1c4   :  { %v2082_v62 = vld [vmem:[#allocation8 + $0x658] sm:$0xff] }
 0x1c5   :  { %1945 = vmatmul.mubr.f32.gmra.mrb[28].mxu1 %v1419_v44  ;;  %5453 = vmatpush1.bf16.msra.mxu0 %v5452_v24  ;;  %v5460_v44 = vpack.c.bf16 %v2712_v37, %v2710_v15  ;;  %v5300_v24 = vpack.c.bf16 %v2073_v34, %v2071_v22  ;;  %v2720_v15 = vld [vmem:[#allocation11 + $0x550] sm:$0xff]  ;;  %v5306_v37 = vpack.c.bf16 %v2082_v62, %v2080_v61  ;;  %v2725_v22 = vld [vmem:[#allocation11 + $0x578] sm:$0xff]  ;;  %v2726_v61 = vld [vmem:[#allocation11 + $0x580] sm:$0xff] }
 0x1c6   :  { %5293 = vmatpush1.bf16.msra.mxu1 %v5292_v32  ;;  %1950 = vmatprep.mubr.f32.mxu1 %v1423_v55  ;;  %v2075_v32 = vld [vmem:[#allocation8 + $0x620] sm:$0xff]  ;;  %v2086_v34 = vld [vmem:[#allocation8 + $0x678] sm:$0xff] }
 0x1c7   :  { %5295 = vmatprep.subr.bf16.mxu1 %v5294_v35  ;;  %5455 = vmatprep.subr.bf16.mxu0 %v5454_v41  ;;  %v2714_v55 = vld [vmem:[#allocation11 + $0x520] sm:$0xff]  ;;  %v5462_v35 = vpack.c.bf16 %v2717_v33, %v2715_v1  ;;  %v2077_v41 = vld [vmem:[#allocation8 + $0x630] sm:$0xff] }
 0x1c8   :  { %v5464_v17 = vpack.c.bf16 %v2716_v45, %v2714_v55  ;;  %v5304_v4 = vpack.c.bf16 %v2077_v41, %v2075_v32  ;;  %v1406_v51 = vld [vmem:[#allocation2 + $0x40] sm:$0xff]  ;;  %v2085_v32 = vld [vmem:[#allocation8 + $0x670] sm:$0xff]  ;;  %v2088_v45 = vld [vmem:[#allocation8 + $0x688] sm:$0xff] }
 0x1c9   :  { %1951 = vmatmul.mubr.f32.gmra.mrb[30].mxu1 %v1422_v11  ;;  %5457 = vmatpush1.bf16.msra.mxu0 %v5456_v36  ;;  %v5466_v36 = vpack.c.bf16 %v2721_v60, %v2719_v56  ;;  %v2079_v11 = vld [vmem:[#allocation8 + $0x640] sm:$0xff]  ;;  %v2728_v62 = vld [vmem:[#allocation11 + $0x590] sm:$0xff] }
 0x1ca   :  { %5297 = vmatpush1.bf16.msra.mxu1 %v5296_v58  ;;  %2021 = vmatprep.mubr.f32.mxu1 %v7960_v28  ;;  %v2718_v58 = vld [vmem:[#allocation11 + $0x540] sm:$0xff]  ;;  %v2729_v55 = vld [vmem:[#allocation11 + $0x598] sm:$0xff] }
 0x1cb   :  { %5299 = vmatprep.subr.bf16.mxu1 %v5298_v7  ;;  %5459 = vmatprep.subr.bf16.mxu0 %v5458_v8  ;;  %v2081_v7 = vld [vmem:[#allocation8 + $0x650] sm:$0xff]  ;;  %v2083_v33 = vld [vmem:[#allocation8 + $0x660] sm:$0xff] }
 0x1cc   :  { %2807 = vmatmul.mubr.f32.vlgmr.msra.gmra.mrb[32].mxu0 %v7045_v21  ;;  %v2723_v8 = vld [vmem:[#allocation11 + $0x568] sm:$0xff]  ;;  %v5308_v10 = vpack.c.bf16 %v2081_v7, %v2079_v11  ;;  %v5312_v41 = vpack.c.bf16 %v2085_v32, %v2083_v33  ;;  %v2087_v60 = vld [vmem:[#allocation8 + $0x680] sm:$0xff] }
 0x1cd   :  { %2022 = vmatmul.mubr.f32.vlgmr.msra.gmra.mrb[16].mxu1 %v1403_v18  ;;  %5461 = vmatpush1.bf16.msra.mxu0 %v5460_v44  ;;  %v2084_v21 = vld [vmem:[#allocation8 + $0x668] sm:$0xff]  ;;  %v5470_v1 = vpack.c.bf16 %v2725_v22, %v2723_v8  ;;  %v2724_v44 = vld [vmem:[#allocation11 + $0x570] sm:$0xff]  ;;  %v2091_v8 = vld [vmem:[#allocation8 + $0x6a0] sm:$0xff] }
 0x1ce   :  { %5301 = vmatpush1.bf16.msra.mxu1 %v5300_v24  ;;  %2812 = vmatprep.mubr.f32.mxu0 %v7063_v39  ;;  %v5468_v39 = vpack.c.bf16 %v2720_v15, %v2718_v58  ;;  %v2722_v18 = vld [vmem:[#allocation11 + $0x560] sm:$0xff]  ;;  %v5310_v24 = vpack.c.bf16 %v2086_v34, %v2084_v21  ;;  %v2094_v58 = vld [vmem:[#allocation8 + $0x6b8] sm:$0xff]  ;;  %v5476_v15 = vpack.c.bf16 %v2728_v62, %v2726_v61 }
 0x1cf   :  { %5303 = vmatprep.subr.bf16.mxu1 %v5302_v49  ;;  %5463 = vmatprep.subr.bf16.mxu0 %v5462_v35  ;;  %v2090_v49 = vld [vmem:[#allocation8 + $0x698] sm:$0xff]  ;;  %v5472_v35 = vpack.c.bf16 %v2724_v44, %v2722_v18  ;;  %v2092_v11 = vld [vmem:[#allocation8 + $0x6a8] sm:$0xff] }
 0x1d0   :  { %2813 = vmatmul.mubr.f32.gmra.mrb[34].mxu0 %v7074_v47  ;;  %2027 = vmatprep.mubr.f32.mxu1 %v7960_v28  ;;  %v2727_v47 = vld [vmem:[#allocation11 + $0x588] sm:$0xff]  ;;  %v2730_v22 = vld [vmem:[#allocation11 + $0x5a0] sm:$0xff]  ;;  %v2732_v21 = vld [vmem:[#allocation11 + $0x5b0] sm:$0xff]  ;;  %v5318_v34 = vpack.c.bf16 %v2094_v58, %v2092_v11 }
 0x1d1   :  { %5465 = vmatpush1.bf16.msra.mxu0 %v5464_v17  ;;  %2818 = vmatprep.mubr.f32.mxu0 %v7102_v13  ;;  %v1409_v13 = vld [vmem:[#allocation2 + $0x70] sm:$0xff]  ;;  %v5474_v56 = vpack.c.bf16 %v2729_v55, %v2727_v47  ;;  %v5314_v17 = vpack.c.bf16 %v2090_v49, %v2088_v45  ;;  %v5480_v33 = vpack.c.bf16 %v2732_v21, %v2730_v22  ;;  %v2734_v32 = vld [vmem:[#allocation11 + $0x5c0] sm:$0xff]  ;;  %v2741_v49 = vld [vmem:[#allocation11 + $0x5f8] sm:$0xff] }
 0x1d2   :  { %5305 = vmatpush1.bf16.msra.mxu1 %v5304_v4  ;;  %5467 = vmatprep.subr.bf16.mxu0 %v5466_v36  ;;  %v2089_v4 = vld [vmem:[#allocation8 + $0x690] sm:$0xff]  ;;  %v2733_v36 = vld [vmem:[#allocation11 + $0x5b8] sm:$0xff]  ;;  %v2549_v21 = vld [vmem:[#allocation11] sm:$0xff] }
 0x1d3   :  { %5307 = vmatprep.subr.bf16.mxu1 %v5306_v37  ;;  %2028 = vmatmul.mubr.f32.gmra.mrb[18].mxu1 %v1406_v51  ;;  %v5316_v37 = vpack.c.bf16 %v2089_v4, %v2087_v60  ;;  %v2093_v51 = vld [vmem:[#allocation8 + $0x6b0] sm:$0xff]  ;;  %v2738_v4 = vld [vmem:[#allocation11 + $0x5e0] sm:$0xff]  ;;  %v2552_v58 = vld [vmem:[#allocation11 + $0x18] sm:$0xff] }
 0x1d4   :  { %2819 = vmatmul.mubr.f32.gmra.mrb[36].mxu0 %v7127_v25  ;;  %2033 = vmatprep.mubr.f32.mxu1 %v7960_v28  ;;  %v2731_v25 = vld [vmem:[#allocation11 + $0x5a8] sm:$0xff]  ;;  %v5320_v18 = vpack.c.bf16 %v2093_v51, %v2091_v8  ;;  %v2736_v47 = vld [vmem:[#allocation11 + $0x5d0] sm:$0xff]  ;;  %v2103_v22 = vld [vmem:[#allocation8 + $0x700] sm:$0xff] }
 0x1d5   :  { %5469 = vmatpush1.bf16.msra.mxu0 %v5468_v39  ;;  %2824 = vmatprep.mubr.f32.mxu0 %v7142_v50  ;;  %v1412_v50 = vld [vmem:[#allocation2 + $0xa0] sm:$0xff]  ;;  %v5478_v7 = vpack.c.bf16 %v2733_v36, %v2731_v25  ;;  %v2097_v45 = vld [vmem:[#allocation8 + $0x6d0] sm:$0xff] }
 0x1d6   :  { %5309 = vmatpush1.bf16.msra.mxu1 %v5308_v10  ;;  %5471 = vmatprep.subr.bf16.mxu0 %v5470_v1  ;;  %v2737_v39 = vld [vmem:[#allocation11 + $0x5d8] sm:$0xff]  ;;  %v2096_v10 = vld [vmem:[#allocation8 + $0x6c8] sm:$0xff]  ;;  %v2101_v36 = vld [vmem:[#allocation8 + $0x6f0] sm:$0xff] }
 0x1d7   :  { %5311 = vmatprep.subr.bf16.mxu1 %v5310_v24  ;;  %2034 = vmatmul.mubr.f32.gmra.mrb[20].mxu1 %v1409_v13  ;;  %v2098_v1 = vld [vmem:[#allocation8 + $0x6d8] sm:$0xff]  ;;  %v2095_v24 = vld [vmem:[#allocation8 + $0x6c0] sm:$0xff]  ;;  %v2100_v13 = vld [vmem:[#allocation8 + $0x6e8] sm:$0xff] }
 0x1d8   :  { %2825 = vmatmul.mubr.f32.gmra.mrb[38].mxu0 %v7167_v16  ;;  %2039 = vmatprep.mubr.f32.mxu1 %v7960_v28  ;;  %v2735_v16 = vld [vmem:[#allocation11 + $0x5c8] sm:$0xff]  ;;  %v5322_v55 = vpack.c.bf16 %v2098_v1, %v2096_v10  ;;  %v5324_v61 = vpack.c.bf16 %v2097_v45, %v2095_v24  ;;  %v2110_v1 = vld [vmem:[#allocation8 + $0x738] sm:$0xff]  ;;  %v2553_v24 = vld [vmem:[#allocation11 + $0x20] sm:$0xff] }
 0x1d9   :  { %5473 = vmatpush1.bf16.msra.mxu0 %v5472_v35  ;;  %2830 = vmatprep.mubr.f32.mxu0 %v7180_v42  ;;  %v1415_v42 = vld [vmem:[#allocation2 + $0xd0] sm:$0xff]  ;;  %v5482_v44 = vpack.c.bf16 %v2737_v39, %v2735_v16  ;;  %v2102_v35 = vld [vmem:[#allocation8 + $0x6f8] sm:$0xff] }
 0x1da   :  { %5313 = vmatpush1.bf16.msra.mxu1 %v5312_v41  ;;  %5475 = vmatprep.subr.bf16.mxu0 %v5474_v56  ;;  %v5484_v56 = vpack.c.bf16 %v2736_v47, %v2734_v32  ;;  %v5326_v25 = vpack.c.bf16 %v2102_v35, %v2100_v13  ;;  %v2550_v11 = vld [vmem:[#allocation11 + $0x8] sm:$0xff]  ;;  %v2556_v39 = vld [vmem:[#allocation11 + $0x38] sm:$0xff]  ;;  %v2555_v32 = vld [vmem:[#allocation11 + $0x30] sm:$0xff] }
 0x1db   :  { %5315 = vmatprep.subr.bf16.mxu1 %v5314_v17  ;;  %2040 = vmatmul.mubr.f32.gmra.mrb[22].mxu1 %v1412_v50  ;;  %v2099_v17 = vld [vmem:[#allocation8 + $0x6e0] sm:$0xff]  ;;  %v2104_v50 = vld [vmem:[#allocation8 + $0x708] sm:$0xff]  ;;  %v5490_v8 = vpack.c.bf16 %v2552_v58, %v2550_v11  ;;  %v2105_v16 = vld [vmem:[#allocation8 + $0x710] sm:$0xff]  ;;  %v5496_v13 = vpack.c.bf16 %v2555_v32, %v2553_v24 }
 0x1dc   :  { %2831 = vmatmul.mubr.f32.gmra.mrb[40].mxu0 %v7199_v3  ;;  %2045 = vmatprep.mubr.f32.mxu1 %v7960_v28  ;;  %v2739_v3 = vld [vmem:[#allocation11 + $0x5e8] sm:$0xff]  ;;  %v2560_v45 = vld [vmem:[#allocation11 + $0x58] sm:$0xff] }
 0x1dd   :  { %5477 = vmatpush1.bf16.msra.mxu0 %v5476_v15  ;;  %2836 = vmatprep.mubr.f32.mxu0 %v7208_v2  ;;  %v1418_v2 = vld [vmem:[#allocation2 + $0x100] sm:$0xff]  ;;  %v5486_v62 = vpack.c.bf16 %v2741_v49, %v2739_v3  ;;  %v1421_v15 = vld [vmem:[#allocation2 + $0x130] sm:$0xff] }
 0x1de   :  { %5317 = vmatpush1.bf16.msra.mxu1 %v5316_v37  ;;  %5479 = vmatprep.subr.bf16.mxu0 %v5478_v7  ;;  %v5328_v7 = vpack.c.bf16 %v2101_v36, %v2099_v17  ;;  %v2108_v10 = vld [vmem:[#allocation8 + $0x728] sm:$0xff]  ;;  %v2114_v49 = vld [vmem:[#allocation8 + $0x758] sm:$0xff] }
 0x1df   :  { %5319 = vmatprep.subr.bf16.mxu1 %v5318_v34  ;;  %2046 = vmatmul.mubr.f32.gmra.mrb[24].mxu1 %v1415_v42  ;;  %v2551_v34 = vld [vmem:[#allocation11 + $0x10] sm:$0xff]  ;;  %v5334_v47 = vpack.c.bf16 %v2110_v1, %v2108_v10  ;;  %v2112_v3 = vld [vmem:[#allocation8 + $0x748] sm:$0xff]  ;;  %v2119_v1 = vld [vmem:[#allocation8 + $0x780] sm:$0xff] }
 0x1e0   :  { %2837 = vmatmul.mubr.f32.gmra.mrb[42].mxu0 %v7220_v31  ;;  %v7335_v41 = vpop.f32.mrb[0].mxu1  ;;  %2051 = vmatprep.mubr.f32.mxu1 %v7960_v28  ;;  %v2740_v31 = vld [vmem:[#allocation11 + $0x5f0] sm:$0xff]  ;;  %v5492_v42 = vpack.c.bf16 %v2551_v34, %v2549_v21  ;;  %v5338_v17 = vpack.c.bf16 %v2114_v49, %v2112_v3  ;;  %v2566_v21 = vld [vmem:[#allocation11 + $0x88] sm:$0xff]  ;;  %v2568_v34 = vld [vmem:[#allocation11 + $0x98] sm:$0xff] }
 0x1e1   :  { %5481 = vmatpush1.bf16.msra.mxu0 %v5480_v33  ;;  %2842 = vmatprep.mubr.f32.mxu0 %v7225_v5  ;;  %v7339_v60 = vpop.f32.mrb[1].mxu1  ;;  %v2106_v5 = vld [vmem:[#allocation8 + $0x718] sm:$0xff]  ;;  %v5488_v37 = vpack.c.bf16 %v2740_v31, %v2738_v4  ;;  %v5332_v33 = vpack.c.bf16 %v2105_v16, %v2103_v22  ;;  %v2113_v4 = vld [vmem:[#allocation8 + $0x750] sm:$0xff]  ;;  %v5506_v10 = vpack.c.bf16 %v2568_v34, %v2566_v21  ;;  %v2123_v49 = vld [vmem:[#allocation8 + $0x7a0] sm:$0xff] }
 0x1e2   :  { %5321 = vmatpush1.bf16.msra.mxu1 %v5320_v18  ;;  %5483 = vmatprep.subr.bf16.mxu0 %v5482_v44  ;;  %v5330_v51 = vpack.c.bf16 %v2106_v5, %v2104_v50  ;;  %v2107_v44 = vld [vmem:[#allocation8 + $0x720] sm:$0xff]  ;;  %v2562_v31 = vld [vmem:[#allocation11 + $0x68] sm:$0xff]  ;;  %v2118_v36 = vld [vmem:[#allocation8 + $0x778] sm:$0xff] }
 0x1e3   :  { %5323 = vmatprep.subr.bf16.mxu1 %v5322_v55  ;;  %2052 = vmatmul.mubr.f32.gmra.mrb[26].mxu1 %v1418_v2  ;;  %v2109_v55 = vld [vmem:[#allocation8 + $0x730] sm:$0xff]  ;;  %v2115_v5 = vld [vmem:[#allocation8 + $0x760] sm:$0xff]  ;;  %v2122_v16 = vld [vmem:[#allocation8 + $0x798] sm:$0xff] }
 0x1e4   :  { %2843 = vmatmul.mubr.f32.gmra.mrb[44].mxu0 %v7233_v27  ;;  %2057 = vmatprep.mubr.f32.mxu1 %v7960_v28  ;;  %v2554_v27 = vld [vmem:[#allocation11 + $0x28] sm:$0xff]  ;;  %v5336_v35 = vpack.c.bf16 %v2109_v55, %v2107_v44  ;;  %v2572_v32 = vld [vmem:[#allocation11 + $0xb8] sm:$0xff] }
 0x1e5   :  { %5485 = vmatpush1.bf16.msra.mxu0 %v5484_v56  ;;  %2848 = vmatprep.mubr.f32.mxu0 %v7238_v0  ;;  %v1424_v0 = vld [vmem:[#allocation2 + $0x160] sm:$0xff]  ;;  %v5494_v18 = vpack.c.bf16 %v2556_v39, %v2554_v27  ;;  %v2117_v22 = vld [vmem:[#allocation8 + $0x770] sm:$0xff] }
 0x1e6   :  { %5325 = vmatpush1.bf16.msra.mxu1 %v5324_v61  ;;  %5487 = vmatprep.subr.bf16.mxu0 %v5486_v62  ;;  %v2111_v56 = vld [vmem:[#allocation8 + $0x740] sm:$0xff]  ;;  %v2559_v62 = vld [vmem:[#allocation11 + $0x50] sm:$0xff]  ;;  %v5344_v39 = vpack.c.bf16 %v2117_v22, %v2115_v5  ;;  %v2570_v24 = vld [vmem:[#allocation11 + $0xa8] sm:$0xff] }
 0x1e7   :  { %5327 = vmatprep.subr.bf16.mxu1 %v5326_v25  ;;  %2058 = vmatmul.mubr.f32.gmra.mrb[28].mxu1 %v1421_v15  ;;  %v2557_v61 = vld [vmem:[#allocation11 + $0x40] sm:$0xff]  ;;  %v5340_v58 = vpack.c.bf16 %v2113_v4, %v2111_v56  ;;  %v2121_v44 = vld [vmem:[#allocation8 + $0x790] sm:$0xff]  ;;  %v2126_v55 = vld [vmem:[#allocation8 + $0x7b8] sm:$0xff]  ;;  %v5510_v3 = vpack.c.bf16 %v2572_v32, %v2570_v24 }
 0x1e8   :  { %2849 = vmatmul.mubr.f32.gmra.mrb[46].mxu0 %v7242_v46  ;;  %2063 = vmatprep.mubr.f32.mxu1 %v7960_v28  ;;  %v2558_v46 = vld [vmem:[#allocation11 + $0x48] sm:$0xff]  ;;  %v5500_v11 = vpack.c.bf16 %v2559_v62, %v2557_v61  ;;  %v2561_v15 = vld [vmem:[#allocation11 + $0x60] sm:$0xff]  ;;  %v2580_v21 = vld [vmem:[#allocation11 + $0xf8] sm:$0xff] }
 0x1e9   :  { %5489 = vmatpush1.bf16.msra.mxu0 %v5488_v37  ;;  %2919 = vmatprep.mubr.f32.mxu0 %v7960_v28  ;;  %v5498_v2 = vpack.c.bf16 %v2560_v45, %v2558_v46  ;;  %v2116_v25 = vld [vmem:[#allocation8 + $0x768] sm:$0xff]  ;;  %v2563_v37 = vld [vmem:[#allocation11 + $0x70] sm:$0xff]  ;;  %v5348_v45 = vpack.c.bf16 %v2121_v44, %v2119_v1 }
 0x1ea   :  { %5329 = vmatpush1.bf16.msra.mxu1 %v5328_v7  ;;  %5491 = vmatprep.subr.bf16.mxu0 %v5490_v8  ;;  %v7352_v7 = vpop.f32.mrb[2].mxu1  ;;  %v5342_v8 = vpack.c.bf16 %v2118_v36, %v2116_v25  ;;  %v5504_v27 = vpack.c.bf16 %v2563_v37, %v2561_v15  ;;  %v2125_v61 = vld [vmem:[#allocation8 + $0x7b0] sm:$0xff] }
 0x1eb   :  { %5331 = vmatprep.subr.bf16.mxu1 %v5330_v51  ;;  %2064 = vmatmul.mubr.f32.gmra.mrb[30].mxu1 %v1424_v0  ;;  %v7354_v51 = vpop.f32.mrb[3].mxu1  ;;  %v2565_v0 = vld [vmem:[#allocation11 + $0x80] sm:$0xff]  ;;  %v2574_v62 = vld [vmem:[#allocation11 + $0xc8] sm:$0xff]  ;;  %v5352_v25 = vpack.c.bf16 %v2125_v61, %v2123_v49 }
 0x1ec   :  { %2920 = vmatmul.mubr.f32.vlgmr.msra.gmra.mrb[32].mxu0 %v7248_v52  ;;  %2231 = vmatprep.mubr.f32.mxu1 %v6887_v40  ;;  %v2564_v52 = vld [vmem:[#allocation11 + $0x78] sm:$0xff]  ;;  %v2578_v22 = vld [vmem:[#allocation11 + $0xe8] sm:$0xff] }
 0x1ed   :  { %5493 = vmatpush1.bf16.msra.mxu0 %v5492_v42  ;;  %2925 = vmatprep.mubr.f32.mxu0 %v7960_v28  ;;  %v5502_v50 = vpack.c.bf16 %v2564_v52, %v2562_v31  ;;  %v2567_v42 = vld [vmem:[#allocation11 + $0x90] sm:$0xff] }
 0x1ee   :  { %5333 = vmatpush1.bf16.msra.mxu1 %v5332_v33  ;;  %5495 = vmatprep.subr.bf16.mxu0 %v5494_v18  ;;  %v7358_v33 = vpop.f32.mrb[4].mxu1  ;;  %v5508_v46 = vpack.c.bf16 %v2567_v42, %v2565_v0  ;;  %v2130_v31 = vld [vmem:[#allocation8 + $0x7d8] sm:$0xff]  ;;  %v5518_v0 = vpack.c.bf16 %v2580_v21, %v2578_v22  ;;  %v2131_v42 = vld [vmem:[#allocation8 + $0x7e0] sm:$0xff]  ;;  %v2133_v32 = vld [vmem:[#allocation8 + $0x7f0] sm:$0xff] }
 0x1ef   :  { %5335 = vmatprep.subr.bf16.mxu1 %v5334_v47  ;;  %v7360_v47 = vpop.f32.mrb[5].mxu1  ;;  %v2139_v21 = vld [vmem:[#allocation8 + $0x820] sm:$0xff] }
 0x1f0   :  { %2926 = vmatmul.mubr.f32.gmra.mrb[34].mxu0 %v7260_v63  ;;  %v2120_v63 = vld [vmem:[#allocation8 + $0x788] sm:$0xff] }
 0x1f1   :  { %5497 = vmatpush1.bf16.msra.mxu0 %v5496_v13  ;;  %2931 = vmatprep.mubr.f32.mxu0 %v7960_v28  ;;  %v5346_v18 = vpack.c.bf16 %v2122_v16, %v2120_v63  ;;  %v2569_v13 = vld [vmem:[#allocation11 + $0xa0] sm:$0xff] }
 0x1f2   :  { %5337 = vmatpush1.bf16.msra.mxu1 %v5336_v35  ;;  %5499 = vmatprep.subr.bf16.mxu0 %v5498_v2  ;;  %v2571_v35 = vld [vmem:[#allocation11 + $0xb0] sm:$0xff]  ;;  %v7364_v2 = vpop.f32.mrb[6].mxu1  ;;  %v2132_v16 = vld [vmem:[#allocation8 + $0x7e8] sm:$0xff] }
 0x1f3   :  { %5339 = vmatprep.subr.bf16.mxu1 %v5338_v17  ;;  %v2576_v17 = vld [vmem:[#allocation11 + $0xd8] sm:$0xff]  ;;  %v7366_v4 = vpop.f32.mrb[7].mxu1  ;;  %v5512_v52 = vpack.c.bf16 %v2571_v35, %v2569_v13  ;;  %v2581_v13 = vld [vmem:[#allocation11 + $0x100] sm:$0xff]  ;;  %v2583_v35 = vld [vmem:[#allocation11 + $0x110] sm:$0xff] }
 0x1f4   :  { %2932 = vmatmul.mubr.f32.gmra.mrb[36].mxu0 %v7267_v38  ;;  %v2124_v38 = vld [vmem:[#allocation8 + $0x7a8] sm:$0xff]  ;;  %v5514_v36 = vpack.c.bf16 %v2576_v17, %v2574_v62  ;;  %v7370_v5 = vpop.f32.mrb[8].mxu1  ;;  %v2135_v62 = vld [vmem:[#allocation8 + $0x800] sm:$0xff]  ;;  %v2137_v17 = vld [vmem:[#allocation8 + $0x810] sm:$0xff] }
 0x1f5   :  { %5501 = vmatpush1.bf16.msra.mxu0 %v5500_v11  ;;  %2937 = vmatprep.mubr.f32.mxu0 %v7960_v28  ;;  %v5350_v56 = vpack.c.bf16 %v2126_v55, %v2124_v38  ;;  %v2127_v11 = vld [vmem:[#allocation8 + $0x7c0] sm:$0xff]  ;;  %v2136_v55 = vld [vmem:[#allocation8 + $0x808] sm:$0xff] }
 0x1f6   :  { %5341 = vmatpush1.bf16.msra.mxu1 %v5340_v58  ;;  %5503 = vmatprep.subr.bf16.mxu0 %v5502_v50  ;;  %v2573_v58 = vld [vmem:[#allocation11 + $0xc0] sm:$0xff]  ;;  %v2575_v50 = vld [vmem:[#allocation11 + $0xd0] sm:$0xff]  ;;  %v2584_v38 = vld [vmem:[#allocation11 + $0x118] sm:$0xff] }
 0x1f7   :  { %5343 = vmatprep.subr.bf16.mxu1 %v5342_v8  ;;  %v2129_v8 = vld [vmem:[#allocation8 + $0x7d0] sm:$0xff] }
 0x1f8   :  { %2938 = vmatmul.mubr.f32.gmra.mrb[38].mxu0 %v7274_v43  ;;  %v2128_v43 = vld [vmem:[#allocation8 + $0x7c8] sm:$0xff]  ;;  %v5356_v1 = vpack.c.bf16 %v2129_v8, %v2127_v11 }
 0x1f9   :  { %5505 = vmatpush1.bf16.msra.mxu0 %v5504_v27  ;;  %2943 = vmatprep.mubr.f32.mxu0 %v7960_v28  ;;  %v5354_v37 = vpack.c.bf16 %v2130_v31, %v2128_v43  ;;  %v2134_v27 = vld [vmem:[#allocation8 + $0x7f8] sm:$0xff]  ;;  %v2140_v43 = vld [vmem:[#allocation8 + $0x828] sm:$0xff] }
 0x1fa   :  { %5345 = vmatpush1.bf16.msra.mxu1 %v5344_v39  ;;  %5507 = vmatprep.subr.bf16.mxu0 %v5506_v10  ;;  %v5516_v10 = vpack.c.bf16 %v2575_v50, %v2573_v58  ;;  %v5358_v24 = vpack.c.bf16 %v2134_v27, %v2132_v16  ;;  %v6267_v11 = vld [vmem:[#allocation2 + $0x8] sm:$0xff]  ;;  %v5364_v58 = vpack.c.bf16 %v2137_v17, %v2135_v62 }
 0x1fb   :  { %5347 = vmatprep.subr.bf16.mxu1 %v5346_v18  ;;  %v2577_v18 = vld [vmem:[#allocation11 + $0xe0] sm:$0xff] }
 0x1fc   :  { %2944 = vmatmul.mubr.f32.gmra.mrb[40].mxu0 %v7279_v12  ;;  %v7372_v12 = vpop.f32.mrb[9].mxu1  ;;  %v2585_v50 = vld [vmem:[#allocation11 + $0x120] sm:$0xff] }
 0x1fd   :  { %5509 = vmatpush1.bf16.msra.mxu0 %v5508_v46  ;;  %2949 = vmatprep.mubr.f32.mxu0 %v7960_v28  ;;  %v7382_v44 = vpop.f32.mrb[10].mxu1  ;;  %v2138_v46 = vld [vmem:[#allocation8 + $0x818] sm:$0xff]  ;;  %v2144_v16 = vld [vmem:[#allocation8 + $0x848] sm:$0xff] }
 0x1fe   :  { %5349 = vmatpush1.bf16.msra.mxu1 %v5348_v45  ;;  %5511 = vmatprep.subr.bf16.mxu0 %v5510_v3  ;;  %v5360_v3 = vpack.c.bf16 %v2133_v32, %v2131_v42  ;;  %v5362_v61 = vpack.c.bf16 %v2138_v46, %v2136_v55  ;;  %v2145_v55 = vld [vmem:[#allocation8 + $0x850] sm:$0xff]  ;;  %v2148_v46 = vld [vmem:[#allocation8 + $0x868] sm:$0xff] }
 0x1ff   :  { %v856_v15 = vpop.f32.mrb[0].mxu0  ;;  %5351 = vmatprep.subr.bf16.mxu1 %v5350_v56 }
 0x200   :  { %v7375_v34 = vadd.f32 %v7335_v41, %v856_v15  ;;  %v858_v63 = vpop.f32.mrb[1].mxu0  ;;  %2950 = vmatmul.mubr.f32.gmra.mrb[42].mxu0 %v7286_v30  ;;  %v2579_v41 = vld [vmem:[#allocation11 + $0xf0] sm:$0xff]  ;;  %v2582_v30 = vld [vmem:[#allocation11 + $0x108] sm:$0xff] }
 0x201   :  { %v7379_v39 = vadd.f32 %v7339_v60, %v858_v63  ;;  %5513 = vmatpush1.bf16.msra.mxu0 %v5512_v52  ;;  %2955 = vmatprep.mubr.f32.mxu0 %v7960_v28  ;;  %v7384_v60 = vpop.f32.mrb[11].mxu1  ;;  %v5520_v45 = vpack.c.bf16 %v2579_v41, %v2577_v18  ;;  %v5522_v49 = vpack.c.bf16 %v2584_v38, %v2582_v30  ;;  %v2586_v52 = vld [vmem:[#allocation11 + $0x128] sm:$0xff]  ;;  %v2587_v15 = vld [vmem:[#allocation11 + $0x130] sm:$0xff]  ;;  %v2589_v18 = vld [vmem:[#allocation11 + $0x140] sm:$0xff] }
 0x202   :  { %5353 = vmatpush1.bf16.msra.mxu1 %v5352_v25  ;;  %5515 = vmatprep.subr.bf16.mxu0 %v5514_v36  ;;  %v7388_v56 = vpop.f32.mrb[12].mxu1  ;;  %v2588_v25 = vld [vmem:[#allocation11 + $0x138] sm:$0xff]  ;;  %v5524_v36 = vpack.c.bf16 %v2583_v35, %v2581_v13  ;;  %v2141_v63 = vld [vmem:[#allocation8 + $0x830] sm:$0xff] }
 0x203   :  { %5355 = vmatprep.subr.bf16.mxu1 %v5354_v37  ;;  %v7390_v31 = vpop.f32.mrb[13].mxu1  ;;  %v5526_v22 = vpack.c.bf16 %v2588_v25, %v2586_v52  ;;  %v5368_v42 = vpack.c.bf16 %v2141_v63, %v2139_v21  ;;  %v2591_v41 = vld [vmem:[#allocation11 + $0x150] sm:$0xff]  ;;  %v2143_v38 = vld [vmem:[#allocation8 + $0x840] sm:$0xff]  ;;  %v2594_v13 = vld [vmem:[#allocation11 + $0x168] sm:$0xff] }
 0x204   :  { %2956 = vmatmul.mubr.f32.gmra.mrb[44].mxu0 %v7293_v53  ;;  %v2142_v53 = vld [vmem:[#allocation8 + $0x838] sm:$0xff]  ;;  %v7393_v37 = vpop.f32.mrb[14].mxu1  ;;  %v5532_v62 = vpack.c.bf16 %v2591_v41, %v2589_v18  ;;  %v5372_v17 = vpack.c.bf16 %v2145_v55, %v2143_v38  ;;  %v2147_v25 = vld [vmem:[#allocation8 + $0x860] sm:$0xff]  ;;  %v2156_v18 = vld [vmem:[#allocation8 + $0x8a8] sm:$0xff] }
 0x205   :  { %5517 = vmatpush1.bf16.msra.mxu0 %v5516_v10  ;;  %2961 = vmatprep.mubr.f32.mxu0 %v7960_v28  ;;  %v5366_v8 = vpack.c.bf16 %v2142_v53, %v2140_v43  ;;  %v7395_v27 = vpop.f32.mrb[15].mxu1  ;;  %v2590_v10 = vld [vmem:[#allocation11 + $0x148] sm:$0xff]  ;;  %v2596_v35 = vld [vmem:[#allocation11 + $0x178] sm:$0xff]  ;;  %v2593_v43 = vld [vmem:[#allocation11 + $0x160] sm:$0xff] }
 0x206   :  { %5357 = vmatpush1.bf16.msra.mxu1 %v5356_v1  ;;  %5519 = vmatprep.subr.bf16.mxu0 %v5518_v0  ;;  %v2592_v1 = vld [vmem:[#allocation11 + $0x158] sm:$0xff]  ;;  %v5528_v0 = vpack.c.bf16 %v2587_v15, %v2585_v50  ;;  %v2595_v53 = vld [vmem:[#allocation11 + $0x170] sm:$0xff]  ;;  %v5534_v52 = vpack.c.bf16 %v2596_v35, %v2594_v13  ;;  %v2598_v50 = vld [vmem:[#allocation11 + $0x188] sm:$0xff] }
 0x207   :  { %5359 = vmatprep.subr.bf16.mxu1 %v5358_v24  ;;  %v862_v24 = vpop.f32.mrb[2].mxu0  ;;  %v5530_v30 = vpack.c.bf16 %v2592_v1, %v2590_v10  ;;  %v2600_v15 = vld [vmem:[#allocation11 + $0x198] sm:$0xff]  ;;  %v5536_v21 = vpack.c.bf16 %v2595_v53, %v2593_v43  ;;  %v2599_v10 = vld [vmem:[#allocation11 + $0x190] sm:$0xff]  ;;  %v2160_v43 = vld [vmem:[#allocation8 + $0x8c8] sm:$0xff] }
 0x208   :  { %2962 = vmatmul.mubr.f32.gmra.mrb[46].mxu0 %v7300_v6  ;;  %v2146_v6 = vld [vmem:[#allocation8 + $0x858] sm:$0xff] }
 0x209   :  { %5521 = vmatpush1.bf16.msra.mxu0 %v5520_v45  ;;  %3032 = vmatprep.mubr.f32.mxu0 %v6267_v11  ;;  %v5370_v32 = vpack.c.bf16 %v2146_v6, %v2144_v16  ;;  %v7400_v45 = vadd.f32 %v7352_v7, %v862_v24  ;;  %v2152_v11 = vld [vmem:[#allocation8 + $0x888] sm:$0xff]  ;;  %v2158_v24 = vld [vmem:[#allocation8 + $0x8b8] sm:$0xff] }
 0x20a   :  { %5361 = vmatpush1.bf16.msra.mxu1 %v5360_v3  ;;  %5523 = vmatprep.subr.bf16.mxu0 %v5522_v49  ;;  %v864_v3 = vpop.f32.mrb[3].mxu0  ;;  %v2150_v49 = vld [vmem:[#allocation8 + $0x878] sm:$0xff]  ;;  %v2597_v6 = vld [vmem:[#allocation11 + $0x180] sm:$0xff]  ;;  %v5382_v35 = vpack.c.bf16 %v2158_v24, %v2156_v18  ;;  %v7961_v18 = vld [vmem:[#allocation40_spill] sm:$0xff] }
 0x20b   :  { %5363 = vmatprep.subr.bf16.mxu1 %v5362_v61  ;;  %v7403_v61 = vadd.f32 %v7354_v51, %v864_v3  ;;  %v5374_v7 = vpack.c.bf16 %v2150_v49, %v2148_v46  ;;  %v2154_v51 = vld [vmem:[#allocation8 + $0x898] sm:$0xff]  ;;  %v5540_v55 = vpack.c.bf16 %v2599_v10, %v2597_v6  ;;  %v2601_v49 = vld [vmem:[#allocation11 + $0x1a0] sm:$0xff] }
 0x20c   :  { %v5378_v1 = vpack.c.bf16 %v2154_v51, %v2152_v11  ;;  %v2603_v13 = vld [vmem:[#allocation11 + $0x1b0] sm:$0xff]  ;;  %v2609_v24 = vld [vmem:[#allocation11 + $0x1e0] sm:$0xff] }
 0x20d   :  { %2232 = vmatmul.mubr.f32.vlgmr.msra.gmra.mrb[16].mxu1 %v6909_v59  ;;  %5525 = vmatpush1.bf16.msra.mxu0 %v5524_v36  ;;  %v2149_v36 = vld [vmem:[#allocation8 + $0x870] sm:$0xff]  ;;  %v2162_v53 = vld [vmem:[#allocation8 + $0x8d8] sm:$0xff] }
 0x20e   :  { %5365 = vmatpush1.bf16.msra.mxu1 %v5364_v58  ;;  %2237 = vmatprep.mubr.f32.mxu1 %v6932_v14  ;;  %v868_v58 = vpop.f32.mrb[4].mxu0  ;;  %v5376_v16 = vpack.c.bf16 %v2149_v36, %v2147_v25  ;;  %v2605_v36 = vld [vmem:[#allocation11 + $0x1c0] sm:$0xff]  ;;  %v2607_v11 = vld [vmem:[#allocation11 + $0x1d0] sm:$0xff]  ;;  %v5386_v51 = vpack.c.bf16 %v2162_v53, %v2160_v43 }
 0x20f   :  { %5367 = vmatprep.subr.bf16.mxu1 %v5366_v8  ;;  %5527 = vmatprep.subr.bf16.mxu0 %v5526_v22  ;;  %v7408_v8 = vadd.f32 %v7358_v33, %v868_v58  ;;  %v870_v22 = vpop.f32.mrb[5].mxu0  ;;  %v2151_v33 = vld [vmem:[#allocation8 + $0x880] sm:$0xff]  ;;  %v2166_v10 = vld [vmem:[#allocation8 + $0x8f8] sm:$0xff] }
 0x210   :  { %v7412_v63 = vadd.f32 %v7360_v47, %v870_v22  ;;  %v2161_v22 = vld [vmem:[#allocation8 + $0x8d0] sm:$0xff] }
 0x211   :  { %2238 = vmatmul.mubr.f32.gmra.mrb[18].mxu1 %v6937_v19  ;;  %5529 = vmatpush1.bf16.msra.mxu0 %v5528_v0  ;;  %v5538_v0 = vpack.c.bf16 %v2600_v15, %v2598_v50  ;;  %v2159_v15 = vld [vmem:[#allocation8 + $0x8c0] sm:$0xff] }
 0x212   :  { %5369 = vmatpush1.bf16.msra.mxu1 %v5368_v42  ;;  %2243 = vmatprep.mubr.f32.mxu1 %v6943_v48  ;;  %v2153_v42 = vld [vmem:[#allocation8 + $0x890] sm:$0xff]  ;;  %v874_v41 = vpop.f32.mrb[6].mxu0 }
 0x213   :  { %5371 = vmatprep.subr.bf16.mxu1 %v5370_v32  ;;  %5531 = vmatprep.subr.bf16.mxu0 %v5530_v30  ;;  %v2602_v32 = vld [vmem:[#allocation11 + $0x1a8] sm:$0xff]  ;;  %v2604_v30 = vld [vmem:[#allocation11 + $0x1b8] sm:$0xff]  ;;  %v7416_v47 = vadd.f32 %v7364_v2, %v874_v41  ;;  %v876_v38 = vpop.f32.mrb[7].mxu0  ;;  %v5380_v3 = vpack.c.bf16 %v2153_v42, %v2151_v33  ;;  %v5548_v42 = vpack.c.bf16 %v2607_v11, %v2605_v36 }
 0x214   :  { %v7420_v46 = vadd.f32 %v7366_v4, %v876_v38  ;;  %v2155_v2 = vld [vmem:[#allocation8 + $0x8a0] sm:$0xff]  ;;  %v5544_v4 = vpack.c.bf16 %v2603_v13, %v2601_v49  ;;  %v5388_v41 = vpack.c.bf16 %v2161_v22, %v2159_v15  ;;  %v7964_v36 = vld [vmem:[#allocation43_spill] sm:$0xff] }
 0x215   :  { %2244 = vmatmul.mubr.f32.gmra.mrb[20].mxu1 %v6950_v57  ;;  %5533 = vmatpush1.bf16.msra.mxu0 %v5532_v62  ;;  %v5542_v62 = vpack.c.bf16 %v2604_v30, %v2602_v32  ;;  %v2611_v32 = vld [vmem:[#allocation11 + $0x1f0] sm:$0xff]  ;;  %v2163_v38 = vld [vmem:[#allocation8 + $0x8e0] sm:$0xff] }
 0x216   :  { %5373 = vmatpush1.bf16.msra.mxu1 %v5372_v17  ;;  %2249 = vmatprep.mubr.f32.mxu1 %v6972_v23  ;;  %v2157_v17 = vld [vmem:[#allocation8 + $0x8b0] sm:$0xff]  ;;  %v2616_v49 = vld [vmem:[#allocation11 + $0x218] sm:$0xff]  ;;  %v5552_v13 = vpack.c.bf16 %v2611_v32, %v2609_v24 }
 0x217   :  { %5375 = vmatprep.subr.bf16.mxu1 %v5374_v7  ;;  %5535 = vmatprep.subr.bf16.mxu0 %v5534_v52  ;;  %v2606_v7 = vld [vmem:[#allocation11 + $0x1c8] sm:$0xff]  ;;  %v2608_v52 = vld [vmem:[#allocation11 + $0x1d8] sm:$0xff]  ;;  %v5384_v25 = vpack.c.bf16 %v2157_v17, %v2155_v2  ;;  %v2613_v2 = vld [vmem:[#allocation11 + $0x200] sm:$0xff] }
 0x218   :  { %v5546_v50 = vpack.c.bf16 %v2608_v52, %v2606_v7  ;;  %v2615_v17 = vld [vmem:[#allocation11 + $0x210] sm:$0xff]  ;;  %v2618_v7 = vld [vmem:[#allocation11 + $0x228] sm:$0xff]  ;;  %v2620_v52 = vld [vmem:[#allocation11 + $0x238] sm:$0xff] }
 0x219   :  { %2250 = vmatmul.mubr.f32.gmra.mrb[22].mxu1 %v6983_v29  ;;  %5537 = vmatpush1.bf16.msra.mxu0 %v5536_v21  ;;  %v2164_v21 = vld [vmem:[#allocation8 + $0x8e8] sm:$0xff]  ;;  %v5556_v11 = vpack.c.bf16 %v2615_v17, %v2613_v2  ;;  %v5558_v15 = vpack.c.bf16 %v2620_v52, %v2618_v7  ;;  %v6268_v22 = vld [vmem:[#allocation2] sm:$0xff]  ;;  %v2627_v2 = vld [vmem:[#allocation11 + $0x270] sm:$0xff] }
 0x21a   :  { %5377 = vmatpush1.bf16.msra.mxu1 %v5376_v16  ;;  %2255 = vmatprep.mubr.f32.mxu1 %v7028_v9  ;;  %v880_v58 = vpop.f32.mrb[8].mxu0  ;;  %v6270_v24 = vld [vmem:[#allocation2 + $0x30] sm:$0xff]  ;;  %v7967_v7 = vld [vmem:[#allocation34_spill] sm:$0xff] }
 0x21b   :  { %5379 = vmatprep.subr.bf16.mxu1 %v5378_v1  ;;  %5539 = vmatprep.subr.bf16.mxu0 %v5538_v0  ;;  %v7426_v16 = vadd.f32 %v7370_v5, %v880_v58  ;;  %v882_v6 = vpop.f32.mrb[9].mxu0  ;;  %v2610_v1 = vld [vmem:[#allocation11 + $0x1e8] sm:$0xff]  ;;  %v2612_v0 = vld [vmem:[#allocation11 + $0x1f8] sm:$0xff]  ;;  %v5390_v5 = vpack.c.bf16 %v2166_v10, %v2164_v21 }
 0x21c   :  { %v7429_v33 = vadd.f32 %v7372_v12, %v882_v6  ;;  %v5550_v30 = vpack.c.bf16 %v2612_v0, %v2610_v1  ;;  %v7962_v12 = vld [vmem:[#allocation41_spill] sm:$0xff]  ;;  %v2622_v21 = vld [vmem:[#allocation11 + $0x248] sm:$0xff] }
 0x21d   :  { %2256 = vmatmul.mubr.f32.gmra.mrb[24].mxu1 %v7042_v20  ;;  %5541 = vmatpush1.bf16.msra.mxu0 %v5540_v55  ;;  %v2165_v55 = vld [vmem:[#allocation8 + $0x8f0] sm:$0xff] }
 0x21e   :  { %5381 = vmatpush1.bf16.msra.mxu1 %v5380_v3  ;;  %2261 = vmatprep.mubr.f32.mxu1 %v7083_v54  ;;  %v2614_v3 = vld [vmem:[#allocation11 + $0x208] sm:$0xff]  ;;  %v6269_v1 = vld [vmem:[#allocation2 + $0x38] sm:$0xff] }
 0x21f   :  { %5383 = vmatprep.subr.bf16.mxu1 %v5382_v35  ;;  %5543 = vmatprep.subr.bf16.mxu0 %v5542_v62  ;;  %v7963_v35 = vld [vmem:[#allocation42_spill] sm:$0xff]  ;;  %v5392_v62 = vpack.c.bf16 %v2165_v55, %v2163_v38  ;;  %v5554_v43 = vpack.c.bf16 %v2616_v49, %v2614_v3  ;;  %v7965_v6 = vld [vmem:[#allocation32_spill] sm:$0xff]  ;;  %v7966_v55 = vld [vmem:[#allocation33_spill] sm:$0xff] }
 0x220   :  { %v2623_v0 = vld [vmem:[#allocation11 + $0x250] sm:$0xff]  ;;  %v2628_v38 = vld [vmem:[#allocation11 + $0x278] sm:$0xff] }
 0x221   :  { %2262 = vmatmul.mubr.f32.gmra.mrb[26].mxu1 %v7124_v26  ;;  %5545 = vmatpush1.bf16.msra.mxu0 %v5544_v4 }
 0x222   :  { %5385 = vmatpush1.bf16.msra.mxu1 %v5384_v25  ;;  %2267 = vmatprep.mubr.f32.mxu1 %v7961_v18 }
 0x223   :  { %5387 = vmatprep.subr.bf16.mxu1 %v5386_v51  ;;  %5547 = vmatprep.subr.bf16.mxu0 %v5546_v50  ;;  %v886_v53 = vpop.f32.mrb[10].mxu0  ;;  %v2617_v51 = vld [vmem:[#allocation11 + $0x220] sm:$0xff]  ;;  %v2619_v50 = vld [vmem:[#allocation11 + $0x230] sm:$0xff] }
 0x224   :  { %v7436_v4 = vadd.f32 %v7382_v44, %v886_v53  ;;  %v888_v25 = vpop.f32.mrb[11].mxu0  ;;  %v2624_v44 = vld [vmem:[#allocation11 + $0x258] sm:$0xff]  ;;  %v5560_v10 = vpack.c.bf16 %v2619_v50, %v2617_v51 }
 0x225   :  { %2268 = vmatmul.mubr.f32.gmra.mrb[28].mxu1 %v7962_v12  ;;  %5549 = vmatpush1.bf16.msra.mxu0 %v5548_v42  ;;  %v7440_v58 = vadd.f32 %v7384_v60, %v888_v25  ;;  %v2621_v60 = vld [vmem:[#allocation11 + $0x240] sm:$0xff]  ;;  %v5562_v42 = vpack.c.bf16 %v2624_v44, %v2622_v21  ;;  %v2632_v53 = vld [vmem:[#allocation11 + $0x298] sm:$0xff]  ;;  %v2634_v44 = vld [vmem:[#allocation11 + $0x2a8] sm:$0xff] }
 0x226   :  { %5389 = vmatpush1.bf16.msra.mxu1 %v5388_v41  ;;  %2273 = vmatprep.mubr.f32.mxu1 %v7963_v35  ;;  %v5564_v3 = vpack.c.bf16 %v2623_v0, %v2621_v60  ;;  %v2629_v25 = vld [vmem:[#allocation11 + $0x280] sm:$0xff] }
 0x227   :  { %5391 = vmatprep.subr.bf16.mxu1 %v5390_v5  ;;  %5551 = vmatprep.subr.bf16.mxu0 %v5550_v30  ;;  %v2626_v30 = vld [vmem:[#allocation11 + $0x268] sm:$0xff] }
 0x228   :  { %v5566_v17 = vpack.c.bf16 %v2628_v38, %v2626_v30  ;;  %v2638_v30 = vld [vmem:[#allocation11 + $0x2c8] sm:$0xff]  ;;  %v2640_v38 = vld [vmem:[#allocation11 + $0x2d8] sm:$0xff] }
 0x229   :  { %2274 = vmatmul.mubr.f32.gmra.mrb[30].mxu1 %v7964_v36  ;;  %5553 = vmatpush1.bf16.msra.mxu0 %v5552_v13  ;;  %v6271_v13 = vld [vmem:[#allocation2 + $0x68] sm:$0xff] }
 0x22a   :  { %5393 = vmatpush1.bf16.msra.mxu1 %v5392_v62  ;;  %2344 = vmatprep.mubr.f32.mxu1 %v7960_v28  ;;  %v2625_v62 = vld [vmem:[#allocation11 + $0x260] sm:$0xff] }
 0x22b   :  { %5555 = vmatprep.subr.bf16.mxu0 %v5554_v43  ;;  %v892_v41 = vpop.f32.mrb[12].mxu0  ;;  %v2630_v43 = vld [vmem:[#allocation11 + $0x288] sm:$0xff]  ;;  %v5568_v52 = vpack.c.bf16 %v2627_v2, %v2625_v62  ;;  %v2637_v62 = vld [vmem:[#allocation11 + $0x2c0] sm:$0xff]  ;;  %v2639_v2 = vld [vmem:[#allocation11 + $0x2d0] sm:$0xff] }
 0x22c   :  { %3033 = vmatmul.mubr.f32.vlgmr.msra.gmra.mrb[32].mxu0 %v6268_v22  ;;  %v7446_v32 = vadd.f32 %v7388_v56, %v892_v41  ;;  %v894_v5 = vpop.f32.mrb[13].mxu0  ;;  %v6272_v56 = vld [vmem:[#allocation2 + $0x60] sm:$0xff]  ;;  %v5570_v50 = vpack.c.bf16 %v2632_v53, %v2630_v43  ;;  %v2642_v43 = vld [vmem:[#allocation11 + $0x2e8] sm:$0xff] }
 0x22d   :  { %2345 = vmatmul.mubr.f32.vlgmr.msra.gmra.mrb[16].mxu1 %v7965_v6  ;;  %5557 = vmatpush1.bf16.msra.mxu0 %v5556_v11  ;;  %v7450_v49 = vadd.f32 %v7390_v31, %v894_v5  ;;  %v6273_v31 = vld [vmem:[#allocation2 + $0x98] sm:$0xff]  ;;  %v2633_v41 = vld [vmem:[#allocation11 + $0x2a0] sm:$0xff] }
 0x22e   :  { %2350 = vmatprep.mubr.f32.mxu1 %v7960_v28  ;;  %3038 = vmatprep.mubr.f32.mxu0 %v6269_v1  ;;  %v2631_v11 = vld [vmem:[#allocation11 + $0x290] sm:$0xff]  ;;  %v7968_v1 = vld [vmem:[#allocation35_spill] sm:$0xff]  ;;  %v2644_v53 = vld [vmem:[#allocation11 + $0x2f8] sm:$0xff] }
 0x22f   :  { %5559 = vmatprep.subr.bf16.mxu0 %v5558_v15  ;;  %v6274_v15 = vld [vmem:[#allocation2 + $0x90] sm:$0xff]  ;;  %v5572_v0 = vpack.c.bf16 %v2631_v11, %v2629_v25  ;;  %v6279_v25 = vld [vmem:[#allocation2 + $0x128] sm:$0xff]  ;;  %v3250_v6 = vld [vmem:[#allocation11 + $0x7b8] sm:$0xff] }
 0x230   :  { %3039 = vmatmul.mubr.f32.gmra.mrb[34].mxu0 %v6270_v24  ;;  %v2635_v24 = vld [vmem:[#allocation11 + $0x2b0] sm:$0xff]  ;;  %v2641_v11 = vld [vmem:[#allocation11 + $0x2e0] sm:$0xff] }
 0x231   :  { %2351 = vmatmul.mubr.f32.gmra.mrb[18].mxu1 %v7966_v55  ;;  %5561 = vmatpush1.bf16.msra.mxu0 %v5560_v10  ;;  %v2636_v10 = vld [vmem:[#allocation11 + $0x2b8] sm:$0xff] }
 0x232   :  { %2356 = vmatprep.mubr.f32.mxu1 %v7960_v28  ;;  %3044 = vmatprep.mubr.f32.mxu0 %v6271_v13  ;;  %v5574_v5 = vpack.c.bf16 %v2636_v10, %v2634_v44  ;;  %v5576_v13 = vpack.c.bf16 %v2635_v24, %v2633_v41  ;;  %v6280_v44 = vld [vmem:[#allocation2 + $0x120] sm:$0xff] }
 0x233   :  { %5563 = vmatprep.subr.bf16.mxu0 %v5562_v42  ;;  %v898_v51 = vpop.f32.mrb[14].mxu0  ;;  %v6275_v42 = vld [vmem:[#allocation2 + $0xc8] sm:$0xff] }
 0x234   :  { %3045 = vmatmul.mubr.f32.gmra.mrb[36].mxu0 %v6272_v56  ;;  %v7456_v22 = vadd.f32 %v7393_v37, %v898_v51  ;;  %v900_v21 = vpop.f32.mrb[15].mxu0  ;;  %v6276_v37 = vld [vmem:[#allocation2 + $0xc0] sm:$0xff]  ;;  %v6278_v56 = vld [vmem:[#allocation2 + $0xf0] sm:$0xff] }
 0x235   :  { %2357 = vmatmul.mubr.f32.gmra.mrb[20].mxu1 %v7967_v7  ;;  %5565 = vmatpush1.bf16.msra.mxu0 %v5564_v3  ;;  %v7460_v60 = vadd.f32 %v7395_v27, %v900_v21  ;;  %v7969_v3 = vld [vmem:[#allocation36_spill] sm:$0xff]  ;;  %v3198_v21 = vld [vmem:[#allocation11 + $0x618] sm:$0xff]  ;;  %v3195_v24 = vld [vmem:[#allocation11 + $0x600] sm:$0xff] }
 0x236   :  { %2362 = vmatprep.mubr.f32.mxu1 %v7960_v28  ;;  %3050 = vmatprep.mubr.f32.mxu0 %v6273_v31  ;;  %v6277_v27 = vld [vmem:[#allocation2 + $0xf8] sm:$0xff]  ;;  %v5580_v31 = vpack.c.bf16 %v2639_v2, %v2637_v62  ;;  %v7971_v10 = vld [vmem:[#allocation38_spill] sm:$0xff] }
 0x237   :  { %5567 = vmatprep.subr.bf16.mxu0 %v5566_v17  ;;  %v5578_v17 = vpack.c.bf16 %v2640_v38, %v2638_v30  ;;  %v2643_v51 = vld [vmem:[#allocation11 + $0x2f0] sm:$0xff]  ;;  %v3202_v30 = vld [vmem:[#allocation11 + $0x638] sm:$0xff]  ;;  %v3199_v2 = vld [vmem:[#allocation11 + $0x620] sm:$0xff] }
 0x238   :  { %3051 = vmatmul.mubr.f32.gmra.mrb[38].mxu0 %v6274_v15  ;;  %v3196_v15 = vld [vmem:[#allocation11 + $0x608] sm:$0xff] }
 0x239   :  { %2363 = vmatmul.mubr.f32.gmra.mrb[22].mxu1 %v7968_v1  ;;  %5569 = vmatpush1.bf16.msra.mxu0 %v5568_v52  ;;  %v7970_v52 = vld [vmem:[#allocation37_spill] sm:$0xff]  ;;  %v5586_v41 = vpack.c.bf16 %v3198_v21, %v3196_v15  ;;  %v6282_v38 = vld [vmem:[#allocation2 + $0x150] sm:$0xff] }
 0x23a   :  { %2368 = vmatprep.mubr.f32.mxu1 %v7960_v28  ;;  %3056 = vmatprep.mubr.f32.mxu0 %v6275_v42  ;;  %v6281_v42 = vld [vmem:[#allocation2 + $0x158] sm:$0xff]  ;;  %v6284_v21 = vld [vmem:[#allocation2 + $0x40] sm:$0xff] }
 0x23b   :  { %5571 = vmatprep.subr.bf16.mxu0 %v5570_v50  ;;  %v5582_v50 = vpack.c.bf16 %v2644_v53, %v2642_v43  ;;  %v3206_v43 = vld [vmem:[#allocation11 + $0x658] sm:$0xff]  ;;  %v6283_v53 = vld [vmem:[#allocation2 + $0x10] sm:$0xff] }
 0x23c   :  { %3057 = vmatmul.mubr.f32.gmra.mrb[40].mxu0 %v6276_v37  ;;  %v3200_v37 = vld [vmem:[#allocation11 + $0x628] sm:$0xff]  ;;  %v3210_v15 = vld [vmem:[#allocation11 + $0x678] sm:$0xff] }
 0x23d   :  { %2369 = vmatmul.mubr.f32.gmra.mrb[24].mxu1 %v7969_v3  ;;  %5573 = vmatpush1.bf16.msra.mxu0 %v5572_v0  ;;  %v5584_v0 = vpack.c.bf16 %v2643_v51, %v2641_v11  ;;  %v5590_v62 = vpack.c.bf16 %v3202_v30, %v3200_v37  ;;  %v3203_v11 = vld [vmem:[#allocation11 + $0x640] sm:$0xff]  ;;  %v3205_v51 = vld [vmem:[#allocation11 + $0x650] sm:$0xff]  ;;  %v3214_v37 = vld [vmem:[#allocation11 + $0x698] sm:$0xff] }
 0x23e   :  { %2374 = vmatprep.mubr.f32.mxu1 %v7960_v28  ;;  %3062 = vmatprep.mubr.f32.mxu0 %v6277_v27  ;;  %v6285_v30 = vld [vmem:[#allocation2 + $0x70] sm:$0xff] }
 0x23f   :  { %5575 = vmatprep.subr.bf16.mxu0 %v5574_v5  ;;  %v3197_v5 = vld [vmem:[#allocation11 + $0x610] sm:$0xff]  ;;  %v3240_v3 = vld [vmem:[#allocation11 + $0x768] sm:$0xff] }
 0x240   :  { %3063 = vmatmul.mubr.f32.gmra.mrb[42].mxu0 %v6278_v56  ;;  %v5588_v27 = vpack.c.bf16 %v3197_v5, %v3195_v24  ;;  %v3204_v56 = vld [vmem:[#allocation11 + $0x648] sm:$0xff]  ;;  %v1244_v24 = vlaneseq }
 0x241   :  { %2375 = vmatmul.mubr.f32.gmra.mrb[26].mxu1 %v7970_v52  ;;  %5577 = vmatpush1.bf16.msra.mxu0 %v5576_v13  ;;  %v7972_v13 = vld [vmem:[#allocation39_spill] sm:$0xff] }
 0x242   :  { %2380 = vmatprep.mubr.f32.mxu1 %v7960_v28  ;;  %3068 = vmatprep.mubr.f32.mxu0 %v6279_v25  ;;  %v5594_v25 = vpack.c.bf16 %v3206_v43, %v3204_v56  ;;  %v3212_v5 = vld [vmem:[#allocation11 + $0x688] sm:$0xff]  ;;  %v3218_v43 = vld [vmem:[#allocation11 + $0x6b8] sm:$0xff] }
 0x243   :  { %5579 = vmatprep.subr.bf16.mxu0 %v5578_v17  ;;  %v3201_v17 = vld [vmem:[#allocation11 + $0x630] sm:$0xff]  ;;  %v3216_v56 = vld [vmem:[#allocation11 + $0x6a8] sm:$0xff] }
 0x244   :  { %3069 = vmatmul.mubr.f32.gmra.mrb[44].mxu0 %v6280_v44  ;;  %v5596_v44 = vpack.c.bf16 %v3205_v51, %v3203_v11  ;;  %v5606_v11 = vpack.c.bf16 %v3218_v43, %v3216_v56  ;;  %v3215_v51 = vld [vmem:[#allocation11 + $0x6a0] sm:$0xff] }
 0x245   :  { %2381 = vmatmul.mubr.f32.gmra.mrb[28].mxu1 %v7971_v10  ;;  %5581 = vmatpush1.bf16.msra.mxu0 %v5580_v31  ;;  %v5592_v31 = vpack.c.bf16 %v3201_v17, %v3199_v2  ;;  %v3213_v2 = vld [vmem:[#allocation11 + $0x690] sm:$0xff]  ;;  %v7474_v17 = vshrl.u32 %v1244_v24, 7  ;;  %v3235_v10 = vld [vmem:[#allocation11 + $0x740] sm:$0xff] }
 0x246   :  { %2386 = vmatprep.mubr.f32.mxu1 %v7960_v28  ;;  %3074 = vmatprep.mubr.f32.mxu0 %v6281_v42  ;;  %v3207_v42 = vld [vmem:[#allocation11 + $0x660] sm:$0xff] }
 0x247   :  { %5583 = vmatprep.subr.bf16.mxu0 %v5582_v50  ;;  %v3208_v50 = vld [vmem:[#allocation11 + $0x668] sm:$0xff]  ;;  %vm1288_vm2 = vcmp.lt.s32.totalorder %v7474_v17, 7 }
 0x248   :  { %3075 = vmatmul.mubr.f32.gmra.mrb[46].mxu0 %v6282_v38 }
 0x249   :  { %2387 = vmatmul.mubr.f32.gmra.mrb[30].mxu1 %v7972_v13  ;;  %5585 = vmatpush1.bf16.msra.mxu0 %v5584_v0  ;;  %v5598_v0 = vpack.c.bf16 %v3210_v15, %v3208_v50  ;;  %v3217_v50 = vld [vmem:[#allocation11 + $0x6b0] sm:$0xff]  ;;  %v1242_v15 = vld [vmem:[#allocation7] sm:$0x3] }
 0x24a   :  { %3145 = vmatprep.mubr.f32.mxu0 %v7960_v28  ;;  %5587 = vmatprep.subr.bf16.mxu0 %v5586_v41  ;;  %v3209_v41 = vld [vmem:[#allocation11 + $0x670] sm:$0xff] }
 0x24b   :  { %v5600_v38 = vpack.c.bf16 %v3209_v41, %v3207_v42  ;;  %v6287_v42 = vld [vmem:[#allocation2 + $0xd0] sm:$0xff]  ;;  %v5608_v41 = vpack.c.bf16 %v3217_v50, %v3215_v51 }
 0x24c   :  { %3146 = vmatmul.mubr.f32.vlgmr.msra.gmra.mrb[32].mxu0 %v6283_v53  ;;  %v6286_v53 = vld [vmem:[#allocation2 + $0xa0] sm:$0xff] }
 0x24d   :  { %5589 = vmatpush1.bf16.msra.mxu0 %v5588_v27  ;;  %3151 = vmatprep.mubr.f32.mxu0 %v7960_v28  ;;  %v5602_v27 = vpack.c.bf16 %v3214_v37, %v3212_v5  ;;  %v3219_v37 = vld [vmem:[#allocation11 + $0x6c0] sm:$0xff] }
 0x24e   :  { %5591 = vmatprep.subr.bf16.mxu0 %v5590_v62  ;;  %v3211_v62 = vld [vmem:[#allocation11 + $0x680] sm:$0xff] }
 0x250   :  { %3152 = vmatmul.mubr.f32.gmra.mrb[34].mxu0 %v6284_v21  ;;  %v7481_v21 = vsub.s32 1, %v7474_v17 }
 0x251   :  { %5593 = vmatpush1.bf16.msra.mxu0 %v5592_v31  ;;  %3157 = vmatprep.mubr.f32.mxu0 %v7960_v28  ;;  %v5604_v31 = vpack.c.bf16 %v3213_v2, %v3211_v62  ;;  %v3224_v62 = vld [vmem:[#allocation11 + $0x6e8] sm:$0xff]  ;;  %v3226_v2 = vld [vmem:[#allocation11 + $0x6f8] sm:$0xff] }
 0x252   :  { %5595 = vmatprep.subr.bf16.mxu0 %v5594_v25  ;;  %v7478_v25 = vsub.s32 0, %v7474_v17  ;;  %7974 = vst [vmem:[#allocation41_spill] sm:$0xff] %v7481_v21  ;;  %v5614_v50 = vpack.c.bf16 %v3226_v2, %v3224_v62 }
 0x254   :  { %3158 = vmatmul.mubr.f32.gmra.mrb[36].mxu0 %v6285_v30  ;;  %7973 = vst [vmem:[#allocation40_spill] sm:$0xff] %v7478_v25  ;;  %v7485_v24 = vrot.slane %v1242_v15, %v7478_v25  ;;  %v3221_v30 = vld [vmem:[#allocation11 + $0x6d0] sm:$0xff] }
 0x255   :  { %5597 = vmatpush1.bf16.msra.mxu0 %v5596_v44  ;;  %3163 = vmatprep.mubr.f32.mxu0 %v7960_v28  ;;  %v3220_v44 = vld [vmem:[#allocation11 + $0x6c8] sm:$0xff]  ;;  %v5612_v51 = vpack.c.bf16 %v3221_v30, %v3219_v37  ;;  %v3233_v25 = vld [vmem:[#allocation11 + $0x730] sm:$0xff] }
 0x256   :  { %5599 = vmatprep.subr.bf16.mxu0 %v5598_v0  ;;  %v3222_v0 = vld [vmem:[#allocation11 + $0x6d8] sm:$0xff]  ;;  %v6289_v37 = vld [vmem:[#allocation2 + $0x130] sm:$0xff] }
 0x257   :  { %v5610_v5 = vpack.c.bf16 %v3222_v0, %v3220_v44  ;;  %v3223_v44 = vld [vmem:[#allocation11 + $0x6e0] sm:$0xff] }
 0x258   :  { %3164 = vmatmul.mubr.f32.gmra.mrb[38].mxu0 %v6286_v53  ;;  %v6288_v53 = vld [vmem:[#allocation2 + $0x100] sm:$0xff] }
 0x259   :  { %5601 = vmatpush1.bf16.msra.mxu0 %v5600_v38  ;;  %3169 = vmatprep.mubr.f32.mxu0 %v7960_v28 }
 0x25a   :  { %5603 = vmatprep.subr.bf16.mxu0 %v5602_v27  ;;  %v7488_v27 = vrot.slane %v1242_v15, %v7481_v21  ;;  %v3225_v15 = vld [vmem:[#allocation11 + $0x6f0] sm:$0xff]  ;;  %v6290_v21 = vld [vmem:[#allocation2 + $0x160] sm:$0xff] }
 0x25c   :  { %3170 = vmatmul.mubr.f32.gmra.mrb[40].mxu0 %v6287_v42  ;;  %v3228_v42 = vld [vmem:[#allocation11 + $0x708] sm:$0xff] }
 0x25d   :  { %5605 = vmatpush1.bf16.msra.mxu0 %v5604_v31  ;;  %3175 = vmatprep.mubr.f32.mxu0 %v7960_v28 }
 0x25e   :  { %5607 = vmatprep.subr.bf16.mxu0 %v5606_v11 }
 0x25f   :  { %v1195_v38 = vpop.f32.mrb[16].mxu0 }
 0x260   :  { %v6003_v56 = vadd.f32 %v1195_v38, %v7375_v34  ;;  %v1197_v43 = vpop.f32.mrb[17].mxu0  ;;  %3176 = vmatmul.mubr.f32.gmra.mrb[42].mxu0 %v6288_v53  ;;  %v3230_v38 = vld [vmem:[#allocation11 + $0x718] sm:$0xff] }
 0x261   :  { %v6005_v31 = vadd.f32 %v1197_v43, %v7379_v39  ;;  %5609 = vmatpush1.bf16.msra.mxu0 %v5608_v41  ;;  %3181 = vmatprep.mubr.f32.mxu0 %v7960_v28  ;;  %v5618_v43 = vpack.c.bf16 %v3230_v38, %v3228_v42 }
 0x262   :  { %v1254_v11 = vadd.f32 %v6003_v56, %v7485_v24  ;;  %5611 = vmatprep.subr.bf16.mxu0 %v5610_v5  ;;  %v5616_v5 = vpack.c.bf16 %v3225_v15, %v3223_v44  ;;  %v3234_v44 = vld [vmem:[#allocation11 + $0x738] sm:$0xff] }
 0x263   :  { %v1255_v0 = vadd.f32 %v6005_v31, %v7488_v27  ;;  %v1201_v34 = vpop.f32.mrb[18].mxu0  ;;  %v3227_v31 = vld [vmem:[#allocation11 + $0x700] sm:$0xff] }
 0x264   :  { %v1270_v53 = vmax.f32 %v1254_v11, 0.0  ;;  %v6007_v39 = vadd.f32 %v1201_v34, %v7400_v45  ;;  %v1203_v41 = vpop.f32.mrb[19].mxu0  ;;  %3182 = vmatmul.mubr.f32.gmra.mrb[44].mxu0 %v6289_v37  ;;  %v3229_v11 = vld [vmem:[#allocation11 + $0x710] sm:$0xff] }
 0x265   :  { %v1271_v30 = vmax.f32 %v1255_v0, 0.0  ;;  %v6009_v56 = vadd.f32 %v1203_v41, %v7403_v61  ;;  %5613 = vmatpush1.bf16.msra.mxu0 %v5612_v51  ;;  %3187 = vmatprep.mubr.f32.mxu0 %v7960_v28  ;;  %v3232_v51 = vld [vmem:[#allocation11 + $0x728] sm:$0xff] }
 0x266   :  { %v1289_v62 = vsel %vm1288_vm2, %v1270_v53, 0.0  ;;  %v1256_v2 = vadd.f32 %v6007_v39, %v7485_v24  ;;  %5615 = vmatprep.subr.bf16.mxu0 %v5614_v50  ;;  %v5620_v39 = vpack.c.bf16 %v3229_v11, %v3227_v31  ;;  %v3238_v31 = vld [vmem:[#allocation11 + $0x758] sm:$0xff] }
 0x267   :  { %v1305_v45 = vrot.slane %v1289_v62, 4  ;;  %v1290_v34 = vsel %vm1288_vm2, %v1271_v30, 0.0  ;;  %v1257_v0 = vadd.f32 %v6009_v56, %v7488_v27  ;;  %v1207_v61 = vpop.f32.mrb[20].mxu0 }
 0x268   :  { %v1311_v15 = vrot.slane %v1290_v34, 4  ;;  %v1272_v41 = vmax.f32 %v1256_v2, 0.0  ;;  %v6011_v37 = vadd.f32 %v1207_v61, %v7408_v8  ;;  %v1209_v53 = vpop.f32.mrb[21].mxu0  ;;  %3188 = vmatmul.mubr.f32.gmra.mrb[46].mxu0 %v6290_v21  ;;  %v5622_v8 = vpack.c.bf16 %v3234_v44, %v3232_v51  ;;  %v3231_v61 = vld [vmem:[#allocation11 + $0x720] sm:$0xff] }
 0x269   :  { %v1306_v50 = vmax.f32 %v1289_v62, %v1305_v45  ;;  %v1273_v42 = vmax.f32 %v1257_v0, 0.0  ;;  %v7507_v38 = vadd.f32 %v1209_v53, %v7412_v63  ;;  %5617 = vmatpush1.bf16.msra.mxu0 %v5616_v5  ;;  %3355 = vmatprep.mubr.f32.mxu0 %v6887_v40  ;;  %v3236_v5 = vld [vmem:[#allocation11 + $0x748] sm:$0xff]  ;;  %v5624_v44 = vpack.c.bf16 %v3233_v25, %v3231_v61 }
 0x26a   :  { %v1312_v30 = vmax.f32 %v1290_v34, %v1311_v15  ;;  %v1291_v56 = vsel %vm1288_vm2, %v1272_v41, 0.0  ;;  %v1258_v2 = vadd.f32 %v6011_v37, %v7485_v24  ;;  %5619 = vmatprep.subr.bf16.mxu0 %v5618_v43  ;;  %v5626_v13 = vpack.c.bf16 %v3238_v31, %v3236_v5  ;;  %v3241_v5 = vld [vmem:[#allocation11 + $0x770] sm:$0xff] }
 0x26b   :  { %v1307_v21 = vrot.slane %v1306_v50, 2  ;;  %v1317_v62 = vrot.slane %v1291_v56, 4  ;;  %v1292_v63 = vsel %vm1288_vm2, %v1273_v42, 0.0  ;;  %v1213_v45 = vpop.f32.mrb[22].mxu0 }
 0x26c   :  { %v1313_v11 = vrot.slane %v1312_v30, 2  ;;  %v1323_v40 = vrot.slane %v1292_v63, 4  ;;  %v1274_v34 = vmax.f32 %v1258_v2, 0.0  ;;  %v7516_v0 = vadd.f32 %v1213_v45, %v7416_v47  ;;  %v1215_v15 = vpop.f32.mrb[23].mxu0  ;;  %v3237_v2 = vld [vmem:[#allocation11 + $0x750] sm:$0xff] }
 0x26d   :  { %v1308_v41 = vmax.f32 %v1306_v50, %v1307_v21  ;;  %v1318_v43 = vmax.f32 %v1291_v56, %v1317_v62  ;;  %v7519_v51 = vadd.f32 %v1215_v15, %v7420_v46  ;;  %5621 = vmatpush1.bf16.msra.mxu0 %v5620_v39  ;;  %v3242_v50 = vld [vmem:[#allocation11 + $0x778] sm:$0xff]  ;;  %v5628_v25 = vpack.c.bf16 %v3237_v2, %v3235_v10 }
 0x26e   :  { %v1314_v37 = vmax.f32 %v1312_v30, %v1313_v11  ;;  %v1324_v53 = vmax.f32 %v1292_v63, %v1323_v40  ;;  %v1293_v42 = vsel %vm1288_vm2, %v1274_v34, 0.0  ;;  %5623 = vmatprep.subr.bf16.mxu0 %v5622_v8  ;;  %v5630_v63 = vpack.c.bf16 %v3242_v50, %v3240_v3  ;;  %v3239_v8 = vld [vmem:[#allocation11 + $0x760] sm:$0xff]  ;;  %v3244_v34 = vld [vmem:[#allocation11 + $0x788] sm:$0xff]  ;;  %v3246_v15 = vld [vmem:[#allocation11 + $0x798] sm:$0xff] }
 0x26f   :  { %v1319_v52 = vrot.slane %v1318_v43, 2  ;;  %v1329_v47 = vrot.slane %v1293_v42, 4  ;;  %v1219_v45 = vpop.f32.mrb[24].mxu0  ;;  %v1309_v46 = vrot.slane %v1308_v41, 1  ;;  %v5632_v3 = vpack.c.bf16 %v3241_v5, %v3239_v8  ;;  %v3245_v50 = vld [vmem:[#allocation11 + $0x790] sm:$0xff]  ;;  %v3254_v8 = vld [vmem:[#allocation11 + $0x7d8] sm:$0xff] }
 0x270   :  { %v1325_v56 = vrot.slane %v1324_v53, 2  ;;  %v1221_v21 = vpop.f32.mrb[25].mxu0  ;;  %v1315_v30 = vrot.slane %v1314_v37, 1  ;;  %v7524_v7 = vadd.f32 %v1219_v45, %v7426_v16  ;;  %v5634_v2 = vpack.c.bf16 %v3246_v15, %v3244_v34  ;;  %v3248_v45 = vld [vmem:[#allocation11 + $0x7a8] sm:$0xff]  ;;  %v3258_v15 = vld [vmem:[#allocation11 + $0x7f8] sm:$0xff] }
 0x271   :  { %v1320_v62 = vmax.f32 %v1318_v43, %v1319_v52  ;;  %v1330_v39 = vmax.f32 %v1293_v42, %v1329_v47  ;;  %5625 = vmatpush1.bf16.msra.mxu0 %v5624_v44  ;;  %v7527_v52 = vadd.f32 %v1221_v21, %v7429_v33  ;;  %v1310_v43 = vmax.f32 %v1308_v41, %v1309_v46  ;;  %v3243_v47 = vld [vmem:[#allocation11 + $0x780] sm:$0xff]  ;;  %v3256_v34 = vld [vmem:[#allocation11 + $0x7e8] sm:$0xff] }
 0x272   :  { %v1326_v61 = vmax.f32 %v1324_v53, %v1325_v56  ;;  %5627 = vmatprep.subr.bf16.mxu0 %v5626_v13  ;;  %v1316_v53 = vmax.f32 %v1314_v37, %v1315_v30 }
 0x273   :  { %v1321_v31 = vrot.slane %v1320_v62, 1  ;;  %v1331_v11 = vrot.slane %v1330_v39, 2  ;;  %v1225_v40 = vpop.f32.mrb[26].mxu0 }
 0x274   :  { %v1327_v1 = vrot.slane %v1326_v61, 1  ;;  %v1227_v10 = vpop.f32.mrb[27].mxu0  ;;  %v6023_v46 = vadd.f32 %v1225_v40, %v7436_v4  ;;  %v3253_v40 = vld [vmem:[#allocation11 + $0x7d0] sm:$0xff] }
 0x275   :  { %v1322_v44 = vmax.f32 %v1320_v62, %v1321_v31  ;;  %v1332_v13 = vmax.f32 %v1330_v39, %v1331_v11  ;;  %5629 = vmatpush1.bf16.msra.mxu0 %v5628_v25  ;;  %v6025_v37 = vadd.f32 %v1227_v10, %v7440_v58  ;;  %v5638_v62 = vpack.c.bf16 %v3250_v6, %v3248_v45  ;;  %v3247_v39 = vld [vmem:[#allocation11 + $0x7a0] sm:$0xff]  ;;  %v3249_v25 = vld [vmem:[#allocation11 + $0x7b0] sm:$0xff] }
 0x276   :  { %v1328_v42 = vmax.f32 %v1326_v61, %v1327_v1  ;;  %5631 = vmatprep.subr.bf16.mxu0 %v5630_v63  ;;  %v5636_v1 = vpack.c.bf16 %v3245_v50, %v3243_v47  ;;  %v3252_v63 = vld [vmem:[#allocation11 + $0x7c8] sm:$0xff]  ;;  %v5640_v4 = vpack.c.bf16 %v3249_v25, %v3247_v39  ;;  %v3251_v58 = vld [vmem:[#allocation11 + $0x7c0] sm:$0xff]  ;;  %v1261_v47 = vadd.f32 %v7519_v51, %v7488_v27  ;;  %v3261_v50 = vld [vmem:[#allocation11 + $0x810] sm:$0xff] }
 0x277   :  { %v4475_v56 = vsel %vm4365_vm3, %v1322_v44, %v1310_v43  ;;  %v1333_v55 = vrot.slane %v1332_v13, 1  ;;  %v1231_v16 = vpop.f32.mrb[28].mxu0  ;;  %v5642_v11 = vpack.c.bf16 %v3254_v8, %v3252_v63  ;;  %v5644_v10 = vpack.c.bf16 %v3253_v40, %v3251_v58  ;;  %v3270_v25 = vld [vmem:[#allocation11 + $0x858] sm:$0xff]  ;;  %v7558_v63 = vld [vmem:[#allocation11 + $0x850] sm:$0xff]  ;;  %v7563_v40 = vld [vmem:[#allocation11 + $0x868] sm:$0xff] }
 0x278   :  { %v7531_v33 = vsel %vm4365_vm3, %v1328_v42, %v1316_v53  ;;  %v1233_v41 = vpop.f32.mrb[29].mxu0  ;;  %v6027_v31 = vadd.f32 %v1231_v16, %v7446_v32  ;;  %v5646_v44 = vpack.c.bf16 %v3258_v15, %v3256_v34  ;;  %v3255_v32 = vld [vmem:[#allocation11 + $0x7e0] sm:$0xff]  ;;  %v1259_v53 = vadd.f32 %v7507_v38, %v7488_v27  ;;  %v3266_v16 = vld [vmem:[#allocation11 + $0x838] sm:$0xff] }
 0x279   :  { %v1334_v21 = vmax.f32 %v1332_v13, %v1333_v55  ;;  %5633 = vmatpush1.bf16.msra.mxu0 %v5632_v3  ;;  %v6029_v55 = vadd.f32 %v1233_v41, %v7450_v49  ;;  %v3257_v13 = vld [vmem:[#allocation11 + $0x7f0] sm:$0xff]  ;;  %v3260_v49 = vld [vmem:[#allocation11 + $0x808] sm:$0xff]  ;;  %v3262_v3 = vld [vmem:[#allocation11 + $0x818] sm:$0xff]  ;;  %v1263_v45 = vadd.f32 %v7527_v52, %v7488_v27  ;;  %v1265_v41 = vadd.f32 %v6025_v37, %v7488_v27 }
 0x27a   :  { %5635 = vmatprep.subr.bf16.mxu0 %v5634_v2  ;;  %v5648_v42 = vpack.c.bf16 %v3257_v13, %v3255_v32  ;;  %v3259_v2 = vld [vmem:[#allocation11 + $0x800] sm:$0xff]  ;;  %v1262_v52 = vadd.f32 %v7524_v7, %v7485_v24  ;;  %v1264_v37 = vadd.f32 %v6023_v46, %v7485_v24  ;;  %v1266_v15 = vadd.f32 %v6027_v31, %v7485_v24  ;;  %v7570_v7 = vld [vmem:[#allocation11 + $0x878] sm:$0xff] }
 0x27b   :  { %v7536_v30 = vsel %vm4367_vm4, %v1334_v21, %v4475_v56  ;;  %v1237_v61 = vpop.f32.mrb[30].mxu0  ;;  %v3264_v56 = vld [vmem:[#allocation11 + $0x828] sm:$0xff]  ;;  %v3263_v38 = vld [vmem:[#allocation11 + $0x820] sm:$0xff]  ;;  %v3265_v21 = vld [vmem:[#allocation11 + $0x830] sm:$0xff]  ;;  %v5652_v39 = vpack.c.bf16 %v3261_v50, %v3259_v2  ;;  %v1279_v58 = vmax.f32 %v1263_v45, 0.0  ;;  %v1281_v34 = vmax.f32 %v1265_v41, 0.0 }
 0x27c   :  { %v1239_v5 = vpop.f32.mrb[31].mxu0  ;;  %v7541_v6 = vadd.f32 %v1237_v61, %v7456_v22  ;;  %v1260_v22 = vadd.f32 %v7516_v0, %v7485_v24  ;;  %v1267_v0 = vadd.f32 %v6029_v55, %v7488_v27  ;;  %v5654_v51 = vpack.c.bf16 %v3266_v16, %v3264_v56  ;;  %v7556_v61 = vld [vmem:[#allocation11 + $0x840] sm:$0xff]  ;;  %v4287_v32 = vld [vmem:[#allocation16 + $0x10] sm:$0xff] }
 0x27d   :  { %5637 = vmatpush1.bf16.msra.mxu0 %v5636_v1  ;;  %v6033_v43 = vadd.f32 %v1239_v5, %v7460_v60  ;;  %v5650_v60 = vpack.c.bf16 %v3262_v3, %v3260_v49  ;;  %v7553_v1 = vld [vmem:[#allocation11 + $0x848] sm:$0xff]  ;;  %v1277_v5 = vmax.f32 %v1261_v47, 0.0  ;;  %v5656_v55 = vpack.c.bf16 %v3265_v21, %v3263_v38  ;;  %v4291_v16 = vld [vmem:[#allocation16 + $0x30] sm:$0xff] }
 0x27e   :  { %5639 = vmatprep.subr.bf16.mxu0 %v5638_v62  ;;  %v1275_v62 = vmax.f32 %v1259_v53, 0.0  ;;  %v1276_v8 = vmax.f32 %v1260_v22, 0.0  ;;  %v4285_v46 = vld [vmem:[#allocation16] sm:$0xff]  ;;  %v1283_v49 = vmax.f32 %v1267_v0, 0.0  ;;  %v4292_v53 = vld [vmem:[#allocation16 + $0x38] sm:$0xff]  ;;  %v1278_v22 = vmax.f32 %v1262_v52, 0.0 }
 0x27f   :  { %v1269_v3 = vadd.f32 %v6033_v43, %v7488_v27  ;;  %v1296_v2 = vsel %vm1288_vm2, %v1277_v5, 0.0  ;;  %v1280_v47 = vmax.f32 %v1264_v37, 0.0  ;;  %v1268_v27 = vadd.f32 %v7541_v6, %v7485_v24  ;;  %v7586_v43 = vld [vmem:[#allocation11 + $0x860] sm:$0xff]  ;;  %v7591_v21 = vld [vmem:[#allocation11 + $0x870] sm:$0xff] }
 0x280   :  { %v1294_v13 = vsel %vm1288_vm2, %v1275_v62, 0.0  ;;  %v5780_v50 = vpack.c.bf16 %v4287_v32, %v4285_v46  ;;  %v4289_v56 = vld [vmem:[#allocation16 + $0x20] sm:$0xff]  ;;  %v1300_v41 = vsel %vm1288_vm2, %v1281_v34, 0.0  ;;  %v1282_v38 = vmax.f32 %v1266_v15, 0.0  ;;  %v4294_v24 = vld [vmem:[#allocation16 + $0x48] sm:$0xff]  ;;  %v4296_v6 = vld [vmem:[#allocation16 + $0x58] sm:$0xff] }
 0x281   :  { %5641 = vmatpush1.bf16.msra.mxu0 %v5640_v4  ;;  %v4286_v4 = vld [vmem:[#allocation16 + $0x8] sm:$0xff]  ;;  %v1335_v45 = vrot.slane %v1294_v13, 4  ;;  %v1347_v0 = vrot.slane %v1296_v2, 4  ;;  %v1297_v5 = vsel %vm1288_vm2, %v1278_v22, 0.0  ;;  %v1299_v52 = vsel %vm1288_vm2, %v1280_v47, 0.0  ;;  %v4300_v32 = vld [vmem:[#allocation16 + $0x78] sm:$0xff] }
 0x282   :  { %5643 = vmatprep.subr.bf16.mxu0 %v5642_v11  ;;  %v4288_v11 = vld [vmem:[#allocation16 + $0x18] sm:$0xff]  ;;  %v5784_v37 = vpack.c.bf16 %v4291_v16, %v4289_v56  ;;  %v1301_v15 = vsel %vm1288_vm2, %v1282_v38, 0.0  ;;  %v3277_v22 = vld [vmem:[#allocation11 + $0x890] sm:$0xff]  ;;  %v3280_v47 = vld [vmem:[#allocation11 + $0x8a8] sm:$0xff] }
 0x283   :  { %v5778_v31 = vpack.c.bf16 %v4288_v11, %v4286_v4  ;;  %v1371_v4 = vrot.slane %v1300_v41, 4  ;;  %v1284_v11 = vmax.f32 %v1268_v27, 0.0  ;;  %v1336_v34 = vmax.f32 %v1294_v13, %v1335_v45  ;;  %v3282_v56 = vld [vmem:[#allocation11 + $0x8b8] sm:$0xff] }
 0x285   :  { %5645 = vmatpush1.bf16.msra.mxu0 %v5644_v10  ;;  %v5658_v10 = vpack.c.bf16 %v3270_v25, %v7553_v1  ;;  %5779 = vmatprep.subr.bf16.mxu1 %v5778_v31  ;;  %v3276_v25 = vld [vmem:[#allocation11 + $0x888] sm:$0xff]  ;;  %v1365_v31 = vrot.slane %v1299_v52, 4  ;;  %v1372_v27 = vmax.f32 %v1300_v41, %v1371_v4 }
 0x286   :  { %5647 = vmatprep.subr.bf16.mxu0 %v5646_v44  ;;  %v5660_v44 = vpack.c.bf16 %v7558_v63, %v7556_v61  ;;  %5781 = vmatpush1.bf16.msra.mxu1 %v5780_v50  ;;  %v1303_v50 = vsel %vm1288_vm2, %v1284_v11, 0.0  ;;  %v4297_v63 = vld [vmem:[#allocation16 + $0x60] sm:$0xff] }
 0x287   :  { %v7618_v41 = vmax.f32 %v1299_v52, %v1365_v31  ;;  %v4301_v52 = vld [vmem:[#allocation16 + $0x80] sm:$0xff]  ;;  %v3290_v31 = vld [vmem:[#allocation11 + $0x8f8] sm:$0xff] }
 0x289   :  { %5649 = vmatpush1.bf16.msra.mxu0 %v5648_v42  ;;  %v1295_v42 = vsel %vm1288_vm2, %v1276_v8, 0.0  ;;  %v3278_v8 = vld [vmem:[#allocation11 + $0x898] sm:$0xff] }
 0x28a   :  { %5651 = vmatprep.subr.bf16.mxu0 %v5650_v60  ;;  %v1298_v60 = vsel %vm1288_vm2, %v1279_v58, 0.0  ;;  %v1341_v62 = vrot.slane %v1295_v42, 4  ;;  %v5664_v58 = vpack.c.bf16 %v7591_v21, %v7586_v43  ;;  %v5666_v46 = vpack.c.bf16 %v3278_v8, %v3276_v25 }
 0x28b   :  { %v1377_v43 = vrot.slane %v1301_v15, 4  ;;  %v1373_v8 = vrot.slane %v1372_v27, 2 }
 0x28c   :  { %3356 = vmatmul.mubr.f32.vlgmr.msra.gmra.mrb[32].mxu0 %v6909_v59  ;;  %v4290_v59 = vld [vmem:[#allocation16 + $0x28] sm:$0xff]  ;;  %v7611_v13 = vmax.f32 %v1295_v42, %v1341_v62  ;;  %v1389_v62 = vrot.slane %v1303_v50, 4 }
 0x28d   :  { %5653 = vmatpush1.bf16.msra.mxu0 %v5652_v39  ;;  %3361 = vmatprep.mubr.f32.mxu0 %v6932_v14  ;;  %v5662_v14 = vpack.c.bf16 %v7570_v7, %v7563_v40  ;;  %v5782_v1 = vpack.c.bf16 %v4292_v53, %v4290_v59  ;;  %v1302_v39 = vsel %vm1288_vm2, %v1283_v49, 0.0  ;;  %v4295_v40 = vld [vmem:[#allocation16 + $0x50] sm:$0xff]  ;;  %v1348_v49 = vmax.f32 %v1296_v2, %v1347_v0 }
 0x28e   :  { %5655 = vmatprep.subr.bf16.mxu0 %v5654_v51  ;;  %v1285_v51 = vmax.f32 %v1269_v3, 0.0  ;;  %v1383_v7 = vrot.slane %v1302_v39, 4  ;;  %v1353_v3 = vrot.slane %v1297_v5, 4  ;;  %v5670_v0 = vpack.c.bf16 %v3282_v56, %v3280_v47  ;;  %v7644_v47 = vld [vmem:[#allocation11 + $0x8f0] sm:$0xff] }
 0x28f   :  { %5783 = vmatprep.subr.bf16.mxu1 %v5782_v1  ;;  %v1349_v45 = vrot.slane %v1348_v49, 2  ;;  %v3279_v1 = vld [vmem:[#allocation11 + $0x8a0] sm:$0xff]  ;;  %v1343_v25 = vrot.slane %v7611_v13, 2 }
 0x290   :  { %3362 = vmatmul.mubr.f32.gmra.mrb[34].mxu0 %v6937_v19  ;;  %v1359_v19 = vrot.slane %v1298_v60, 4  ;;  %v1304_v59 = vsel %vm1288_vm2, %v1285_v51, 0.0  ;;  %5785 = vmatpush1.bf16.msra.mxu1 %v5784_v37  ;;  %v1384_v42 = vmax.f32 %v1302_v39, %v1383_v7  ;;  %v7616_v38 = vmax.f32 %v1297_v5, %v1353_v3  ;;  %v3284_v39 = vld [vmem:[#allocation11 + $0x8c8] sm:$0xff]  ;;  %v3286_v51 = vld [vmem:[#allocation11 + $0x8d8] sm:$0xff] }
 0x291   :  { %5657 = vmatpush1.bf16.msra.mxu0 %v5656_v55  ;;  %3367 = vmatprep.mubr.f32.mxu0 %v6943_v48  ;;  %v5786_v55 = vpack.c.bf16 %v4296_v6, %v4294_v24  ;;  %v4293_v48 = vld [vmem:[#allocation16 + $0x40] sm:$0xff]  ;;  %v1395_v16 = vrot.slane %v1304_v59, 4  ;;  %v3281_v24 = vld [vmem:[#allocation11 + $0x8b0] sm:$0xff]  ;;  %v7622_v5 = vmax.f32 %v1301_v15, %v1377_v43  ;;  %v1367_v15 = vrot.slane %v7618_v41, 2 }
 0x292   :  { %5659 = vmatprep.subr.bf16.mxu0 %v5658_v10  ;;  %v4298_v10 = vld [vmem:[#allocation16 + $0x68] sm:$0xff]  ;;  %v1360_v53 = vmax.f32 %v1298_v60, %v1359_v19  ;;  %v5788_v2 = vpack.c.bf16 %v4295_v40, %v4293_v48  ;;  %v1385_v4 = vrot.slane %v1384_v42, 2  ;;  %v4308_v48 = vld [vmem:[#allocation16 + $0xb8] sm:$0xff]  ;;  %v7629_v40 = vmax.f32 %v1348_v49, %v1349_v45  ;;  %v4307_v43 = vld [vmem:[#allocation16 + $0xb0] sm:$0xff] }
 0x293   :  { %5787 = vmatprep.subr.bf16.mxu1 %v5786_v55  ;;  %v5790_v61 = vpack.c.bf16 %v4300_v32, %v4298_v10  ;;  %v4302_v60 = vld [vmem:[#allocation16 + $0x88] sm:$0xff]  ;;  %v7626_v11 = vmax.f32 %v1304_v59, %v1395_v16  ;;  %v1355_v7 = vrot.slane %v7616_v38, 2  ;;  %v7636_v3 = vmax.f32 %v1303_v50, %v1389_v62  ;;  %v7640_v49 = vld [vmem:[#allocation11 + $0x8e0] sm:$0xff] }
 0x294   :  { %3368 = vmatmul.mubr.f32.gmra.mrb[36].mxu0 %v6950_v57  ;;  %v3275_v57 = vld [vmem:[#allocation11 + $0x880] sm:$0xff]  ;;  %v1361_v6 = vrot.slane %v1360_v53, 2  ;;  %5789 = vmatpush1.bf16.msra.mxu1 %v5788_v2  ;;  %v4306_v55 = vld [vmem:[#allocation16 + $0xa8] sm:$0xff]  ;;  %v1386_v56 = vmax.f32 %v1384_v42, %v1385_v4  ;;  %v1368_v16 = vmax.f32 %v7618_v41, %v1367_v15 }
 0x295   :  { %5661 = vmatpush1.bf16.msra.mxu0 %v5660_v44  ;;  %3373 = vmatprep.mubr.f32.mxu0 %v6972_v23  ;;  %v4299_v44 = vld [vmem:[#allocation16 + $0x70] sm:$0xff]  ;;  %v1337_v23 = vrot.slane %v1336_v34, 2  ;;  %v5668_v21 = vpack.c.bf16 %v3277_v22, %v3275_v57  ;;  %v1344_v57 = vmax.f32 %v7611_v13, %v1343_v25  ;;  %v1374_v22 = vmax.f32 %v1372_v27, %v1373_v8  ;;  %v4305_v2 = vld [vmem:[#allocation16 + $0xa0] sm:$0xff]  ;;  %v4312_v13 = vld [vmem:[#allocation16 + $0xd8] sm:$0xff] }
 0x296   :  { %5663 = vmatprep.subr.bf16.mxu0 %v5662_v14  ;;  %v4304_v14 = vld [vmem:[#allocation16 + $0x98] sm:$0xff]  ;;  %5791 = vmatprep.subr.bf16.mxu1 %v5790_v61  ;;  %v3285_v10 = vld [vmem:[#allocation11 + $0x8d0] sm:$0xff]  ;;  %v7634_v32 = vmax.f32 %v1360_v53, %v1361_v6  ;;  %v5798_v53 = vpack.c.bf16 %v4308_v48, %v4306_v55  ;;  %v1397_v61 = vrot.slane %v7626_v11, 2  ;;  %v1351_v27 = vrot.slane %v7629_v40, 1  ;;  %v3728_v42 = vld [vmem:[#allocation11 + $0x908] sm:$0xff] }
 0x297   :  { %v5794_v19 = vpack.c.bf16 %v4304_v14, %v4302_v60  ;;  %v7624_v37 = vmax.f32 %v1336_v34, %v1337_v23  ;;  %v3283_v34 = vld [vmem:[#allocation11 + $0x8c0] sm:$0xff]  ;;  %v1356_v23 = vmax.f32 %v7616_v38, %v1355_v7  ;;  %v3730_v14 = vld [vmem:[#allocation11 + $0x918] sm:$0xff]  ;;  %v7660_v38 = vld [vmem:[#allocation11 + $0x910] sm:$0xff]  ;;  %v5800_v41 = vpack.c.bf16 %v4307_v43, %v4305_v2 }
 0x298   :  { %3374 = vmatmul.mubr.f32.gmra.mrb[38].mxu0 %v6983_v29  ;;  %v5792_v29 = vpack.c.bf16 %v4299_v44, %v4297_v63  ;;  %v5676_v63 = vpack.c.bf16 %v3285_v10, %v3283_v34  ;;  %v4310_v44 = vld [vmem:[#allocation16 + $0xc8] sm:$0xff]  ;;  %v1363_v45 = vrot.slane %v7634_v32, 1  ;;  %v1398_v25 = vmax.f32 %v7626_v11, %v1397_v61  ;;  %v4313_v34 = vld [vmem:[#allocation16 + $0xe0] sm:$0xff] }
 0x299   :  { %5665 = vmatpush1.bf16.msra.mxu0 %v5664_v58  ;;  %3379 = vmatprep.mubr.f32.mxu0 %v7028_v9  ;;  %v4303_v9 = vld [vmem:[#allocation16 + $0x90] sm:$0xff]  ;;  %v5672_v58 = vpack.c.bf16 %v3281_v24, %v3279_v1  ;;  %v1339_v50 = vrot.slane %v7624_v37, 1  ;;  %v7658_v1 = vld [vmem:[#allocation11 + $0x900] sm:$0xff]  ;;  %v1345_v24 = vrot.slane %v1344_v57, 1  ;;  %v5802_v62 = vpack.c.bf16 %v4312_v13, %v4310_v44  ;;  %v3732_v55 = vld [vmem:[#allocation11 + $0x928] sm:$0xff] }
 0x29a   :  { %5667 = vmatprep.subr.bf16.mxu0 %v5666_v46  ;;  %v5674_v46 = vpack.c.bf16 %v3286_v51, %v3284_v39  ;;  %5793 = vmatpush1.bf16.msra.mxu1 %v5792_v29  ;;  %v5796_v59 = vpack.c.bf16 %v4303_v9, %v4301_v52  ;;  %v4311_v39 = vld [vmem:[#allocation16 + $0xd0] sm:$0xff]  ;;  %v1387_v29 = vrot.slane %v1386_v56, 1  ;;  %v5682_v8 = vpack.c.bf16 %v3730_v14, %v3728_v42  ;;  %v4316_v52 = vld [vmem:[#allocation16 + $0xf8] sm:$0xff] }
 0x29b   :  { %5795 = vmatprep.subr.bf16.mxu1 %v5794_v19  ;;  %v1340_v51 = vmax.f32 %v7624_v37, %v1339_v50  ;;  %v4314_v19 = vld [vmem:[#allocation16 + $0xe8] sm:$0xff]  ;;  %v1352_v9 = vmax.f32 %v7629_v40, %v1351_v27  ;;  %v1357_v4 = vrot.slane %v1356_v23, 1  ;;  %v3734_v37 = vld [vmem:[#allocation11 + $0x938] sm:$0xff]  ;;  %v1364_v48 = vmax.f32 %v7634_v32, %v1363_v45 }
 0x29c   :  { %3380 = vmatmul.mubr.f32.gmra.mrb[40].mxu0 %v7042_v20  ;;  %v7638_v20 = vld [vmem:[#allocation11 + $0x8e8] sm:$0xff]  ;;  %v1346_v7 = vmax.f32 %v1344_v57, %v1345_v24  ;;  %v5686_v10 = vpack.c.bf16 %v3734_v37, %v3732_v55  ;;  %v1399_v32 = vrot.slane %v1398_v25, 1  ;;  %v4319_v44 = vld [vmem:[#allocation16 + $0x110] sm:$0xff] }
 0x29d   :  { %5669 = vmatpush1.bf16.msra.mxu0 %v5668_v21  ;;  %3385 = vmatprep.mubr.f32.mxu0 %v7083_v54  ;;  %v1379_v54 = vrot.slane %v7622_v5, 2  ;;  %v5678_v60 = vpack.c.bf16 %v3290_v31, %v7638_v20  ;;  %v5680_v21 = vpack.c.bf16 %v7644_v47, %v7640_v49  ;;  %v4318_v20 = vld [vmem:[#allocation16 + $0x108] sm:$0xff]  ;;  %v4320_v31 = vld [vmem:[#allocation16 + $0x118] sm:$0xff]  ;;  %v1388_v49 = vmax.f32 %v1386_v56, %v1387_v29 }
 0x29e   :  { %5671 = vmatprep.subr.bf16.mxu0 %v5670_v0  ;;  %5797 = vmatpush1.bf16.msra.mxu1 %v5796_v59  ;;  %v4309_v0 = vld [vmem:[#allocation16 + $0xc0] sm:$0xff]  ;;  %v1358_v59 = vmax.f32 %v1356_v23, %v1357_v4  ;;  %v3733_v47 = vld [vmem:[#allocation11 + $0x930] sm:$0xff]  ;;  %v1400_v2 = vmax.f32 %v1398_v25, %v1399_v32  ;;  %v5810_v61 = vpack.c.bf16 %v4320_v31, %v4318_v20  ;;  %v3746_v37 = vld [vmem:[#allocation11 + $0x998] sm:$0xff] }
 0x29f   :  { %v1380_v6 = vmax.f32 %v7622_v5, %v1379_v54  ;;  %5799 = vmatprep.subr.bf16.mxu1 %v5798_v53  ;;  %v5684_v5 = vpack.c.bf16 %v7660_v38, %v7658_v1  ;;  %v4477_v27 = vsel %vm4369_vm5, %v1346_v7, %v7536_v30  ;;  %v7975_v23 = vld [vmem:[#allocation32_spill] sm:$0xff]  ;;  %v3735_v38 = vld [vmem:[#allocation11 + $0x940] sm:$0xff]  ;;  %v7976_v29 = vld [vmem:[#allocation33_spill] sm:$0xff] }
 0x2a0   :  { %3386 = vmatmul.mubr.f32.gmra.mrb[42].mxu0 %v7124_v26  ;;  %v1391_v26 = vrot.slane %v7636_v3, 2  ;;  %v3737_v30 = vld [vmem:[#allocation11 + $0x950] sm:$0xff]  ;;  %v3739_v4 = vld [vmem:[#allocation11 + $0x960] sm:$0xff]  ;;  %v3748_v20 = vld [vmem:[#allocation11 + $0x9a8] sm:$0xff] }
 0x2a1   :  { %5673 = vmatpush1.bf16.msra.mxu0 %v5672_v58  ;;  %3391 = vmatprep.mubr.f32.mxu0 %v7961_v18  ;;  %v1375_v18 = vrot.slane %v1374_v22, 1  ;;  %v1369_v58 = vrot.slane %v1368_v16, 1  ;;  %v1381_v15 = vrot.slane %v1380_v6, 1  ;;  %v4326_v25 = vld [vmem:[#allocation16 + $0x148] sm:$0xff]  ;;  %v7977_v7 = vld [vmem:[#allocation34_spill] sm:$0xff] }
 0x2a2   :  { %5675 = vmatprep.subr.bf16.mxu0 %v5674_v46  ;;  %v1392_v11 = vmax.f32 %v7636_v3, %v1391_v26  ;;  %5801 = vmatpush1.bf16.msra.mxu1 %v5800_v41  ;;  %v5806_v46 = vpack.c.bf16 %v4316_v52, %v4314_v19  ;;  %v4483_v3 = vsel %vm4367_vm4, %v1340_v51, %v7531_v33  ;;  %v3738_v33 = vld [vmem:[#allocation11 + $0x958] sm:$0xff]  ;;  %v3740_v41 = vld [vmem:[#allocation11 + $0x968] sm:$0xff] }
 0x2a3   :  { %v1376_v40 = vmax.f32 %v1374_v22, %v1375_v18  ;;  %5803 = vmatprep.subr.bf16.mxu1 %v5802_v62  ;;  %v1370_v54 = vmax.f32 %v1368_v16, %v1369_v58  ;;  %v4484_v57 = vsel %vm4369_vm5, %v1352_v9, %v4483_v3  ;;  %v3731_v22 = vld [vmem:[#allocation11 + $0x920] sm:$0xff]  ;;  %v1382_v56 = vmax.f32 %v1380_v6, %v1381_v15  ;;  %v4322_v16 = vld [vmem:[#allocation16 + $0x128] sm:$0xff]  ;;  %v3742_v6 = vld [vmem:[#allocation11 + $0x978] sm:$0xff] }
 0x2a4   :  { %3392 = vmatmul.mubr.f32.gmra.mrb[44].mxu0 %v7962_v12  ;;  %v5804_v12 = vpack.c.bf16 %v4311_v39, %v4309_v0  ;;  %v4485_v43 = vsel %vm4371_vm6, %v1364_v48, %v4484_v57  ;;  %v1393_v50 = vrot.slane %v1392_v11, 1  ;;  %v5688_v45 = vpack.c.bf16 %v3733_v47, %v3731_v22  ;;  %v4321_v0 = vld [vmem:[#allocation16 + $0x120] sm:$0xff]  ;;  %v4323_v39 = vld [vmem:[#allocation16 + $0x130] sm:$0xff]  ;;  %v4332_v15 = vld [vmem:[#allocation16 + $0x178] sm:$0xff] }
 0x2a5   :  { %5677 = vmatpush1.bf16.msra.mxu0 %v5676_v63  ;;  %3397 = vmatprep.mubr.f32.mxu0 %v7963_v35  ;;  %v4315_v35 = vld [vmem:[#allocation16 + $0xf0] sm:$0xff]  ;;  %v4317_v63 = vld [vmem:[#allocation16 + $0x100] sm:$0xff]  ;;  %v4486_v13 = vsel %vm4373_vm7, %v1376_v40, %v4485_v43  ;;  %v5692_v52 = vpack.c.bf16 %v3737_v30, %v3735_v38  ;;  %v5694_v9 = vpack.c.bf16 %v3742_v6, %v3740_v41  ;;  %v4330_v40 = vld [vmem:[#allocation16 + $0x168] sm:$0xff] }
 0x2a6   :  { %5679 = vmatprep.subr.bf16.mxu0 %v5678_v60  ;;  %5805 = vmatpush1.bf16.msra.mxu1 %v5804_v12  ;;  %v5808_v53 = vpack.c.bf16 %v4315_v35, %v4313_v34  ;;  %v4324_v60 = vld [vmem:[#allocation16 + $0x138] sm:$0xff]  ;;  %v4487_v42 = vsel %vm4375_vm8, %v1388_v49, %v4486_v13  ;;  %v1394_v14 = vmax.f32 %v1392_v11, %v1393_v50  ;;  %v3741_v58 = vld [vmem:[#allocation11 + $0x970] sm:$0xff]  ;;  %v4325_v11 = vld [vmem:[#allocation16 + $0x140] sm:$0xff] }
 0x2a7   :  { %5807 = vmatprep.subr.bf16.mxu1 %v5806_v46  ;;  %v7685_v26 = vsel %vm4377_vm9, %v1400_v2, %v4487_v42  ;;  %v5812_v24 = vpack.c.bf16 %v4319_v44, %v4317_v63  ;;  %v5814_v62 = vpack.c.bf16 %v4324_v60, %v4322_v16  ;;  %v5816_v55 = vpack.c.bf16 %v4323_v39, %v4321_v0  ;;  %v4327_v12 = vld [vmem:[#allocation16 + $0x150] sm:$0xff]  ;;  %v3743_v35 = vld [vmem:[#allocation11 + $0x980] sm:$0xff]  ;;  %v4334_v57 = vld [vmem:[#allocation16 + $0x188] sm:$0xff] }
 0x2a8   :  { %3398 = vmatmul.mubr.f32.gmra.mrb[46].mxu0 %v7964_v36  ;;  %v3736_v36 = vld [vmem:[#allocation11 + $0x948] sm:$0xff]  ;;  %v5696_v46 = vpack.c.bf16 %v3741_v58, %v3739_v4  ;;  %v5820_v31 = vpack.c.bf16 %v4327_v12, %v4325_v11  ;;  %v3750_v49 = vld [vmem:[#allocation11 + $0x9b8] sm:$0xff]  ;;  %v5822_v32 = vpack.c.bf16 %v4332_v15, %v4330_v40  ;;  %v3749_v2 = vld [vmem:[#allocation11 + $0x9b0] sm:$0xff] }
 0x2a9   :  { %5681 = vmatpush1.bf16.msra.mxu0 %v5680_v21  ;;  %3468 = vmatprep.mubr.f32.mxu0 %v7960_v28  ;;  %v4478_v21 = vsel %vm4371_vm6, %v1358_v59, %v4477_v27  ;;  %v5690_v1 = vpack.c.bf16 %v3738_v33, %v3736_v36  ;;  %v4329_v3 = vld [vmem:[#allocation16 + $0x160] sm:$0xff]  ;;  %v4331_v59 = vld [vmem:[#allocation16 + $0x170] sm:$0xff]  ;;  %v4336_v22 = vld [vmem:[#allocation16 + $0x198] sm:$0xff]  ;;  %v5702_v36 = vpack.c.bf16 %v3750_v49, %v3748_v20 }
 0x2aa   :  { %5683 = vmatprep.subr.bf16.mxu0 %v5682_v8  ;;  %5809 = vmatpush1.bf16.msra.mxu1 %v5808_v53  ;;  %v4479_v18 = vsel %vm4373_vm7, %v1370_v54, %v4478_v21  ;;  %v4328_v8 = vld [vmem:[#allocation16 + $0x158] sm:$0xff]  ;;  %v7978_v54 = vld [vmem:[#allocation35_spill] sm:$0xff]  ;;  %v5824_v50 = vpack.c.bf16 %v4331_v59, %v4329_v3  ;;  %v5826_v33 = vpack.c.bf16 %v4336_v22, %v4334_v57  ;;  %v4335_v63 = vld [vmem:[#allocation16 + $0x190] sm:$0xff] }
 0x2ab   :  { %5811 = vmatprep.subr.bf16.mxu1 %v5810_v61  ;;  %v4480_v51 = vsel %vm4375_vm8, %v1382_v56, %v4479_v18  ;;  %v5818_v48 = vpack.c.bf16 %v4328_v8, %v4326_v25  ;;  %v3747_v53 = vld [vmem:[#allocation11 + $0x9a0] sm:$0xff]  ;;  %v3752_v43 = vld [vmem:[#allocation11 + $0x9c8] sm:$0xff]  ;;  %v3754_v56 = vld [vmem:[#allocation11 + $0x9d8] sm:$0xff] }
 0x2ac   :  { %3469 = vmatmul.mubr.f32.vlgmr.msra.gmra.mrb[32].mxu0 %v7975_v23  ;;  %v7692_v19 = vsel %vm4377_vm9, %v1394_v14, %v4480_v51  ;;  %v4333_v61 = vld [vmem:[#allocation16 + $0x180] sm:$0xff]  ;;  %v7979_v44 = vld [vmem:[#allocation36_spill] sm:$0xff]  ;;  %v4340_v27 = vld [vmem:[#allocation16 + $0x1b8] sm:$0xff]  ;;  %v5704_v23 = vpack.c.bf16 %v3749_v2, %v3747_v53  ;;  %v5706_v42 = vpack.c.bf16 %v3754_v56, %v3752_v43 }
 0x2ad   :  { %5685 = vmatpush1.bf16.msra.mxu0 %v5684_v5  ;;  %3474 = vmatprep.mubr.f32.mxu0 %v7960_v28  ;;  %v3744_v5 = vld [vmem:[#allocation11 + $0x988] sm:$0xff]  ;;  %v3751_v16 = vld [vmem:[#allocation11 + $0x9c0] sm:$0xff]  ;;  %v3753_v60 = vld [vmem:[#allocation11 + $0x9d0] sm:$0xff] }
 0x2ae   :  { %5687 = vmatprep.subr.bf16.mxu0 %v5686_v10  ;;  %5813 = vmatpush1.bf16.msra.mxu1 %v5812_v24  ;;  %v5698_v34 = vpack.c.bf16 %v3746_v37, %v3744_v5  ;;  %v3745_v10 = vld [vmem:[#allocation11 + $0x990] sm:$0xff]  ;;  %v3756_v14 = vld [vmem:[#allocation11 + $0x9e8] sm:$0xff]  ;;  %v3537_v38 = vld [vmem:[#allocation2 + $0x20] sm:$0x7]  ;;  %v5708_v0 = vpack.c.bf16 %v3753_v60, %v3751_v16 }
 0x2af   :  { %5815 = vmatprep.subr.bf16.mxu1 %v5814_v62  ;;  %v5700_v47 = vpack.c.bf16 %v3745_v10, %v3743_v35  ;;  %v4338_v13 = vld [vmem:[#allocation16 + $0x1a8] sm:$0xff]  ;;  %v4337_v41 = vld [vmem:[#allocation16 + $0x1a0] sm:$0xff]  ;;  %v4339_v24 = vld [vmem:[#allocation16 + $0x1b0] sm:$0xff] }
 0x2b0   :  { %3475 = vmatmul.mubr.f32.gmra.mrb[34].mxu0 %v7976_v29  ;;  %v3534_v21 = vld [vmem:[#allocation2 + $0x8] sm:$0xf8]  ;;  %v5830_v30 = vpack.c.bf16 %v4340_v27, %v4338_v13  ;;  %v7980_v18 = vld [vmem:[#allocation37_spill] sm:$0xff]  ;;  %v7981_v37 = vld [vmem:[#allocation38_spill] sm:$0xff] }
 0x2b1   :  { %5689 = vmatpush1.bf16.msra.mxu0 %v5688_v45  ;;  %3480 = vmatprep.mubr.f32.mxu0 %v7960_v28  ;;  %v3758_v45 = vld [vmem:[#allocation11 + $0x9f8] sm:$0xff]  ;;  %v4342_v6 = vld [vmem:[#allocation16 + $0x1c8] sm:$0xff]  ;;  %v3755_v51 = vld [vmem:[#allocation11 + $0x9e0] sm:$0xff]  ;;  %v3633_v8 = vrot.slane %v3534_v21, 3 }
 0x2b2   :  { %5691 = vmatprep.subr.bf16.mxu0 %v5690_v1  ;;  %5817 = vmatpush1.bf16.msra.mxu1 %v5816_v55  ;;  %v5828_v1 = vpack.c.bf16 %v4335_v63, %v4333_v61  ;;  %v4344_v62 = vld [vmem:[#allocation16 + $0x1d8] sm:$0xff]  ;;  %v5710_v39 = vpack.c.bf16 %v3758_v45, %v3756_v14  ;;  %v3757_v29 = vld [vmem:[#allocation11 + $0x9f0] sm:$0xff]  ;;  %v3760_v25 = vld [vmem:[#allocation11 + $0xa08] sm:$0xff] }
 0x2b3   :  { %5819 = vmatprep.subr.bf16.mxu1 %v5818_v48  ;;  %v3762_v4 = vld [vmem:[#allocation11 + $0xa18] sm:$0xff]  ;;  %v5834_v58 = vpack.c.bf16 %v4344_v62, %v4342_v6  ;;  %v4341_v5 = vld [vmem:[#allocation16 + $0x1c0] sm:$0xff]  ;;  %v4346_v48 = vld [vmem:[#allocation16 + $0x1e8] sm:$0xff]  ;;  %v5712_v12 = vpack.c.bf16 %v3757_v29, %v3755_v51 }
 0x2b4   :  { %3481 = vmatmul.mubr.f32.gmra.mrb[36].mxu0 %v7977_v7  ;;  %v4343_v55 = vld [vmem:[#allocation16 + $0x1d0] sm:$0xff]  ;;  %v4348_v11 = vld [vmem:[#allocation16 + $0x1f8] sm:$0xff]  ;;  %v5714_v7 = vpack.c.bf16 %v3762_v4, %v3760_v25  ;;  %v4222_v3 = vld [vmem:[#allocation14 + $0x8] sm:$0xff] }
 0x2b5   :  { %5693 = vmatpush1.bf16.msra.mxu0 %v5692_v52  ;;  %3486 = vmatprep.mubr.f32.mxu0 %v7960_v28  ;;  %v3634_v52 = vrot.slane %v3537_v38, 3  ;;  %v3759_v40 = vld [vmem:[#allocation11 + $0xa00] sm:$0xff]  ;;  %v3761_v15 = vld [vmem:[#allocation11 + $0xa10] sm:$0xff]  ;;  %v5836_v35 = vpack.c.bf16 %v4343_v55, %v4341_v5  ;;  %v3766_v10 = vld [vmem:[#allocation11 + $0xa38] sm:$0xff]  ;;  %v5838_v20 = vpack.c.bf16 %v4348_v11, %v4346_v48 }
 0x2b6   :  { %5695 = vmatprep.subr.bf16.mxu0 %v5694_v9  ;;  %5821 = vmatpush1.bf16.msra.mxu1 %v5820_v31  ;;  %v5832_v9 = vpack.c.bf16 %v4339_v24, %v4337_v41  ;;  %v4345_v31 = vld [vmem:[#allocation16 + $0x1e0] sm:$0xff]  ;;  %v4347_v49 = vld [vmem:[#allocation16 + $0x1f0] sm:$0xff]  ;;  %v4224_v59 = vld [vmem:[#allocation14 + $0x18] sm:$0xff] }
 0x2b7   :  { %5823 = vmatprep.subr.bf16.mxu1 %v5822_v32  ;;  %v7982_v32 = vld [vmem:[#allocation39_spill] sm:$0xff]  ;;  %v3770_v2 = vld [vmem:[#allocation11 + $0xa58] sm:$0xff]  ;;  %v5842_v43 = vpack.c.bf16 %v4224_v59, %v4222_v3  ;;  %v3769_v61 = vld [vmem:[#allocation11 + $0xa50] sm:$0xff] }
 0x2b8   :  { %3487 = vmatmul.mubr.f32.gmra.mrb[38].mxu0 %v7978_v54  ;;  %v5716_v54 = vpack.c.bf16 %v3761_v15, %v3759_v40  ;;  %v3763_v22 = vld [vmem:[#allocation11 + $0xa20] sm:$0xff]  ;;  %v3768_v53 = vld [vmem:[#allocation11 + $0xa48] sm:$0xff]  ;;  %v3773_v16 = vld [vmem:[#allocation11 + $0xa70] sm:$0xff] }
 0x2b9   :  { %5697 = vmatpush1.bf16.msra.mxu0 %v5696_v46  ;;  %3492 = vmatprep.mubr.f32.mxu0 %v7960_v28  ;;  %v3764_v46 = vld [vmem:[#allocation11 + $0xa28] sm:$0xff]  ;;  %v5722_v56 = vpack.c.bf16 %v3770_v2, %v3768_v53  ;;  %v3775_v21 = vld [vmem:[#allocation11 + $0xa80] sm:$0xff]  ;;  %v3781_v6 = vld [vmem:[#allocation11 + $0xab0] sm:$0xff] }
 0x2ba   :  { %5699 = vmatprep.subr.bf16.mxu0 %v5698_v34  ;;  %5825 = vmatpush1.bf16.msra.mxu1 %v5824_v50  ;;  %v3635_v34 = vsel %vm3629_vm10, %v3633_v8, %v3634_v52  ;;  %v5718_v57 = vpack.c.bf16 %v3766_v10, %v3764_v46  ;;  %v3772_v63 = vld [vmem:[#allocation11 + $0xa68] sm:$0xff]  ;;  %v3783_v29 = vld [vmem:[#allocation11 + $0xac0] sm:$0xff]  ;;  %v3785_v25 = vld [vmem:[#allocation11 + $0xad0] sm:$0xff] }
 0x2bb   :  { %5827 = vmatprep.subr.bf16.mxu1 %v5826_v33  ;;  %v3767_v33 = vld [vmem:[#allocation11 + $0xa40] sm:$0xff]  ;;  %v3776_v60 = vld [vmem:[#allocation11 + $0xa88] sm:$0xff]  ;;  %v3790_v52 = vld [vmem:[#allocation11 + $0xaf8] sm:$0xff] }
 0x2bc   :  { %3493 = vmatmul.mubr.f32.gmra.mrb[40].mxu0 %v7979_v44  ;;  %v3774_v44 = vld [vmem:[#allocation11 + $0xa78] sm:$0xff]  ;;  %v5724_v13 = vpack.c.bf16 %v3769_v61, %v3767_v33  ;;  %v3780_v38 = vld [vmem:[#allocation11 + $0xaa8] sm:$0xff]  ;;  %v3787_v4 = vld [vmem:[#allocation11 + $0xae0] sm:$0xff] }
 0x2bd   :  { %5701 = vmatpush1.bf16.msra.mxu0 %v5700_v47  ;;  %3498 = vmatprep.mubr.f32.mxu0 %v7960_v28  ;;  %v3765_v47 = vld [vmem:[#allocation11 + $0xa30] sm:$0xff]  ;;  %v5726_v27 = vpack.c.bf16 %v3774_v44, %v3772_v63  ;;  %v3784_v62 = vld [vmem:[#allocation11 + $0xac8] sm:$0xff]  ;;  %v3533_v55 = vld [vmem:[#allocation2] sm:$0xf8] }
 0x2be   :  { %5703 = vmatprep.subr.bf16.mxu0 %v5702_v36  ;;  %5829 = vmatpush1.bf16.msra.mxu1 %v5828_v1  ;;  %v5840_v36 = vpack.c.bf16 %v4347_v49, %v4345_v31  ;;  %v5720_v50 = vpack.c.bf16 %v3765_v47, %v3763_v22  ;;  %v3777_v1 = vld [vmem:[#allocation11 + $0xa90] sm:$0xff]  ;;  %v3788_v8 = vld [vmem:[#allocation11 + $0xae8] sm:$0xff]  ;;  %v3794_v11 = vld [vmem:[#allocation11 + $0xb18] sm:$0xff]  ;;  %v3630_v15 = vrot.slane %v3533_v55, 3 }
 0x2bf   :  { %5831 = vmatprep.subr.bf16.mxu1 %v5830_v30  ;;  %v3782_v30 = vld [vmem:[#allocation11 + $0xab8] sm:$0xff]  ;;  %v5732_v41 = vpack.c.bf16 %v3777_v1, %v3775_v21  ;;  %v5742_v5 = vpack.c.bf16 %v3790_v52, %v3788_v8  ;;  %v3792_v48 = vld [vmem:[#allocation11 + $0xb08] sm:$0xff]  ;;  %v3795_v2 = vld [vmem:[#allocation11 + $0xb20] sm:$0xff] }
 0x2c0   :  { %3499 = vmatmul.mubr.f32.gmra.mrb[42].mxu0 %v7980_v18  ;;  %v5734_v24 = vpack.c.bf16 %v3782_v30, %v3780_v38  ;;  %v3779_v18 = vld [vmem:[#allocation11 + $0xaa0] sm:$0xff]  ;;  %v5746_v10 = vpack.c.bf16 %v3794_v11, %v3792_v48  ;;  %v3796_v3 = vld [vmem:[#allocation11 + $0xb28] sm:$0xff]  ;;  %v3798_v59 = vld [vmem:[#allocation11 + $0xb38] sm:$0xff] }
 0x2c1   :  { %5705 = vmatpush1.bf16.msra.mxu0 %v5704_v23  ;;  %3504 = vmatprep.mubr.f32.mxu0 %v7960_v28  ;;  %v3771_v23 = vld [vmem:[#allocation11 + $0xa60] sm:$0xff]  ;;  %v3797_v33 = vld [vmem:[#allocation11 + $0xb30] sm:$0xff] }
 0x2c2   :  { %5707 = vmatprep.subr.bf16.mxu0 %v5706_v42  ;;  %5833 = vmatpush1.bf16.msra.mxu1 %v5832_v9  ;;  %v3778_v42 = vld [vmem:[#allocation11 + $0xa98] sm:$0xff]  ;;  %v5728_v14 = vpack.c.bf16 %v3773_v16, %v3771_v23  ;;  %v5740_v9 = vpack.c.bf16 %v3785_v25, %v3783_v29  ;;  %v3548_v44 = vld [vmem:[#allocation2 + $0x78] sm:$0x7]  ;;  %v3555_v16 = vld [vmem:[#allocation2 + $0xb0] sm:$0x7] }
 0x2c3   :  { %5835 = vmatprep.subr.bf16.mxu1 %v5834_v58  ;;  %v5730_v45 = vpack.c.bf16 %v3778_v42, %v3776_v60  ;;  %v3789_v58 = vld [vmem:[#allocation11 + $0xaf0] sm:$0xff]  ;;  %v5752_v42 = vpack.c.bf16 %v3797_v33, %v3795_v2  ;;  %v3799_v21 = vld [vmem:[#allocation11 + $0xb40] sm:$0xff]  ;;  %v3573_v2 = vld [vmem:[#allocation2 + $0x140] sm:$0x7] }
 0x2c4   :  { %3505 = vmatmul.mubr.f32.gmra.mrb[44].mxu0 %v7981_v37  ;;  %v3536_v37 = vld [vmem:[#allocation2 + $0x18] sm:$0x7]  ;;  %v5744_v40 = vpack.c.bf16 %v3789_v58, %v3787_v4  ;;  %v3552_v23 = vld [vmem:[#allocation2 + $0x98] sm:$0xf8]  ;;  %v3551_v1 = vld [vmem:[#allocation2 + $0x90] sm:$0xf8] }
 0x2c5   :  { %5709 = vmatpush1.bf16.msra.mxu0 %v5708_v0  ;;  %3510 = vmatprep.mubr.f32.mxu0 %v7960_v28  ;;  %v3786_v0 = vld [vmem:[#allocation11 + $0xad8] sm:$0xff]  ;;  %v3631_v46 = vrot.slane %v3536_v37, 3  ;;  %v3657_v8 = vrot.slane %v3551_v1, 3  ;;  %v3805_v4 = vld [vmem:[#allocation11 + $0xb70] sm:$0xff]  ;;  %v3808_v58 = vld [vmem:[#allocation11 + $0xb88] sm:$0xff] }
 0x2c6   :  { %5711 = vmatprep.subr.bf16.mxu0 %v5710_v39  ;;  %5837 = vmatpush1.bf16.msra.mxu1 %v5836_v35  ;;  %v5736_v39 = vpack.c.bf16 %v3781_v6, %v3779_v18  ;;  %v5738_v51 = vpack.c.bf16 %v3786_v0, %v3784_v62  ;;  %v3539_v35 = vld [vmem:[#allocation2 + $0x30] sm:$0xf8]  ;;  %v3661_v18 = vrot.slane %v3555_v16, 3  ;;  %v3554_v6 = vld [vmem:[#allocation2 + $0xa8] sm:$0x7]  ;;  %v3806_v0 = vld [vmem:[#allocation11 + $0xb78] sm:$0xff] }
 0x2c7   :  { %5839 = vmatprep.subr.bf16.mxu1 %v5838_v20  ;;  %v3793_v20 = vld [vmem:[#allocation11 + $0xb10] sm:$0xff]  ;;  %v3632_v22 = vsel %vm3629_vm10, %v3630_v15, %v3631_v46  ;;  %v3804_v62 = vld [vmem:[#allocation11 + $0xb68] sm:$0xff]  ;;  %v3658_v52 = vrot.slane %v3554_v6, 3  ;;  %v3557_v11 = vld [vmem:[#allocation2 + $0xc0] sm:$0xf8] }
 0x2c8   :  { %3511 = vmatmul.mubr.f32.gmra.mrb[46].mxu0 %v7982_v32  ;;  %v3542_v32 = vld [vmem:[#allocation2 + $0x48] sm:$0x7]  ;;  %v5758_v55 = vpack.c.bf16 %v3806_v0, %v3804_v62  ;;  %v3567_v15 = vld [vmem:[#allocation2 + $0x110] sm:$0x7]  ;;  %v3572_v33 = vld [vmem:[#allocation2 + $0x138] sm:$0x7] }
 0x2c9   :  { %5713 = vmatpush1.bf16.msra.mxu0 %v5712_v12  ;;  %3887 = vmatprep.mubr.f32.mxu0 %v3635_v34  ;;  %v3540_v12 = vld [vmem:[#allocation2 + $0x38] sm:$0xf8]  ;;  %v3791_v34 = vld [vmem:[#allocation11 + $0xb00] sm:$0xff]  ;;  %v3640_v53 = vrot.slane %v3542_v32, 3  ;;  %v3659_v46 = vsel %vm3629_vm10, %v3657_v8, %v3658_v52  ;;  %v3575_v1 = vld [vmem:[#allocation2 + $0x150] sm:$0xf8] }
 0x2ca   :  { %5715 = vmatprep.subr.bf16.mxu0 %v5714_v7  ;;  %5841 = vmatpush1.bf16.msra.mxu1 %v5840_v36  ;;  %v3543_v7 = vld [vmem:[#allocation2 + $0x50] sm:$0x7]  ;;  %v3642_v31 = vrot.slane %v3540_v12, 3  ;;  %v5748_v47 = vpack.c.bf16 %v3793_v20, %v3791_v34  ;;  %v3639_v36 = vrot.slane %v3539_v35, 3  ;;  %v3560_v12 = vld [vmem:[#allocation2 + $0xd8] sm:$0x7] }
 0x2cb   :  { %5843 = vmatprep.subr.bf16.mxu1 %v5842_v43  ;;  %v3643_v49 = vrot.slane %v3543_v7, 3  ;;  %v3545_v43 = vld [vmem:[#allocation2 + $0x60] sm:$0xf8]  ;;  %v3666_v35 = vrot.slane %v3557_v11, 3  ;;  %v3576_v16 = vld [vmem:[#allocation2 + $0x158] sm:$0xf8] }
 0x2cc   :  { %v3641_v60 = vsel %vm3629_vm10, %v3639_v36, %v3640_v53  ;;  %v3810_v7 = vld [vmem:[#allocation11 + $0xb98] sm:$0xff]  ;;  %v3807_v20 = vld [vmem:[#allocation11 + $0xb80] sm:$0xff]  ;;  %v7983_v6 = vld [vmem:[#allocation40_spill] sm:$0xff]  ;;  %v3696_v52 = vrot.slane %v3576_v16, 3 }
 0x2cd   :  { %5717 = vmatpush1.bf16.msra.mxu0 %v5716_v54  ;;  %v3546_v54 = vld [vmem:[#allocation2 + $0x68] sm:$0xf8]  ;;  %v5762_v32 = vpack.c.bf16 %v3810_v7, %v3808_v58  ;;  %v3814_v36 = vld [vmem:[#allocation11 + $0xbb8] sm:$0xff]  ;;  %v7731_v58 = vld [vmem:[#allocation11 + $0xbf0] sm:$0xff] }
 0x2ce   :  { %5719 = vmatprep.subr.bf16.mxu0 %v5718_v57  ;;  %v3549_v57 = vld [vmem:[#allocation2 + $0x80] sm:$0x7]  ;;  %v3651_v61 = vrot.slane %v3546_v54, 3  ;;  %v3679_v54 = vrot.slane %v3567_v15, 3  ;;  %v3570_v53 = vld [vmem:[#allocation2 + $0x128] sm:$0xf8] }
 0x2cf   :  { %v3652_v63 = vrot.slane %v3549_v57, 3  ;;  %v3566_v57 = vld [vmem:[#allocation2 + $0x108] sm:$0x7]  ;;  %v3547_v7 = vld [vmem:[#allocation2 + $0x70] sm:$0xf8]  ;;  %v3693_v15 = vrot.slane %v3575_v1, 3 }
 0x2d0   :  { %v3574_v16 = vld [vmem:[#allocation2 + $0x148] sm:$0x7] }
 0x2d1   :  { %5721 = vmatpush1.bf16.msra.mxu0 %v5720_v50  ;;  %v3644_v50 = vsel %vm3629_vm10, %v3642_v31, %v3643_v49  ;;  %v3653_v38 = vsel %vm3629_vm10, %v3651_v61, %v3652_v63  ;;  %v3563_v31 = vld [vmem:[#allocation2 + $0xf0] sm:$0xf8] }
 0x2d2   :  { %5723 = vmatprep.subr.bf16.mxu0 %v5722_v56  ;;  %v5750_v56 = vpack.c.bf16 %v3798_v59, %v3796_v3  ;;  %v3809_v3 = vld [vmem:[#allocation11 + $0xb90] sm:$0xff] }
 0x2d3   :  { %v5764_v63 = vpack.c.bf16 %v3809_v3, %v3807_v20  ;;  %v3556_v3 = vld [vmem:[#allocation2 + $0xb8] sm:$0x7] }
 0x2d5   :  { %5725 = vmatpush1.bf16.msra.mxu0 %v5724_v13  ;;  %v3800_v13 = vld [vmem:[#allocation11 + $0xb48] sm:$0xff] }
 0x2d6   :  { %5727 = vmatprep.subr.bf16.mxu0 %v5726_v27  ;;  %v3802_v27 = vld [vmem:[#allocation11 + $0xb58] sm:$0xff] }
 0x2d7   :  { %v5754_v30 = vpack.c.bf16 %v3802_v27, %v3800_v13  ;;  %v3676_v13 = vrot.slane %v3566_v57, 3  ;;  %v3816_v27 = vld [vmem:[#allocation11 + $0xbc8] sm:$0xff] }
 0x2d9   :  { %5729 = vmatpush1.bf16.msra.mxu0 %v5728_v14  ;;  %v3648_v14 = vrot.slane %v3545_v43, 3  ;;  %v3811_v43 = vld [vmem:[#allocation11 + $0xba0] sm:$0xff] }
 0x2da   :  { %5731 = vmatprep.subr.bf16.mxu0 %v5730_v45  ;;  %v3649_v45 = vrot.slane %v3548_v44, 3  ;;  %v3675_v44 = vrot.slane %v3563_v31, 3 }
 0x2dc   :  { %v3650_v29 = vsel %vm3629_vm10, %v3648_v14, %v3649_v45  ;;  %v3687_v14 = vrot.slane %v3570_v53, 3  ;;  %v3688_v45 = vrot.slane %v3573_v2, 3  ;;  %v3562_v53 = vld [vmem:[#allocation2 + $0xe8] sm:$0x7] }
 0x2dd   :  { %5733 = vmatpush1.bf16.msra.mxu0 %v5732_v41  ;;  %v3801_v41 = vld [vmem:[#allocation11 + $0xb50] sm:$0xff] }
 0x2de   :  { %5735 = vmatprep.subr.bf16.mxu0 %v5734_v24  ;;  %v3660_v24 = vrot.slane %v3552_v23, 3  ;;  %v5756_v25 = vpack.c.bf16 %v3801_v41, %v3799_v21  ;;  %v3818_v23 = vld [vmem:[#allocation11 + $0xbd8] sm:$0xff]  ;;  %v3579_v21 = vld [vmem:[#allocation2 + $0x170] sm:$0x7]  ;;  %v3578_v41 = vld [vmem:[#allocation2 + $0x168] sm:$0x7] }
 0x2df   :  { %v5770_v11 = vpack.c.bf16 %v3818_v23, %v3816_v27  ;;  %v3571_v23 = vld [vmem:[#allocation2 + $0x130] sm:$0xf8] }
 0x2e1   :  { %5737 = vmatpush1.bf16.msra.mxu0 %v5736_v39  ;;  %v3558_v39 = vld [vmem:[#allocation2 + $0xc8] sm:$0xf8] }
 0x2e2   :  { %5739 = vmatprep.subr.bf16.mxu0 %v5738_v51  ;;  %v3561_v51 = vld [vmem:[#allocation2 + $0xe0] sm:$0x7]  ;;  %v3669_v37 = vrot.slane %v3558_v39, 3  ;;  %v3685_v39 = vrot.slane %v3572_v33, 3  ;;  %v3565_v33 = vld [vmem:[#allocation2 + $0x100] sm:$0xf8] }
 0x2e3   :  { %v3670_v48 = vrot.slane %v3561_v51, 3  ;;  %v3535_v51 = vld [vmem:[#allocation2 + $0x10] sm:$0xf8] }
 0x2e5   :  { %5741 = vmatpush1.bf16.msra.mxu0 %v5740_v9  ;;  %v3803_v9 = vld [vmem:[#allocation11 + $0xb60] sm:$0xff]  ;;  %v3671_v49 = vsel %vm3629_vm10, %v3669_v37, %v3670_v48  ;;  %v3689_v48 = vsel %vm3629_vm10, %v3687_v14, %v3688_v45  ;;  %v3664_v14 = vrot.slane %v3556_v3, 3 }
 0x2e6   :  { %5743 = vmatprep.subr.bf16.mxu0 %v5742_v5  ;;  %v3662_v5 = vsel %vm3629_vm10, %v3660_v24, %v3661_v18  ;;  %v5760_v34 = vpack.c.bf16 %v3805_v4, %v3803_v9  ;;  %v7721_v24 = vld [vmem:[#allocation11 + $0xbe8] sm:$0xff]  ;;  %v7723_v18 = vld [vmem:[#allocation11 + $0xbf8] sm:$0xff]  ;;  %v3697_v9 = vrot.slane %v3579_v21, 3  ;;  %v7729_v4 = vld [vmem:[#allocation11 + $0xbe0] sm:$0xff]  ;;  %v3673_v21 = vrot.slane %v3562_v53, 3 }
 0x2e9   :  { %5745 = vmatpush1.bf16.msra.mxu0 %v5744_v40  ;;  %v3564_v40 = vld [vmem:[#allocation2 + $0xf8] sm:$0xf8] }
 0x2ea   :  { %5747 = vmatprep.subr.bf16.mxu0 %v5746_v10  ;;  %v3667_v10 = vrot.slane %v3560_v12, 3  ;;  %v3678_v59 = vrot.slane %v3564_v40, 3  ;;  %v3544_v12 = vld [vmem:[#allocation2 + $0x58] sm:$0x7]  ;;  %v3550_v40 = vld [vmem:[#allocation2 + $0x88] sm:$0x7] }
 0x2ec   :  { %3888 = vmatmul.mubr.f32.vlgmr.msra.gmra.mrb[32].mxu0 %v3632_v22  ;;  %v3812_v22 = vld [vmem:[#allocation11 + $0xba8] sm:$0xff]  ;;  %v3668_v61 = vsel %vm3629_vm10, %v3666_v35, %v3667_v10  ;;  %v3553_v10 = vld [vmem:[#allocation2 + $0xa0] sm:$0xf8] }
 0x2ed   :  { %5749 = vmatpush1.bf16.msra.mxu0 %v5748_v47  ;;  %3893 = vmatprep.mubr.f32.mxu0 %v3644_v50  ;;  %v2409_v47 = vld [vmem:[#allocation10] sm:$0x3]  ;;  %v3813_v50 = vld [vmem:[#allocation11 + $0xbb0] sm:$0xff]  ;;  %v3663_v27 = vrot.slane %v3553_v10, 3 }
 0x2ee   :  { %5751 = vmatprep.subr.bf16.mxu0 %v5750_v56  ;;  %v3569_v56 = vld [vmem:[#allocation2 + $0x120] sm:$0xf8]  ;;  %v7726_v62 = vrot.slane %v2409_v47, %v7983_v6  ;;  %v5768_v8 = vpack.c.bf16 %v3813_v50, %v3811_v43  ;;  %v5776_v43 = vpack.c.bf16 %v7731_v58, %v7729_v4  ;;  %v3654_v50 = vrot.slane %v3547_v7, 3 }
 0x2ef   :  { %v3684_v0 = vrot.slane %v3569_v56, 3  ;;  %v3655_v56 = vrot.slane %v3550_v40, 3 }
 0x2f0   :  { %3894 = vmatmul.mubr.f32.gmra.mrb[34].mxu0 %v3641_v60  ;;  %v3680_v60 = vsel %vm3629_vm10, %v3678_v59, %v3679_v54  ;;  %v3559_v59 = vld [vmem:[#allocation2 + $0xd0] sm:$0xf8] }
 0x2f1   :  { %5753 = vmatpush1.bf16.msra.mxu0 %v5752_v42  ;;  %3899 = vmatprep.mubr.f32.mxu0 %v3653_v38  ;;  %v5766_v42 = vpack.c.bf16 %v3814_v36, %v3812_v22  ;;  %v7717_v38 = vld [vmem:[#allocation11 + $0xbc0] sm:$0xff]  ;;  %v3686_v31 = vsel %vm3629_vm10, %v3684_v0, %v3685_v39  ;;  %v3698_v22 = vsel %vm3629_vm10, %v3696_v52, %v3697_v9  ;;  %v3646_v36 = vrot.slane %v3544_v12, 3 }
 0x2f2   :  { %5755 = vmatprep.subr.bf16.mxu0 %v5754_v30  ;;  %v7719_v30 = vld [vmem:[#allocation11 + $0xbd0] sm:$0xff]  ;;  %v3672_v45 = vrot.slane %v3559_v59, 3  ;;  %v3690_v39 = vrot.slane %v3571_v23, 3  ;;  %v7756_v52 = vsel %vm3629_vm10, %v3654_v50, %v3655_v56 }
 0x2f4   :  { %3900 = vmatmul.mubr.f32.gmra.mrb[36].mxu0 %v3650_v29  ;;  %v3538_v29 = vld [vmem:[#allocation2 + $0x28] sm:$0x7] }
 0x2f5   :  { %5757 = vmatpush1.bf16.msra.mxu0 %v5756_v25  ;;  %3905 = vmatprep.mubr.f32.mxu0 %v3662_v5  ;;  %v3677_v25 = vsel %vm3629_vm10, %v3675_v44, %v3676_v13  ;;  %v7733_v5 = vld [vmem:[#allocation2 + $0x40] sm:$0xf8]  ;;  %v3637_v35 = vrot.slane %v3538_v29, 3 }
 0x2f6   :  { %5759 = vmatprep.subr.bf16.mxu0 %v5758_v55  ;;  %v7984_v55 = vld [vmem:[#allocation41_spill] sm:$0xff] }
 0x2f7   :  { %v7736_v37 = vrot.slane %v2409_v47, %v7984_v55  ;;  %v3645_v47 = vrot.slane %v7733_v5, 3  ;;  %v7759_v5 = vsel %vm3629_vm10, %v3663_v27, %v3664_v14 }
 0x2f8   :  { %3906 = vmatmul.mubr.f32.gmra.mrb[38].mxu0 %v3659_v46  ;;  %v3694_v46 = vrot.slane %v3578_v41, 3  ;;  %v3681_v41 = vrot.slane %v3565_v33, 3 }
 0x2f9   :  { %5761 = vmatpush1.bf16.msra.mxu0 %v5760_v34  ;;  %3911 = vmatprep.mubr.f32.mxu0 %v3671_v49  ;;  %v3636_v34 = vrot.slane %v3535_v51, 3  ;;  %v5772_v49 = vpack.c.bf16 %v7719_v30, %v7717_v38  ;;  %v3691_v51 = vrot.slane %v3574_v16, 3 }
 0x2fa   :  { %5763 = vmatprep.subr.bf16.mxu0 %v5762_v32  ;;  %v5774_v32 = vpack.c.bf16 %v7723_v18, %v7721_v24  ;;  %v3695_v44 = vsel %vm3629_vm10, %v3693_v15, %v3694_v46 }
 0x2fb   :  { %v3638_v13 = vsel %vm3629_vm10, %v3636_v34, %v3637_v35  ;;  %v7771_v34 = vld [vmem:[#allocation2 + $0x178] sm:$0x7] }
 0x2fc   :  { %3912 = vmatmul.mubr.f32.gmra.mrb[40].mxu0 %v3668_v61  ;;  %v3568_v61 = vld [vmem:[#allocation2 + $0x118] sm:$0x7] }
 0x2fd   :  { %5765 = vmatpush1.bf16.msra.mxu0 %v5764_v63  ;;  %3917 = vmatprep.mubr.f32.mxu0 %v3680_v60  ;;  %v3682_v24 = vrot.slane %v3568_v61, 3 }
 0x2fe   :  { %5767 = vmatprep.subr.bf16.mxu0 %v5766_v42 }
 0x2ff   :  { %v7769_v46 = vsel %vm3629_vm10, %v3681_v41, %v3682_v24 }
 0x300   :  { %v2346_v20 = vpop.f32.mrb[16].mxu1  ;;  %3918 = vmatmul.mubr.f32.gmra.mrb[42].mxu0 %v3677_v25 }
 0x301   :  { %v2421_v54 = vadd.f32 %v7726_v62, %v2346_v20  ;;  %v2348_v57 = vpop.f32.mrb[17].mxu1  ;;  %5769 = vmatpush1.bf16.msra.mxu0 %v5768_v8  ;;  %3923 = vmatprep.mubr.f32.mxu0 %v3689_v48  ;;  %v3647_v8 = vsel %vm3629_vm10, %v3645_v47, %v3646_v36  ;;  %v7762_v48 = vsel %vm3629_vm10, %v3672_v45, %v3673_v21  ;;  %v3700_v36 = vrot.slane %v7771_v34, 3 }
 0x302   :  { %v2422_v2 = vadd.f32 %v7736_v37, %v2348_v57  ;;  %5771 = vmatprep.subr.bf16.mxu0 %v5770_v11  ;;  %v7764_v11 = vld [vmem:[#allocation2 + $0x160] sm:$0xf8] }
 0x303   :  { %v2437_v63 = vmax.f32 %v2421_v54, 0.0  ;;  %v3699_v59 = vrot.slane %v7764_v11, 3 }
 0x304   :  { %v2438_v60 = vmax.f32 %v2422_v2, 0.0  ;;  %v2352_v42 = vpop.f32.mrb[18].mxu1  ;;  %3924 = vmatmul.mubr.f32.gmra.mrb[44].mxu0 %v3686_v31  ;;  %v7775_v31 = vsel %vm3629_vm10, %v3690_v39, %v3691_v51 }
 0x305   :  { %v2453_v1 = vrot.slane %v2437_v63, 4  ;;  %v2423_v38 = vadd.f32 %v7726_v62, %v2352_v42  ;;  %v2354_v30 = vpop.f32.mrb[19].mxu1  ;;  %5773 = vmatpush1.bf16.msra.mxu0 %v5772_v49  ;;  %3929 = vmatprep.mubr.f32.mxu0 %v3698_v22 }
 0x306   :  { %v2459_v18 = vrot.slane %v2438_v60, 4  ;;  %v2424_v0 = vadd.f32 %v7736_v37, %v2354_v30  ;;  %5775 = vmatprep.subr.bf16.mxu0 %v5774_v32 }
 0x307   :  { %v2454_v29 = vmax.f32 %v2437_v63, %v2453_v1  ;;  %v2439_v25 = vmax.f32 %v2423_v38, 0.0 }
 0x308   :  { %v2460_v9 = vmax.f32 %v2438_v60, %v2459_v18  ;;  %v2440_v4 = vmax.f32 %v2424_v0, 0.0  ;;  %v2358_v58 = vpop.f32.mrb[20].mxu1  ;;  %3930 = vmatmul.mubr.f32.gmra.mrb[46].mxu0 %v3695_v44 }
 0x309   :  { %v2455_v12 = vrot.slane %v2454_v29, 2  ;;  %v2465_v7 = vrot.slane %v2439_v25, 4  ;;  %v2425_v40 = vadd.f32 %v7726_v62, %v2358_v58  ;;  %v2360_v15 = vpop.f32.mrb[21].mxu1  ;;  %5777 = vmatpush1.bf16.msra.mxu0 %v5776_v43  ;;  %4000 = vmatprep.mubr.f32.mxu0 %v7960_v28 }
 0x30a   :  { %v2461_v35 = vrot.slane %v2460_v9, 2  ;;  %v2471_v10 = vrot.slane %v2440_v4, 4  ;;  %v2426_v20 = vadd.f32 %v7736_v37, %v2360_v15 }
 0x30b   :  { %v2456_v49 = vmax.f32 %v2454_v29, %v2455_v12  ;;  %v2466_v32 = vmax.f32 %v2439_v25, %v2465_v7  ;;  %v2441_v3 = vmax.f32 %v2425_v40, 0.0 }
 0x30c   :  { %v2462_v54 = vmax.f32 %v2460_v9, %v2461_v35  ;;  %v2472_v57 = vmax.f32 %v2440_v4, %v2471_v10  ;;  %v2442_v22 = vmax.f32 %v2426_v20, 0.0  ;;  %v2364_v47 = vpop.f32.mrb[22].mxu1  ;;  %4001 = vmatmul.mubr.f32.vlgmr.msra.gmra.mrb[32].mxu0 %v3638_v13 }
 0x30d   :  { %v2457_v53 = vrot.slane %v2456_v49, 1  ;;  %v2467_v2 = vrot.slane %v2466_v32, 2  ;;  %v2477_v43 = vrot.slane %v2441_v3, 4  ;;  %v2427_v50 = vadd.f32 %v7726_v62, %v2364_v47  ;;  %v2366_v56 = vpop.f32.mrb[23].mxu1  ;;  %4006 = vmatprep.mubr.f32.mxu0 %v7960_v28 }
 0x30e   :  { %v2463_v33 = vrot.slane %v2462_v54, 1  ;;  %v2473_v61 = vrot.slane %v2472_v57, 2  ;;  %v2483_v63 = vrot.slane %v2442_v22, 4  ;;  %v2428_v44 = vadd.f32 %v7736_v37, %v2366_v56 }
 0x30f   :  { %v2458_v27 = vmax.f32 %v2456_v49, %v2457_v53  ;;  %v2468_v23 = vmax.f32 %v2466_v32, %v2467_v2  ;;  %v2478_v16 = vmax.f32 %v2441_v3, %v2477_v43  ;;  %v2443_v60 = vmax.f32 %v2427_v50, 0.0 }
 0x310   :  { %v2464_v13 = vmax.f32 %v2462_v54, %v2463_v33  ;;  %v2474_v42 = vmax.f32 %v2472_v57, %v2473_v61  ;;  %v2484_v14 = vmax.f32 %v2442_v22, %v2483_v63  ;;  %v2444_v45 = vmax.f32 %v2428_v44, 0.0  ;;  %v2370_v21 = vpop.f32.mrb[24].mxu1  ;;  %4007 = vmatmul.mubr.f32.gmra.mrb[34].mxu0 %v3647_v8 }
 0x311   :  { %v2469_v1 = vrot.slane %v2468_v23, 1  ;;  %v2479_v38 = vrot.slane %v2478_v16, 2  ;;  %v2489_v30 = vrot.slane %v2443_v60, 4  ;;  %v2429_v41 = vadd.f32 %v7726_v62, %v2370_v21  ;;  %v2372_v24 = vpop.f32.mrb[25].mxu1  ;;  %4012 = vmatprep.mubr.f32.mxu0 %v7960_v28 }
 0x312   :  { %v2475_v18 = vrot.slane %v2474_v42, 1  ;;  %v2485_v0 = vrot.slane %v2484_v14, 2  ;;  %v2495_v39 = vrot.slane %v2444_v45, 4  ;;  %v2430_v51 = vadd.f32 %v7736_v37, %v2372_v24 }
 0x313   :  { %v2470_v29 = vmax.f32 %v2468_v23, %v2469_v1  ;;  %v2480_v25 = vmax.f32 %v2478_v16, %v2479_v38  ;;  %v2490_v9 = vmax.f32 %v2443_v60, %v2489_v30  ;;  %v2445_v4 = vmax.f32 %v2429_v41, 0.0 }
 0x314   :  { %v2476_v58 = vmax.f32 %v2474_v42, %v2475_v18  ;;  %v2486_v12 = vmax.f32 %v2484_v14, %v2485_v0  ;;  %v2496_v8 = vmax.f32 %v2444_v45, %v2495_v39  ;;  %v2446_v7 = vmax.f32 %v2430_v51, 0.0  ;;  %v2376_v40 = vpop.f32.mrb[26].mxu1  ;;  %4013 = vmatmul.mubr.f32.gmra.mrb[36].mxu0 %v7756_v52 }
 0x315   :  { %v4366_v15 = vsel %vm4365_vm3, %v2470_v29, %v2458_v27  ;;  %v2481_v35 = vrot.slane %v2480_v25, 1  ;;  %v2491_v10 = vrot.slane %v2490_v9, 2  ;;  %v2501_v20 = vrot.slane %v2445_v4, 4  ;;  %v2378_v49 = vpop.f32.mrb[27].mxu1  ;;  %4018 = vmatprep.mubr.f32.mxu0 %v7960_v28 }
 0x316   :  { %v4379_v32 = vsel %vm4365_vm3, %v2476_v58, %v2464_v13  ;;  %v2487_v3 = vrot.slane %v2486_v12, 1  ;;  %v2497_v54 = vrot.slane %v2496_v8, 2  ;;  %v2507_v57 = vrot.slane %v2446_v7, 4 }
 0x317   :  { %v2482_v22 = vmax.f32 %v2480_v25, %v2481_v35  ;;  %v2492_v47 = vmax.f32 %v2490_v9, %v2491_v10  ;;  %v2502_v53 = vmax.f32 %v2445_v4, %v2501_v20  ;;  %v2431_v2 = vadd.f32 %v7726_v62, %v2376_v40 }
 0x318   :  { %v2488_v43 = vmax.f32 %v2486_v12, %v2487_v3  ;;  %v2498_v52 = vmax.f32 %v2496_v8, %v2497_v54  ;;  %v2508_v50 = vmax.f32 %v2446_v7, %v2507_v57  ;;  %v2432_v56 = vadd.f32 %v7736_v37, %v2378_v49  ;;  %v2382_v33 = vpop.f32.mrb[28].mxu1  ;;  %4019 = vmatmul.mubr.f32.gmra.mrb[38].mxu0 %v7759_v5 }
 0x319   :  { %v4368_v61 = vsel %vm4367_vm4, %v2482_v22, %v4366_v15  ;;  %v2493_v63 = vrot.slane %v2492_v47, 1  ;;  %v2503_v44 = vrot.slane %v2502_v53, 2  ;;  %v2447_v27 = vmax.f32 %v2431_v2, 0.0  ;;  %v2384_v23 = vpop.f32.mrb[29].mxu1  ;;  %4024 = vmatprep.mubr.f32.mxu0 %v7960_v28 }
 0x31a   :  { %v4380_v16 = vsel %vm4367_vm4, %v2488_v43, %v4379_v32  ;;  %v2499_v60 = vrot.slane %v2498_v52, 1  ;;  %v2509_v13 = vrot.slane %v2508_v50, 2  ;;  %v2448_v42 = vmax.f32 %v2432_v56, 0.0 }
 0x31b   :  { %v2494_v14 = vmax.f32 %v2492_v47, %v2493_v63  ;;  %v2504_v45 = vmax.f32 %v2502_v53, %v2503_v44  ;;  %v2513_v21 = vrot.slane %v2447_v27, 4  ;;  %v2433_v1 = vadd.f32 %v7726_v62, %v2382_v33 }
 0x31c   :  { %v2500_v38 = vmax.f32 %v2498_v52, %v2499_v60  ;;  %v2510_v5 = vmax.f32 %v2508_v50, %v2509_v13  ;;  %v2519_v30 = vrot.slane %v2448_v42, 4  ;;  %v2434_v41 = vadd.f32 %v7736_v37, %v2384_v23  ;;  %v2388_v24 = vpop.f32.mrb[30].mxu1  ;;  %4025 = vmatmul.mubr.f32.gmra.mrb[40].mxu0 %v7762_v48 }
 0x31d   :  { %v4370_v18 = vsel %vm4369_vm5, %v2494_v14, %v4368_v61  ;;  %v2505_v0 = vrot.slane %v2504_v45, 1  ;;  %v2514_v39 = vmax.f32 %v2447_v27, %v2513_v21  ;;  %v2449_v51 = vmax.f32 %v2433_v1, 0.0  ;;  %v2390_v29 = vpop.f32.mrb[31].mxu1  ;;  %4030 = vmatprep.mubr.f32.mxu0 %v7960_v28 }
 0x31e   :  { %v2511_v25 = vrot.slane %v2510_v5, 1  ;;  %v2520_v9 = vmax.f32 %v2448_v42, %v2519_v30  ;;  %v2450_v4 = vmax.f32 %v2434_v41, 0.0  ;;  %v2435_v58 = vadd.f32 %v7726_v62, %v2388_v24  ;;  %v4228_v30 = vld [vmem:[#allocation14 + $0x38] sm:$0xff] }
 0x31f   :  { %v2506_v12 = vmax.f32 %v2504_v45, %v2505_v0  ;;  %v2515_v8 = vrot.slane %v2514_v39, 2  ;;  %v2525_v7 = vrot.slane %v2449_v51, 4  ;;  %v2436_v40 = vadd.f32 %v7736_v37, %v2390_v29  ;;  %v4227_v29 = vld [vmem:[#allocation14 + $0x30] sm:$0xff] }
 0x320   :  { %v2512_v15 = vmax.f32 %v2510_v5, %v2511_v25  ;;  %v2521_v48 = vrot.slane %v2520_v9, 2  ;;  %v2531_v35 = vrot.slane %v2450_v4, 4  ;;  %v2451_v10 = vmax.f32 %v2435_v58, 0.0  ;;  %4031 = vmatmul.mubr.f32.gmra.mrb[42].mxu0 %v7769_v46  ;;  %v4226_v5 = vld [vmem:[#allocation14 + $0x28] sm:$0xff] }
 0x321   :  { %v4372_v20 = vsel %vm4371_vm6, %v2506_v12, %v4370_v18  ;;  %v2516_v49 = vmax.f32 %v2514_v39, %v2515_v8  ;;  %v2526_v32 = vmax.f32 %v2449_v51, %v2525_v7  ;;  %v2452_v3 = vmax.f32 %v2436_v40, 0.0  ;;  %4036 = vmatprep.mubr.f32.mxu0 %v7960_v28  ;;  %v4225_v51 = vld [vmem:[#allocation14 + $0x20] sm:$0xff]  ;;  %v4230_v25 = vld [vmem:[#allocation14 + $0x48] sm:$0xff]  ;;  %v4231_v8 = vld [vmem:[#allocation14 + $0x50] sm:$0xff] }
 0x322   :  { %v2522_v54 = vmax.f32 %v2520_v9, %v2521_v48  ;;  %v2532_v62 = vmax.f32 %v2450_v4, %v2531_v35  ;;  %v2537_v57 = vrot.slane %v2451_v10, 4  ;;  %v4381_v22 = vsel %vm4369_vm5, %v2500_v38, %v4380_v16  ;;  %v4232_v9 = vld [vmem:[#allocation14 + $0x58] sm:$0xff]  ;;  %v4229_v12 = vld [vmem:[#allocation14 + $0x40] sm:$0xff]  ;;  %v4234_v7 = vld [vmem:[#allocation14 + $0x68] sm:$0xff] }
 0x323   :  { %v2517_v47 = vrot.slane %v2516_v49, 1  ;;  %v2527_v37 = vrot.slane %v2526_v32, 2  ;;  %v2543_v53 = vrot.slane %v2452_v3, 4  ;;  %v4382_v2 = vsel %vm4371_vm6, %v2512_v15, %v4381_v22  ;;  %v4236_v40 = vld [vmem:[#allocation14 + $0x78] sm:$0xff]  ;;  %v4233_v35 = vld [vmem:[#allocation14 + $0x60] sm:$0xff] }
 0x324   :  { %v2523_v43 = vrot.slane %v2522_v54, 1  ;;  %v2533_v52 = vrot.slane %v2532_v62, 2  ;;  %v2538_v46 = vmax.f32 %v2451_v10, %v2537_v57  ;;  %4037 = vmatmul.mubr.f32.gmra.mrb[44].mxu0 %v7775_v31  ;;  %v3701_v61 = vsel %vm3629_vm10, %v3699_v59, %v3700_v36  ;;  %v4221_v59 = vld [vmem:[#allocation14] sm:$0xff]  ;;  %v4223_v36 = vld [vmem:[#allocation14 + $0x10] sm:$0xff]  ;;  %v4244_v57 = vld [vmem:[#allocation14 + $0xb8] sm:$0xff] }
 0x325   :  { %v2518_v50 = vmax.f32 %v2516_v49, %v2517_v47  ;;  %v2528_v56 = vmax.f32 %v2526_v32, %v2527_v37  ;;  %v2544_v33 = vmax.f32 %v2452_v3, %v2543_v53  ;;  %4042 = vmatprep.mubr.f32.mxu0 %v7960_v28  ;;  %v5844_v18 = vpack.c.bf16 %v4223_v36, %v4221_v59  ;;  %v4235_v10 = vld [vmem:[#allocation14 + $0x70] sm:$0xff]  ;;  %v4240_v49 = vld [vmem:[#allocation14 + $0x98] sm:$0xff]  ;;  %v4241_v37 = vld [vmem:[#allocation14 + $0xa0] sm:$0xff] }
 0x326   :  { %v2524_v63 = vmax.f32 %v2522_v54, %v2523_v43  ;;  %v2534_v44 = vmax.f32 %v2532_v62, %v2533_v52  ;;  %v2539_v27 = vrot.slane %v2538_v46, 2  ;;  %v5846_v39 = vpack.c.bf16 %v4228_v30, %v4226_v5  ;;  %v4239_v54 = vld [vmem:[#allocation14 + $0x90] sm:$0xff]  ;;  %v4242_v62 = vld [vmem:[#allocation14 + $0xa8] sm:$0xff]  ;;  %v4248_v43 = vld [vmem:[#allocation14 + $0xd8] sm:$0xff] }
 0x327   :  { %v2529_v23 = vrot.slane %v2528_v56, 1  ;;  %v2545_v16 = vrot.slane %v2544_v33, 2  ;;  %v4374_v60 = vsel %vm4373_vm7, %v2518_v50, %v4372_v20  ;;  %v5848_v4 = vpack.c.bf16 %v4227_v29, %v4225_v51  ;;  %v4238_v20 = vld [vmem:[#allocation14 + $0x88] sm:$0xff]  ;;  %v4243_v53 = vld [vmem:[#allocation14 + $0xb0] sm:$0xff]  ;;  %v4245_v50 = vld [vmem:[#allocation14 + $0xc0] sm:$0xff] }
 0x328   :  { %v2535_v13 = vrot.slane %v2534_v44, 1  ;;  %v2540_v31 = vmax.f32 %v2538_v46, %v2539_v27  ;;  %4043 = vmatmul.mubr.f32.gmra.mrb[46].mxu0 %v3701_v61  ;;  %v4383_v42 = vsel %vm4373_vm7, %v2524_v63, %v4382_v2  ;;  %v5850_v58 = vpack.c.bf16 %v4232_v9, %v4230_v25  ;;  %v4246_v2 = vld [vmem:[#allocation14 + $0xc8] sm:$0xff]  ;;  %v4252_v61 = vld [vmem:[#allocation14 + $0xf8] sm:$0xff]  ;;  %v4249_v27 = vld [vmem:[#allocation14 + $0xe0] sm:$0xff] }
 0x329   :  { %v2530_v14 = vmax.f32 %v2528_v56, %v2529_v23  ;;  %v2546_v28 = vmax.f32 %v2544_v33, %v2545_v16  ;;  %v5852_v15 = vpack.c.bf16 %v4231_v8, %v4229_v12  ;;  %v5854_v48 = vpack.c.bf16 %v4236_v40, %v4234_v7  ;;  %v4247_v56 = vld [vmem:[#allocation14 + $0xd0] sm:$0xff]  ;;  %v4250_v33 = vld [vmem:[#allocation14 + $0xe8] sm:$0xff]  ;;  %v4261_v30 = vld [vmem:[#allocation14 + $0x140] sm:$0xff] }
 0x32a   :  { %v2536_v45 = vmax.f32 %v2534_v44, %v2535_v13  ;;  %v2541_v34 = vrot.slane %v2540_v31, 1  ;;  %v5856_v32 = vpack.c.bf16 %v4235_v10, %v4233_v35  ;;  %v5858_v3 = vpack.c.bf16 %v4240_v49, %v4238_v20  ;;  %v4251_v23 = vld [vmem:[#allocation14 + $0xf0] sm:$0xff]  ;;  %v4254_v16 = vld [vmem:[#allocation14 + $0x108] sm:$0xff]  ;;  %v4265_v51 = vld [vmem:[#allocation14 + $0x160] sm:$0xff] }
 0x32b   :  { %v2547_v21 = vrot.slane %v2546_v28, 1  ;;  %v4376_v11 = vsel %vm4375_vm8, %v2530_v14, %v4374_v60  ;;  %v5862_v47 = vpack.c.bf16 %v4244_v57, %v4242_v62  ;;  %v5864_v52 = vpack.c.bf16 %v4243_v53, %v4241_v37  ;;  %v4256_v60 = vld [vmem:[#allocation14 + $0x118] sm:$0xff]  ;;  %v4255_v14 = vld [vmem:[#allocation14 + $0x110] sm:$0xff]  ;;  %v4262_v36 = vld [vmem:[#allocation14 + $0x148] sm:$0xff] }
 0x32c   :  { %v2542_v1 = vmax.f32 %v2540_v31, %v2541_v34  ;;  %v4384_v38 = vsel %vm4375_vm8, %v2536_v45, %v4383_v42  ;;  %v5866_v46 = vpack.c.bf16 %v4248_v43, %v4246_v2  ;;  %v5868_v63 = vpack.c.bf16 %v4247_v56, %v4245_v50  ;;  %v4253_v42 = vld [vmem:[#allocation14 + $0x100] sm:$0xff]  ;;  %v4260_v45 = vld [vmem:[#allocation14 + $0x138] sm:$0xff]  ;;  %v4259_v59 = vld [vmem:[#allocation14 + $0x130] sm:$0xff] }
 0x32d   :  { %v2548_v41 = vmax.f32 %v2546_v28, %v2547_v21  ;;  %v5870_v44 = vpack.c.bf16 %v4252_v61, %v4250_v33  ;;  %v5872_v13 = vpack.c.bf16 %v4251_v23, %v4249_v27  ;;  %v5874_v31 = vpack.c.bf16 %v4256_v60, %v4254_v16  ;;  %v4258_v28 = vld [vmem:[#allocation14 + $0x128] sm:$0xff]  ;;  %v4267_v29 = vld [vmem:[#allocation14 + $0x170] sm:$0xff]  ;;  %v4272_v9 = vld [vmem:[#allocation14 + $0x198] sm:$0xff] }
 0x32e   :  { %v4378_v24 = vsel %vm4377_vm9, %v2542_v1, %v4376_v11  ;;  %v5876_v34 = vpack.c.bf16 %v4255_v14, %v4253_v42  ;;  %v5878_v21 = vpack.c.bf16 %v4260_v45, %v4258_v28  ;;  %v4257_v11 = vld [vmem:[#allocation14 + $0x120] sm:$0xff]  ;;  %v4264_v1 = vld [vmem:[#allocation14 + $0x158] sm:$0xff]  ;;  %v4270_v25 = vld [vmem:[#allocation14 + $0x188] sm:$0xff] }
 0x32f   :  { %v4385_v0 = vsel %vm4377_vm9, %v2548_v41, %v4384_v38  ;;  %v5880_v38 = vpack.c.bf16 %v4259_v59, %v4257_v11  ;;  %v5882_v5 = vpack.c.bf16 %v4264_v1, %v4262_v36  ;;  %v4263_v41 = vld [vmem:[#allocation14 + $0x150] sm:$0xff]  ;;  %v4269_v12 = vld [vmem:[#allocation14 + $0x180] sm:$0xff]  ;;  %v4274_v7 = vld [vmem:[#allocation14 + $0x1a8] sm:$0xff] }
 0x330   :  { %4452 = vmatprep.mubr.f32.mxu1 %v4385_v0  ;;  %v5884_v0 = vpack.c.bf16 %v4263_v41, %v4261_v30  ;;  %v4271_v8 = vld [vmem:[#allocation14 + $0x190] sm:$0xff]  ;;  %v4276_v40 = vld [vmem:[#allocation14 + $0x1b8] sm:$0xff]  ;;  %v4273_v35 = vld [vmem:[#allocation14 + $0x1a0] sm:$0xff] }
 0x331   :  { %4453 = vmatmul.mubr.f32.vlgmr.msra.gmra.mrb[32].mxu1 %v4378_v24  ;;  %v4266_v24 = vld [vmem:[#allocation14 + $0x168] sm:$0xff]  ;;  %v4275_v10 = vld [vmem:[#allocation14 + $0x1b0] sm:$0xff]  ;;  %v4280_v49 = vld [vmem:[#allocation14 + $0x1d8] sm:$0xff] }
 0x332   :  { %5845 = vmatpush1.bf16.msra.mxu1 %v5844_v18  ;;  %4555 = vmatprep.mubr.f32.mxu1 %v7685_v26  ;;  %v4237_v26 = vld [vmem:[#allocation14 + $0x80] sm:$0xff]  ;;  %v4268_v18 = vld [vmem:[#allocation14 + $0x178] sm:$0xff]  ;;  %v4278_v20 = vld [vmem:[#allocation14 + $0x1c8] sm:$0xff] }
 0x333   :  { %5847 = vmatprep.subr.bf16.mxu1 %v5846_v39  ;;  %v5860_v22 = vpack.c.bf16 %v4239_v54, %v4237_v26  ;;  %v5886_v39 = vpack.c.bf16 %v4268_v18, %v4266_v24  ;;  %v4277_v26 = vld [vmem:[#allocation14 + $0x1c0] sm:$0xff]  ;;  %v4279_v54 = vld [vmem:[#allocation14 + $0x1d0] sm:$0xff]  ;;  %v4282_v62 = vld [vmem:[#allocation14 + $0x1e8] sm:$0xff] }
 0x334   :  { %v4284_v57 = vld [vmem:[#allocation14 + $0x1f8] sm:$0xff]  ;;  %v4281_v37 = vld [vmem:[#allocation14 + $0x1e0] sm:$0xff]  ;;  %v4283_v53 = vld [vmem:[#allocation14 + $0x1f0] sm:$0xff] }
 0x335   :  { %v4563_v2 = vld [vmem:[#allocation17 + $0x8] sm:$0xff]  ;;  %v4565_v43 = vld [vmem:[#allocation17 + $0x18] sm:$0xff]  ;;  %v4562_v50 = vld [vmem:[#allocation17] sm:$0xff] }
 0x336   :  { %5849 = vmatpush1.bf16.msra.mxu1 %v5848_v4  ;;  %v5888_v4 = vpack.c.bf16 %v4267_v29, %v4265_v51  ;;  %v4564_v56 = vld [vmem:[#allocation17 + $0x10] sm:$0xff]  ;;  %v4567_v33 = vld [vmem:[#allocation17 + $0x28] sm:$0xff]  ;;  %v4569_v61 = vld [vmem:[#allocation17 + $0x38] sm:$0xff] }
 0x337   :  { %5851 = vmatprep.subr.bf16.mxu1 %v5850_v58  ;;  %v5890_v58 = vpack.c.bf16 %v4272_v9, %v4270_v25  ;;  %v4566_v27 = vld [vmem:[#allocation17 + $0x20] sm:$0xff]  ;;  %v4568_v23 = vld [vmem:[#allocation17 + $0x30] sm:$0xff]  ;;  %v4571_v16 = vld [vmem:[#allocation17 + $0x48] sm:$0xff] }
 0x338   :  { %v4573_v60 = vld [vmem:[#allocation17 + $0x58] sm:$0xff]  ;;  %v4570_v42 = vld [vmem:[#allocation17 + $0x40] sm:$0xff]  ;;  %v4572_v14 = vld [vmem:[#allocation17 + $0x50] sm:$0xff] }
 0x339   :  { %v4575_v28 = vld [vmem:[#allocation17 + $0x68] sm:$0xff]  ;;  %v4577_v45 = vld [vmem:[#allocation17 + $0x78] sm:$0xff]  ;;  %v4574_v11 = vld [vmem:[#allocation17 + $0x60] sm:$0xff] }
 0x33a   :  { %5853 = vmatpush1.bf16.msra.mxu1 %v5852_v15  ;;  %v5892_v15 = vpack.c.bf16 %v4271_v8, %v4269_v12  ;;  %v4576_v59 = vld [vmem:[#allocation17 + $0x70] sm:$0xff]  ;;  %v4579_v36 = vld [vmem:[#allocation17 + $0x88] sm:$0xff]  ;;  %v4581_v1 = vld [vmem:[#allocation17 + $0x98] sm:$0xff] }
 0x33b   :  { %5855 = vmatprep.subr.bf16.mxu1 %v5854_v48  ;;  %v5894_v48 = vpack.c.bf16 %v4276_v40, %v4274_v7  ;;  %v4580_v30 = vld [vmem:[#allocation17 + $0x90] sm:$0xff]  ;;  %v4583_v41 = vld [vmem:[#allocation17 + $0xa8] sm:$0xff]  ;;  %v4585_v24 = vld [vmem:[#allocation17 + $0xb8] sm:$0xff] }
 0x33c   :  { %v4584_v51 = vld [vmem:[#allocation17 + $0xb0] sm:$0xff]  ;;  %v4587_v29 = vld [vmem:[#allocation17 + $0xc8] sm:$0xff]  ;;  %v4589_v25 = vld [vmem:[#allocation17 + $0xd8] sm:$0xff] }
 0x33d   :  { %v4588_v12 = vld [vmem:[#allocation17 + $0xd0] sm:$0xff]  ;;  %v4591_v8 = vld [vmem:[#allocation17 + $0xe8] sm:$0xff]  ;;  %v4593_v7 = vld [vmem:[#allocation17 + $0xf8] sm:$0xff] }
 0x33e   :  { %5857 = vmatpush1.bf16.msra.mxu1 %v5856_v32  ;;  %v5896_v32 = vpack.c.bf16 %v4275_v10, %v4273_v35  ;;  %v4592_v35 = vld [vmem:[#allocation17 + $0xf0] sm:$0xff]  ;;  %v4595_v10 = vld [vmem:[#allocation17 + $0x108] sm:$0xff] }
 0x33f   :  { %5859 = vmatprep.subr.bf16.mxu1 %v5858_v3  ;;  %v5898_v3 = vpack.c.bf16 %v4280_v49, %v4278_v20  ;;  %v4597_v20 = vld [vmem:[#allocation17 + $0x118] sm:$0xff] }
 0x342   :  { %5861 = vmatpush1.bf16.msra.mxu1 %v5860_v22  ;;  %v5900_v22 = vpack.c.bf16 %v4279_v54, %v4277_v26  ;;  %v4596_v26 = vld [vmem:[#allocation17 + $0x110] sm:$0xff]  ;;  %v4599_v54 = vld [vmem:[#allocation17 + $0x128] sm:$0xff] }
 0x343   :  { %5863 = vmatprep.subr.bf16.mxu1 %v5862_v47  ;;  %v5902_v47 = vpack.c.bf16 %v4284_v57, %v4282_v62  ;;  %v4601_v62 = vld [vmem:[#allocation17 + $0x138] sm:$0xff] }
 0x346   :  { %5865 = vmatpush1.bf16.msra.mxu1 %v5864_v52  ;;  %v5904_v52 = vpack.c.bf16 %v4283_v53, %v4281_v37  ;;  %v4600_v37 = vld [vmem:[#allocation17 + $0x130] sm:$0xff]  ;;  %v4603_v53 = vld [vmem:[#allocation17 + $0x148] sm:$0xff] }
 0x347   :  { %5867 = vmatprep.subr.bf16.mxu1 %v5866_v46  ;;  %v5906_v46 = vpack.c.bf16 %v4565_v43, %v4563_v2  ;;  %v4605_v2 = vld [vmem:[#allocation17 + $0x158] sm:$0xff] }
 0x34a   :  { %5869 = vmatpush1.bf16.msra.mxu1 %v5868_v63  ;;  %v5908_v63 = vpack.c.bf16 %v4564_v56, %v4562_v50  ;;  %v4604_v50 = vld [vmem:[#allocation17 + $0x150] sm:$0xff]  ;;  %v4607_v56 = vld [vmem:[#allocation17 + $0x168] sm:$0xff] }
 0x34b   :  { %5871 = vmatprep.subr.bf16.mxu1 %v5870_v44  ;;  %v5910_v44 = vpack.c.bf16 %v4569_v61, %v4567_v33  ;;  %v4609_v33 = vld [vmem:[#allocation17 + $0x178] sm:$0xff] }
 0x34e   :  { %5873 = vmatpush1.bf16.msra.mxu1 %v5872_v13  ;;  %v5912_v13 = vpack.c.bf16 %v4568_v23, %v4566_v27  ;;  %v4608_v27 = vld [vmem:[#allocation17 + $0x170] sm:$0xff]  ;;  %v4611_v23 = vld [vmem:[#allocation17 + $0x188] sm:$0xff] }
 0x34f   :  { %5875 = vmatprep.subr.bf16.mxu1 %v5874_v31  ;;  %v5914_v31 = vpack.c.bf16 %v4573_v60, %v4571_v16  ;;  %v4613_v16 = vld [vmem:[#allocation17 + $0x198] sm:$0xff] }
 0x352   :  { %5877 = vmatpush1.bf16.msra.mxu1 %v5876_v34  ;;  %v5916_v34 = vpack.c.bf16 %v4572_v14, %v4570_v42  ;;  %v4612_v42 = vld [vmem:[#allocation17 + $0x190] sm:$0xff]  ;;  %v4615_v14 = vld [vmem:[#allocation17 + $0x1a8] sm:$0xff] }
 0x353   :  { %5879 = vmatprep.subr.bf16.mxu1 %v5878_v21  ;;  %v5918_v21 = vpack.c.bf16 %v4577_v45, %v4575_v28  ;;  %v4617_v28 = vld [vmem:[#allocation17 + $0x1b8] sm:$0xff] }
 0x356   :  { %5881 = vmatpush1.bf16.msra.mxu1 %v5880_v38  ;;  %v5920_v38 = vpack.c.bf16 %v4576_v59, %v4574_v11  ;;  %v4616_v11 = vld [vmem:[#allocation17 + $0x1b0] sm:$0xff]  ;;  %v4619_v59 = vld [vmem:[#allocation17 + $0x1c8] sm:$0xff] }
 0x357   :  { %5883 = vmatprep.subr.bf16.mxu1 %v5882_v5  ;;  %v4578_v5 = vld [vmem:[#allocation17 + $0x80] sm:$0xff] }
 0x358   :  { %v5924_v18 = vpack.c.bf16 %v4580_v30, %v4578_v5  ;;  %v4620_v5 = vld [vmem:[#allocation17 + $0x1d0] sm:$0xff]  ;;  %v4623_v30 = vld [vmem:[#allocation17 + $0x1e8] sm:$0xff] }
 0x35a   :  { %5885 = vmatpush1.bf16.msra.mxu1 %v5884_v0  ;;  %v5926_v0 = vpack.c.bf16 %v4585_v24, %v4583_v41  ;;  %v4625_v41 = vld [vmem:[#allocation17 + $0x1f8] sm:$0xff] }
 0x35b   :  { %5887 = vmatprep.subr.bf16.mxu1 %v5886_v39  ;;  %v4582_v39 = vld [vmem:[#allocation17 + $0xa0] sm:$0xff] }
 0x35c   :  { %v5928_v9 = vpack.c.bf16 %v4584_v51, %v4582_v39  ;;  %v4624_v39 = vld [vmem:[#allocation17 + $0x1f0] sm:$0xff]  ;;  %v4763_v51 = vld [vmem:[#allocation20 + $0x80] sm:$0xff] }
 0x35e   :  { %5889 = vmatpush1.bf16.msra.mxu1 %v5888_v4  ;;  %v5930_v4 = vpack.c.bf16 %v4589_v25, %v4587_v29  ;;  %v4764_v29 = vld [vmem:[#allocation20 + $0x88] sm:$0xff] }
 0x35f   :  { %5891 = vmatprep.subr.bf16.mxu1 %v5890_v58  ;;  %v4586_v58 = vld [vmem:[#allocation17 + $0xc0] sm:$0xff] }
 0x360   :  { %v5932_v40 = vpack.c.bf16 %v4588_v12, %v4586_v58 }
 0x362   :  { %5893 = vmatpush1.bf16.msra.mxu1 %v5892_v15  ;;  %v5934_v15 = vpack.c.bf16 %v4593_v7, %v4591_v8 }
 0x363   :  { %5895 = vmatprep.subr.bf16.mxu1 %v5894_v48  ;;  %v4590_v48 = vld [vmem:[#allocation17 + $0xe0] sm:$0xff] }
 0x364   :  { %v5936_v49 = vpack.c.bf16 %v4592_v35, %v4590_v48 }
 0x366   :  { %5897 = vmatpush1.bf16.msra.mxu1 %v5896_v32  ;;  %v5938_v32 = vpack.c.bf16 %v4597_v20, %v4595_v10 }
 0x367   :  { %5899 = vmatprep.subr.bf16.mxu1 %v5898_v3  ;;  %v4594_v3 = vld [vmem:[#allocation17 + $0x100] sm:$0xff] }
 0x368   :  { %v5940_v57 = vpack.c.bf16 %v4596_v26, %v4594_v3 }
 0x36a   :  { %5901 = vmatpush1.bf16.msra.mxu1 %v5900_v22  ;;  %v5942_v22 = vpack.c.bf16 %v4601_v62, %v4599_v54 }
 0x36b   :  { %5903 = vmatprep.subr.bf16.mxu1 %v5902_v47  ;;  %v4598_v47 = vld [vmem:[#allocation17 + $0x120] sm:$0xff] }
 0x36c   :  { %v5944_v43 = vpack.c.bf16 %v4600_v37, %v4598_v47 }
 0x36e   :  { %5905 = vmatpush1.bf16.msra.mxu1 %v5904_v52  ;;  %v5946_v52 = vpack.c.bf16 %v4605_v2, %v4603_v53 }
 0x36f   :  { %5907 = vmatprep.subr.bf16.mxu1 %v5906_v46  ;;  %v4602_v46 = vld [vmem:[#allocation17 + $0x140] sm:$0xff] }
 0x370   :  { %v5948_v61 = vpack.c.bf16 %v4604_v50, %v4602_v46 }
 0x371   :  { %4556 = vmatmul.mubr.f32.vlgmr.msra.gmra.mrb[32].mxu1 %v7692_v19  ;;  %v5922_v19 = vpack.c.bf16 %v4581_v1, %v4579_v36  ;;  %v4621_v36 = vld [vmem:[#allocation17 + $0x1d8] sm:$0xff] }
 0x372   :  { %5909 = vmatpush1.bf16.msra.mxu1 %v5908_v63  ;;  %v5950_v63 = vpack.c.bf16 %v4609_v33, %v4607_v56 }
 0x373   :  { %5911 = vmatprep.subr.bf16.mxu1 %v5910_v44  ;;  %v4606_v44 = vld [vmem:[#allocation17 + $0x160] sm:$0xff] }
 0x374   :  { %v5952_v60 = vpack.c.bf16 %v4608_v27, %v4606_v44 }
 0x376   :  { %5913 = vmatpush1.bf16.msra.mxu1 %v5912_v13  ;;  %v5954_v13 = vpack.c.bf16 %v4613_v16, %v4611_v23 }
 0x377   :  { %5915 = vmatprep.subr.bf16.mxu1 %v5914_v31  ;;  %v4610_v31 = vld [vmem:[#allocation17 + $0x180] sm:$0xff] }
 0x378   :  { %v5956_v45 = vpack.c.bf16 %v4612_v42, %v4610_v31 }
 0x37a   :  { %5917 = vmatpush1.bf16.msra.mxu1 %v5916_v34  ;;  %v5958_v34 = vpack.c.bf16 %v4617_v28, %v4615_v14 }
 0x37b   :  { %5919 = vmatprep.subr.bf16.mxu1 %v5918_v21  ;;  %v4614_v21 = vld [vmem:[#allocation17 + $0x1a0] sm:$0xff] }
 0x37c   :  { %v5960_v1 = vpack.c.bf16 %v4616_v11, %v4614_v21 }
 0x37e   :  { %5921 = vmatpush1.bf16.msra.mxu1 %v5920_v38  ;;  %v5962_v38 = vpack.c.bf16 %v4621_v36, %v4619_v59 }
 0x37f   :  { %5923 = vmatprep.subr.bf16.mxu1 %v5922_v19  ;;  %v4618_v19 = vld [vmem:[#allocation17 + $0x1c0] sm:$0xff] }
 0x380   :  { %v5964_v24 = vpack.c.bf16 %v4620_v5, %v4618_v19 }
 0x382   :  { %5925 = vmatpush1.bf16.msra.mxu1 %v5924_v18  ;;  %v5966_v18 = vpack.c.bf16 %v4625_v41, %v4623_v30 }
 0x383   :  { %5927 = vmatprep.subr.bf16.mxu1 %v5926_v0  ;;  %v4622_v0 = vld [vmem:[#allocation17 + $0x1e0] sm:$0xff] }
 0x384   :  { %v5968_v25 = vpack.c.bf16 %v4624_v39, %v4622_v0 }
 0x386   :  { %5929 = vmatpush1.bf16.msra.mxu1 %v5928_v9  ;;  %v5970_v9 = vpack.c.bf16 %v4764_v29, %v4763_v51 }
 0x387   :  { %5931 = vmatprep.subr.bf16.mxu1 %v5930_v4  ;;  %v4065_v4 = vld [vmem:[#allocation13] sm:$0x3] }
 0x388   :  { %v7823_v58 = vrot.slane %v4065_v4, %v7983_v6  ;;  %v7826_v12 = vrot.slane %v4065_v4, %v7984_v55 }
 0x38a   :  { %5933 = vmatpush1.bf16.msra.mxu1 %v5932_v40 }
 0x38b   :  { %5935 = vmatprep.subr.bf16.mxu1 %v5934_v15 }
 0x38e   :  { %5937 = vmatpush1.bf16.msra.mxu1 %v5936_v49 }
 0x38f   :  { %5939 = vmatprep.subr.bf16.mxu1 %v5938_v32 }
 0x392   :  { %5941 = vmatpush1.bf16.msra.mxu1 %v5940_v57 }
 0x393   :  { %5943 = vmatprep.subr.bf16.mxu1 %v5942_v22 }
 0x396   :  { %5945 = vmatpush1.bf16.msra.mxu1 %v5944_v43 }
 0x397   :  { %5947 = vmatprep.subr.bf16.mxu1 %v5946_v52 }
 0x39a   :  { %5949 = vmatpush1.bf16.msra.mxu1 %v5948_v61 }
 0x39b   :  { %5951 = vmatprep.subr.bf16.mxu1 %v5950_v63 }
 0x39e   :  { %5953 = vmatpush1.bf16.msra.mxu1 %v5952_v60 }
 0x39f   :  { %5955 = vmatprep.subr.bf16.mxu1 %v5954_v13 }
 0x3a2   :  { %5957 = vmatpush1.bf16.msra.mxu1 %v5956_v45 }
 0x3a3   :  { %5959 = vmatprep.subr.bf16.mxu1 %v5958_v34 }
 0x3a6   :  { %5961 = vmatpush1.bf16.msra.mxu1 %v5960_v1 }
 0x3a7   :  { %5963 = vmatprep.subr.bf16.mxu1 %v5962_v38 }
 0x3aa   :  { %5965 = vmatpush1.bf16.msra.mxu1 %v5964_v24 }
 0x3ab   :  { %5967 = vmatprep.subr.bf16.mxu1 %v5966_v18 }
 0x3ae   :  { %5969 = vmatpush1.bf16.msra.mxu1 %v5968_v25 }
 0x3af   :  { %5971 = vmatprep.subr.bf16.mxu1 %v5970_v9 }
 0x3df   :  { %v4002_v8 = vpop.f32.mrb[32].mxu0 }
 0x3e0   :  { %v4077_v7 = vadd.f32 %v7823_v58, %v4002_v8  ;;  %v4004_v40 = vpop.f32.mrb[33].mxu0 }
 0x3e1   :  { %v4078_v15 = vadd.f32 %v7826_v12, %v4004_v40 }
 0x3e2   :  { %v4093_v48 = vmax.f32 %v4077_v7, 0.0 }
 0x3e3   :  { %v4094_v35 = vmax.f32 %v4078_v15, 0.0  ;;  %v4008_v10 = vpop.f32.mrb[34].mxu0 }
 0x3e4   :  { %v4109_v20 = vsel %vm1288_vm2, %v4093_v48, 0.0  ;;  %v4079_v49 = vadd.f32 %v7823_v58, %v4008_v10  ;;  %v4010_v32 = vpop.f32.mrb[35].mxu0 }
 0x3e5   :  { %v4125_v3 = vrot.slane %v4109_v20, 4  ;;  %v4110_v26 = vsel %vm1288_vm2, %v4094_v35, 0.0  ;;  %v4080_v54 = vadd.f32 %v7826_v12, %v4010_v32 }
 0x3e6   :  { %v4131_v62 = vrot.slane %v4110_v26, 4  ;;  %v4095_v57 = vmax.f32 %v4079_v49, 0.0 }
 0x3e7   :  { %v4126_v22 = vmax.f32 %v4109_v20, %v4125_v3  ;;  %v4096_v47 = vmax.f32 %v4080_v54, 0.0  ;;  %v4014_v37 = vpop.f32.mrb[36].mxu0 }
 0x3e8   :  { %v4132_v53 = vmax.f32 %v4110_v26, %v4131_v62  ;;  %v4111_v2 = vsel %vm1288_vm2, %v4095_v57, 0.0  ;;  %v4081_v43 = vadd.f32 %v7823_v58, %v4014_v37  ;;  %v4016_v52 = vpop.f32.mrb[37].mxu0 }
 0x3e9   :  { %v4127_v46 = vrot.slane %v4126_v22, 2  ;;  %v4137_v50 = vrot.slane %v4111_v2, 4  ;;  %v4112_v56 = vsel %vm1288_vm2, %v4096_v47, 0.0  ;;  %v4082_v33 = vadd.f32 %v7826_v12, %v4016_v52 }
 0x3ea   :  { %v4133_v61 = vrot.slane %v4132_v53, 2  ;;  %v4143_v63 = vrot.slane %v4112_v56, 4  ;;  %v4097_v44 = vmax.f32 %v4081_v43, 0.0 }
 0x3eb   :  { %v4128_v27 = vmax.f32 %v4126_v22, %v4127_v46  ;;  %v4138_v23 = vmax.f32 %v4111_v2, %v4137_v50  ;;  %v4098_v16 = vmax.f32 %v4082_v33, 0.0  ;;  %v4020_v60 = vpop.f32.mrb[38].mxu0 }
 0x3ec   :  { %v4134_v13 = vmax.f32 %v4132_v53, %v4133_v61  ;;  %v4144_v31 = vmax.f32 %v4112_v56, %v4143_v63  ;;  %v4113_v42 = vsel %vm1288_vm2, %v4097_v44, 0.0  ;;  %v4083_v14 = vadd.f32 %v7823_v58, %v4020_v60  ;;  %v4022_v28 = vpop.f32.mrb[39].mxu0 }
 0x3ed   :  { %v4129_v45 = vrot.slane %v4128_v27, 1  ;;  %v4139_v34 = vrot.slane %v4138_v23, 2  ;;  %v4149_v21 = vrot.slane %v4113_v42, 4  ;;  %v4114_v11 = vsel %vm1288_vm2, %v4098_v16, 0.0 }
 0x3ee   :  { %v4135_v59 = vrot.slane %v4134_v13, 1  ;;  %v4145_v36 = vrot.slane %v4144_v31, 2  ;;  %v4155_v1 = vrot.slane %v4114_v11, 4  ;;  %v4099_v38 = vmax.f32 %v4083_v14, 0.0 }
 0x3ef   :  { %v4130_v19 = vmax.f32 %v4128_v27, %v4129_v45  ;;  %v4140_v5 = vmax.f32 %v4138_v23, %v4139_v34  ;;  %v4150_v30 = vmax.f32 %v4113_v42, %v4149_v21  ;;  %v4084_v41 = vadd.f32 %v7826_v12, %v4022_v28  ;;  %v4026_v24 = vpop.f32.mrb[40].mxu0 }
 0x3f0   :  { %v4136_v18 = vmax.f32 %v4134_v13, %v4135_v59  ;;  %v4146_v0 = vmax.f32 %v4144_v31, %v4145_v36  ;;  %v4156_v39 = vmax.f32 %v4114_v11, %v4155_v1  ;;  %v4115_v51 = vsel %vm1288_vm2, %v4099_v38, 0.0  ;;  %v4028_v29 = vpop.f32.mrb[41].mxu0 }
 0x3f1   :  { %v4141_v25 = vrot.slane %v4140_v5, 1  ;;  %v4151_v9 = vrot.slane %v4150_v30, 2  ;;  %v4161_v4 = vrot.slane %v4115_v51, 4  ;;  %v4100_v8 = vmax.f32 %v4084_v41, 0.0 }
 0x3f2   :  { %v4147_v7 = vrot.slane %v4146_v0, 1  ;;  %v4157_v40 = vrot.slane %v4156_v39, 2  ;;  %v4085_v15 = vadd.f32 %v7823_v58, %v4026_v24  ;;  %v4086_v48 = vadd.f32 %v7826_v12, %v4028_v29 }
 0x3f3   :  { %v4142_v35 = vmax.f32 %v4140_v5, %v4141_v25  ;;  %v4152_v10 = vmax.f32 %v4150_v30, %v4151_v9  ;;  %v4162_v20 = vmax.f32 %v4115_v51, %v4161_v4  ;;  %v4116_v49 = vsel %vm1288_vm2, %v4100_v8, 0.0  ;;  %v4032_v32 = vpop.f32.mrb[42].mxu0 }
 0x3f4   :  { %v4148_v3 = vmax.f32 %v4146_v0, %v4147_v7  ;;  %v4158_v26 = vmax.f32 %v4156_v39, %v4157_v40  ;;  %v4167_v54 = vrot.slane %v4116_v49, 4  ;;  %v4101_v62 = vmax.f32 %v4085_v15, 0.0  ;;  %v4034_v57 = vpop.f32.mrb[43].mxu0 }
 0x3f5   :  { %v4642_v22 = vsel %vm4365_vm3, %v4142_v35, %v4130_v19  ;;  %v4153_v47 = vrot.slane %v4152_v10, 1  ;;  %v4163_v37 = vrot.slane %v4162_v20, 2  ;;  %v4102_v53 = vmax.f32 %v4086_v48, 0.0 }
 0x3f6   :  { %v4649_v2 = vsel %vm4365_vm3, %v4148_v3, %v4136_v18  ;;  %v4159_v43 = vrot.slane %v4158_v26, 1  ;;  %v4168_v52 = vmax.f32 %v4116_v49, %v4167_v54  ;;  %v4117_v46 = vsel %vm1288_vm2, %v4101_v62, 0.0 }
 0x3f7   :  { %v4154_v50 = vmax.f32 %v4152_v10, %v4153_v47  ;;  %v4164_v56 = vmax.f32 %v4162_v20, %v4163_v37  ;;  %v4173_v33 = vrot.slane %v4117_v46, 4  ;;  %v4118_v61 = vsel %vm1288_vm2, %v4102_v53, 0.0  ;;  %v4038_v63 = vpop.f32.mrb[44].mxu0 }
 0x3f8   :  { %v4160_v44 = vmax.f32 %v4158_v26, %v4159_v43  ;;  %v4169_v27 = vrot.slane %v4168_v52, 2  ;;  %v4179_v23 = vrot.slane %v4118_v61, 4  ;;  %v4087_v16 = vadd.f32 %v7823_v58, %v4032_v32  ;;  %v4040_v60 = vpop.f32.mrb[45].mxu0 }
 0x3f9   :  { %v4643_v13 = vsel %vm4367_vm4, %v4154_v50, %v4642_v22  ;;  %v4165_v31 = vrot.slane %v4164_v56, 1  ;;  %v4174_v42 = vmax.f32 %v4117_v46, %v4173_v33  ;;  %v4088_v14 = vadd.f32 %v7826_v12, %v4034_v57 }
 0x3fa   :  { %v4650_v28 = vsel %vm4367_vm4, %v4160_v44, %v4649_v2  ;;  %v4170_v45 = vmax.f32 %v4168_v52, %v4169_v27  ;;  %v4180_v34 = vmax.f32 %v4118_v61, %v4179_v23  ;;  %v4103_v21 = vmax.f32 %v4087_v16, 0.0 }
 0x3fb   :  { %v4166_v11 = vmax.f32 %v4164_v56, %v4165_v31  ;;  %v4175_v59 = vrot.slane %v4174_v42, 2  ;;  %v4104_v36 = vmax.f32 %v4088_v14, 0.0  ;;  %v4089_v1 = vadd.f32 %v7823_v58, %v4038_v63  ;;  %v4044_v38 = vpop.f32.mrb[46].mxu0 }
 0x3fc   :  { %v4171_v19 = vrot.slane %v4170_v45, 1  ;;  %v4181_v5 = vrot.slane %v4180_v34, 2  ;;  %v4119_v30 = vsel %vm1288_vm2, %v4103_v21, 0.0  ;;  %v4090_v41 = vadd.f32 %v7826_v12, %v4040_v60  ;;  %v4046_v24 = vpop.f32.mrb[47].mxu0 }
 0x3fd   :  { %v4176_v18 = vmax.f32 %v4174_v42, %v4175_v59  ;;  %v4185_v0 = vrot.slane %v4119_v30, 4  ;;  %v4120_v39 = vsel %vm1288_vm2, %v4104_v36, 0.0  ;;  %v4105_v51 = vmax.f32 %v4089_v1, 0.0 }
 0x3fe   :  { %v4172_v29 = vmax.f32 %v4170_v45, %v4171_v19  ;;  %v4182_v25 = vmax.f32 %v4180_v34, %v4181_v5  ;;  %v4191_v9 = vrot.slane %v4120_v39, 4  ;;  %v4106_v4 = vmax.f32 %v4090_v41, 0.0 }
 0x3ff   :  { %v4177_v8 = vrot.slane %v4176_v18, 1  ;;  %v4186_v7 = vmax.f32 %v4119_v30, %v4185_v0  ;;  %v4121_v40 = vsel %vm1288_vm2, %v4105_v51, 0.0  ;;  %v4091_v15 = vadd.f32 %v7823_v58, %v4044_v38  ;;  %v4766_v51 = vld [vmem:[#allocation20 + $0x98] sm:$0xff] }
 0x400   :  { %v4183_v48 = vrot.slane %v4182_v25, 1  ;;  %v4192_v35 = vmax.f32 %v4120_v39, %v4191_v9  ;;  %v4197_v10 = vrot.slane %v4121_v40, 4  ;;  %v4122_v20 = vsel %vm1288_vm2, %v4106_v4, 0.0  ;;  %v4765_v39 = vld [vmem:[#allocation20 + $0x90] sm:$0xff] }
 0x401   :  { %v4178_v49 = vmax.f32 %v4176_v18, %v4177_v8  ;;  %v4187_v32 = vrot.slane %v4186_v7, 2  ;;  %v4203_v3 = vrot.slane %v4122_v20, 4  ;;  %v4107_v26 = vmax.f32 %v4091_v15, 0.0  ;;  %v4748_v18 = vld [vmem:[#allocation20 + $0x8] sm:$0xff]  ;;  %v4749_v8 = vld [vmem:[#allocation20 + $0x10] sm:$0xff] }
 0x402   :  { %v4184_v54 = vmax.f32 %v4182_v25, %v4183_v48  ;;  %v4193_v62 = vrot.slane %v4192_v35, 2  ;;  %v4198_v57 = vmax.f32 %v4121_v40, %v4197_v10  ;;  %v4092_v22 = vadd.f32 %v7826_v12, %v4046_v24  ;;  %v4747_v24 = vld [vmem:[#allocation20] sm:$0xff]  ;;  %v4768_v15 = vld [vmem:[#allocation20 + $0xa8] sm:$0xff] }
 0x403   :  { %v4188_v47 = vmax.f32 %v4186_v7, %v4187_v32  ;;  %v4204_v37 = vmax.f32 %v4122_v20, %v4203_v3  ;;  %v4123_v58 = vsel %vm1288_vm2, %v4107_v26, 0.0  ;;  %v4651_v53 = vsel %vm4369_vm5, %v4172_v29, %v4650_v28  ;;  %v4750_v7 = vld [vmem:[#allocation20 + $0x18] sm:$0xff]  ;;  %v4767_v40 = vld [vmem:[#allocation20 + $0xa0] sm:$0xff]  ;;  %v4752_v20 = vld [vmem:[#allocation20 + $0x28] sm:$0xff] }
 0x404   :  { %v4194_v2 = vmax.f32 %v4192_v35, %v4193_v62  ;;  %v4199_v43 = vrot.slane %v4198_v57, 2  ;;  %v4209_v52 = vrot.slane %v4123_v58, 4  ;;  %v4108_v46 = vmax.f32 %v4092_v22, 0.0  ;;  %v4751_v10 = vld [vmem:[#allocation20 + $0x20] sm:$0xff]  ;;  %v4770_v32 = vld [vmem:[#allocation20 + $0xb8] sm:$0xff]  ;;  %v4772_v22 = vld [vmem:[#allocation20 + $0xc8] sm:$0xff] }
 0x405   :  { %v4189_v50 = vrot.slane %v4188_v47, 1  ;;  %v4205_v56 = vrot.slane %v4204_v37, 2  ;;  %v4652_v33 = vsel %vm4371_vm6, %v4184_v54, %v4651_v53  ;;  %v4644_v61 = vsel %vm4369_vm5, %v4166_v11, %v4643_v13  ;;  %v4753_v54 = vld [vmem:[#allocation20 + $0x30] sm:$0xff]  ;;  %v4754_v62 = vld [vmem:[#allocation20 + $0x38] sm:$0xff]  ;;  %v4756_v53 = vld [vmem:[#allocation20 + $0x48] sm:$0xff] }
 0x406   :  { %v4195_v63 = vrot.slane %v4194_v2, 1  ;;  %v4200_v44 = vmax.f32 %v4198_v57, %v4199_v43  ;;  %v4210_v12 = vmax.f32 %v4123_v58, %v4209_v52  ;;  %v4124_v27 = vsel %vm1288_vm2, %v4108_v46, 0.0  ;;  %v4771_v57 = vld [vmem:[#allocation20 + $0xc0] sm:$0xff]  ;;  %v4774_v43 = vld [vmem:[#allocation20 + $0xd8] sm:$0xff] }
 0x407   :  { %v4190_v23 = vmax.f32 %v4188_v47, %v4189_v50  ;;  %v4206_v16 = vmax.f32 %v4204_v37, %v4205_v56  ;;  %v4215_v60 = vrot.slane %v4124_v27, 4  ;;  %v4645_v31 = vsel %vm4371_vm6, %v4178_v49, %v4644_v61  ;;  %v4769_v49 = vld [vmem:[#allocation20 + $0xb0] sm:$0xff]  ;;  %v4755_v58 = vld [vmem:[#allocation20 + $0x40] sm:$0xff]  ;;  %v4758_v56 = vld [vmem:[#allocation20 + $0x58] sm:$0xff] }
 0x408   :  { %v4196_v42 = vmax.f32 %v4194_v2, %v4195_v63  ;;  %v4201_v14 = vrot.slane %v4200_v44, 1  ;;  %v4211_v28 = vrot.slane %v4210_v12, 2  ;;  %v5972_v25 = vpack.c.bf16 %v4748_v18, %v4747_v24  ;;  %v4773_v2 = vld [vmem:[#allocation20 + $0xd0] sm:$0xff]  ;;  %v4776_v61 = vld [vmem:[#allocation20 + $0xe8] sm:$0xff] }
 0x409   :  { %v4207_v45 = vrot.slane %v4206_v16, 1  ;;  %v4216_v34 = vmax.f32 %v4124_v27, %v4215_v60  ;;  %v4646_v21 = vsel %vm4373_vm7, %v4190_v23, %v4645_v31  ;;  %v5974_v4 = vpack.c.bf16 %v4766_v51, %v4765_v39  ;;  %v4757_v50 = vld [vmem:[#allocation20 + $0x50] sm:$0xff]  ;;  %v4760_v27 = vld [vmem:[#allocation20 + $0x68] sm:$0xff]  ;;  %v4778_v60 = vld [vmem:[#allocation20 + $0xf8] sm:$0xff] }
 0x40a   :  { %v4202_v59 = vmax.f32 %v4200_v44, %v4201_v14  ;;  %v4212_v13 = vmax.f32 %v4210_v12, %v4211_v28  ;;  %v4653_v11 = vsel %vm4373_vm7, %v4196_v42, %v4652_v33  ;;  %v5976_v48 = vpack.c.bf16 %v4750_v7, %v4749_v8  ;;  %v4775_v33 = vld [vmem:[#allocation20 + $0xe0] sm:$0xff]  ;;  %v4761_v31 = vld [vmem:[#allocation20 + $0x70] sm:$0xff]  ;;  %v4762_v14 = vld [vmem:[#allocation20 + $0x78] sm:$0xff] }
 0x40b   :  { %v4208_v36 = vmax.f32 %v4206_v16, %v4207_v45  ;;  %v4217_v1 = vrot.slane %v4216_v34, 2  ;;  %v5978_v35 = vpack.c.bf16 %v4768_v15, %v4767_v40  ;;  %v5980_v3 = vpack.c.bf16 %v4752_v20, %v4751_v10  ;;  %v4759_v12 = vld [vmem:[#allocation20 + $0x60] sm:$0xff]  ;;  %v4777_v16 = vld [vmem:[#allocation20 + $0xf0] sm:$0xff]  ;;  %v4731_v45 = vld [vmem:[#allocation19] sm:$0x3] }
 0x40c   :  { %v4213_v17 = vrot.slane %v4212_v13, 1  ;;  %v4647_v38 = vsel %vm4375_vm8, %v4202_v59, %v4646_v21  ;;  %v5982_v26 = vpack.c.bf16 %v4770_v32, %v4769_v49  ;;  %v5984_v47 = vpack.c.bf16 %v4754_v62, %v4753_v54 }
 0x40d   :  { %v4218_v19 = vmax.f32 %v4216_v34, %v4217_v1  ;;  %v4654_v5 = vsel %vm4375_vm8, %v4208_v36, %v4653_v11  ;;  %v5986_v37 = vpack.c.bf16 %v4772_v22, %v4771_v57  ;;  %v5988_v52 = vpack.c.bf16 %v4756_v53, %v4755_v58 }
 0x40e   :  { %v4214_v30 = vmax.f32 %v4212_v13, %v4213_v17  ;;  %v5990_v46 = vpack.c.bf16 %v4774_v43, %v4773_v2  ;;  %v5992_v63 = vpack.c.bf16 %v4758_v56, %v4757_v50  ;;  %v5994_v44 = vpack.c.bf16 %v4776_v61, %v4775_v33 }
 0x40f   :  { %v4219_v41 = vrot.slane %v4218_v19, 1  ;;  %v5996_v23 = vpack.c.bf16 %v4760_v27, %v4759_v12  ;;  %v5998_v42 = vpack.c.bf16 %v4778_v60, %v4777_v16  ;;  %v6000_v28 = vpack.c.bf16 %v4762_v14, %v4761_v31 }
 0x410   :  { %v4648_v0 = vsel %vm4377_vm9, %v4214_v30, %v4647_v38  ;;  %v4736_v34 = vrot.slane %v4731_v45, %v7983_v6  ;;  %v4740_v21 = vrot.slane %v4731_v45, %v7984_v55 }
 0x411   :  { %v4220_v29 = vmax.f32 %v4218_v19, %v4219_v41  ;;  %v4878_v19 = vld [vmem:[#allocation22] ss:$0 sm:$0xff] }
 0x413   :  { %v4655_v9 = vsel %vm4377_vm9, %v4220_v29, %v4654_v5 }
 0x414   :  { %4722 = vmatprep.mubr.f32.mxu1 %v4655_v9 }
 0x415   :  { %4723 = vmatmul.mubr.f32.vlgmr.msra.gmra.mrb[32].mxu1 %v4648_v0 }
 0x416   :  { %5973 = vmatpush3.bf16.msra.mxu1 %v5972_v25 }
 0x417   :  { %5975 = vmatprep.subr.bf16.mxu1 %v5974_v4 }
 0x41a   :  { %5977 = vmatpush3.bf16.msra.mxu1 %v5976_v48 }
 0x41b   :  { %5979 = vmatprep.subr.bf16.mxu1 %v5978_v35 }
 0x41e   :  { %5981 = vmatpush3.bf16.msra.mxu1 %v5980_v3 }
 0x41f   :  { %5983 = vmatprep.subr.bf16.mxu1 %v5982_v26 }
 0x422   :  { %5985 = vmatpush3.bf16.msra.mxu1 %v5984_v47 }
 0x423   :  { %5987 = vmatprep.subr.bf16.mxu1 %v5986_v37 }
 0x426   :  { %5989 = vmatpush3.bf16.msra.mxu1 %v5988_v52 }
 0x427   :  { %5991 = vmatprep.subr.bf16.mxu1 %v5990_v46 }
 0x42a   :  { %5993 = vmatpush3.bf16.msra.mxu1 %v5992_v63 }
 0x42b   :  { %5995 = vmatprep.subr.bf16.mxu1 %v5994_v44 }
 0x42e   :  { %5997 = vmatpush3.bf16.msra.mxu1 %v5996_v23 }
 0x42f   :  { %5999 = vmatprep.subr.bf16.mxu1 %v5998_v42 }
 0x432   :  { %6001 = vmatpush3.bf16.msra.mxu1 %v6000_v28 }
 0x4e8   :  { %v4724_v59 = vpop.f32.mrb[32].mxu1 }
 0x4e9   :  { %v4743_v13 = vadd.f32 %v4736_v34, %v4724_v59  ;;  %v4726_v11 = vpop.f32.mrb[33].mxu1 }
 0x4ea   :  { %v4744_v36 = vadd.f32 %v4740_v21, %v4726_v11 }
 0x4eb   :  { %v4745_v17 = vmax.f32 %v4743_v13, 0.0 }
 0x4ec   :  { %v4746_v1 = vmax.f32 %v4744_v36, 0.0 }
 0x4ee   :  { %4850 = vmatprep.mubr.f32.mxu1 %v4746_v1 }
 0x4ef   :  { %4851 = vmatmul.mubr.f32.vlgmr.msra.gmra.mrb[34].mxu1 %v4745_v17 }
 0x5c2   :  { %v4911_v38 = vpop.f32.mrb[34].mxu1 }
 0x5c3   :  { %v4912_v5 = vpop.f32.mrb[35].mxu1 }
 0x5c4   :  { %v4913_v30 = vadd.f32 %v4912_v5, %v4911_v38 }
 0x5c6   :  { %v4853_v41 = vadd.f32 %v4913_v30, %v4878_v19 }
 0x5c8   :  { %4856 = vst [vmem:[#allocation23] sm:$0xff] %v4853_v41 }
 0x5c9   :  { %6588 = shalt.err (!%p6585_p10)
}
 0x5ca   :  { %s6589_s28 = scalar_lea.hbm %s7917_s13, 128 }
 0x5cb   :  { %p6590_p11 = scmp.ne.s32.totalorder %s7917_s13, %s6589_s28  ;;  %p6593_p12 = scmp.lt.u32.totalorder %s6589_s28, %s7917_s13 }
 0x5cd   :  { %p6595_p13 = pnand %p6593_p12, %p6590_p11 }
 0x5cf   :  { %6598 = shalt.err (!%p6595_p13)
}
 0x5d0   :  { %4866 = dma.vmem_to_hbm [thread:$0]  %s4864_s5, 128, %s7917_s13, [#allocation4]  }
 0x5d1   :  { %6613 = dma.done.wait [#allocation4], 128  }
 0x5d2   :  { %6614 = vsyncadd [#allocation4], 4294967168 }
 0x5d3   :  { %4870 = vsyncpa [#allocation3], 1 }
 0x5d4   :  { %4871 = vsyncpa [#allocation6], 1 }
 0x5d5   :  { %4872 = vsyncpa [#allocation9], 1 }
 0x5d6   :  { %4873 = vsyncpa [#allocation12], 1 }
 0x5d7   :  { %4874 = vsyncpa [#allocation15], 1 }
 0x5d8   :  { %4875 = vsyncpa [#allocation18], 1 }
 0x5d9   :  { %4876 = vsyncpa [#allocation21], 1 }
 0x5da   :  { %4877 = vsyncpa [#allocation4], 1 }

</bundles_post_ra>
